<compile_context>
chip_gen: v7x
topology: tpu7x:2x2x1
jax: 0.10.0
libtpu: 0.0.40
codegen_flags: <defaults>
</compile_context>

<pallas_src>
import jax
import jax.numpy as jnp
from jax.experimental import pallas as pl
from jax.experimental.pallas import tpu as pltpu
import numpy as np

HIDDEN_SIZE = 5
NUM_LAYERS = 4
OUTPUT_SIZE = 1
INPUT_SIZE = 4   # stand-in for X.shape[2]
SEQ_LEN = 8
BATCH = 2


def _tree_sum(xs):
    """Balanced-tree sum of a list of arrays (shorter dependent chain than a fold)."""
    while len(xs) > 1:
        nxt = [xs[i] + xs[i + 1] for i in range(0, len(xs) - 1, 2)]
        if len(xs) % 2:
            nxt.append(xs[-1])
        xs = nxt
    return xs[0]


# ----------------------------- Pallas kernel --------------------------------
def lstm_kernel(x_ref, w_ref, out_ref):
    # x_ref   : (T*B, D)  time-major flattened input (row = t*B + b), f32
    # w_ref   : (44, 4H)  packed parameter buffer, gate column order [i | f | o | g]:
    #             rows [0, D)                     : layer-0 input->gates weight (D, 4H)
    #             rows [D, D+(L-1)*H)             : layers 1..L-1 input->gates (H, 4H) each
    #             rows [.., +L*H)                 : hidden->gates (H, 4H) per layer
    #             rows [.., +L)                   : combined bias (b_ih + b_hh) per layer
    #             last row                        : [fc_w (H) | fc_b | zeros]
    # out_ref : (B, 1)
    B = out_ref.shape[0]
    H = HIDDEN_SIZE
    L = NUM_LAYERS
    D = x_ref.shape[1]
    T = x_ref.shape[0] // B

    WX0 = 0
    WXR = WX0 + D
    WHH = WXR + (L - 1) * H
    BIA = WHH + L * H
    FC = BIA + L

    x_all = x_ref[...]                                   # (T*B, D)
    # Per-timestep inputs for the current layer (python list of (B, in_dim) values).
    inputs = [x_all[t * B:(t + 1) * B, :] for t in range(T)]

    h_last = None
    for l in range(L):                                   # static -> fully unrolled
        in_dim = D if l == 0 else H
        wx_off = WX0 if l == 0 else WXR + (l - 1) * H
        # Weight rows pre-sliced ONCE per layer (off the h->h chain), each (1, 4H).
        wx_rows = [w_ref[wx_off + k:wx_off + k + 1, :] for k in range(in_dim)]
        wh_rows = [w_ref[WHH + l * H + k:WHH + l * H + k + 1, :] for k in range(H)]
        bias = w_ref[BIA + l:BIA + l + 1, :]             # (1, 4H)

        h = None
        c = None
        next_inputs = []
        for t in range(T):                               # static -> fully unrolled
            x_t = inputs[t]                              # (B, in_dim)
            # Input projection + bias: exact-f32 VPU broadcast-MACs. Depends only on
            # the previous layer's h at this same timestep -> off the h->h chain.
            pre = bias + _tree_sum([x_t[:, k:k + 1] * wx_rows[k] for k in range(in_dim)])
            if t > 0:
                # Recurrent term at FULL gate width (B, 4H): 5 lane-broadcasts of h
                # columns + 5 MACs + 1 tree-sum per step (the serial chain).
                pre = pre + _tree_sum([h[:, k:k + 1] * wh_rows[k] for k in range(H)])

            # Fused nonlinearities: gates packed [i | f | o | g] ->
            # one sigmoid over 3H lanes, one tanh over H lanes per step.
            s = jax.nn.sigmoid(pre[:, :3 * H])           # (B, 3H)
            g_g = jnp.tanh(pre[:, 3 * H:])               # (B, H)
            i_g = s[:, :H]
            f_g = s[:, H:2 * H]
            o_g = s[:, 2 * H:3 * H]

            c = i_g * g_g if t == 0 else f_g * c + i_g * g_g
            h = o_g * jnp.tanh(c)
            if l < L - 1:
                next_inputs.append(h)                    # last layer keeps only h_last
        h_last = h
        inputs = next_inputs

    # fc head on the last timestep of the last layer: exact-f32 lane reduce (no MXU).
    fcw = w_ref[FC:FC + 1, :H]                           # (1, H)
    fcb = w_ref[FC:FC + 1, H:H + 1]                      # (1, 1)
    out_ref[...] = jnp.sum(h_last * fcw, axis=1, keepdims=True) + fcb


# ----------------------------- wrapper ---------------------------------------
@jax.jit
def lstm_forward(x, w_packed):
    """x: (B, T, D) batch_first float32. Returns (B, 1) = fc(lstm(x)[:, -1, :])."""
    B, T, D = x.shape
    # time-major + flattened: row t*B + b  (fused into the same executable by jit)
    x_flat = jnp.transpose(x, (1, 0, 2)).reshape(T * B, D).astype(jnp.float32)
    return pl.pallas_call(
        lstm_kernel,
        out_shape=jax.ShapeDtypeStruct((B, OUTPUT_SIZE), jnp.float32),
        in_specs=[pl.BlockSpec(memory_space=pltpu.MemorySpace.VMEM)] * 2,
        out_specs=pl.BlockSpec(memory_space=pltpu.MemorySpace.VMEM),
    )(x_flat, w_packed)


# ----------------------------- params ----------------------------------------
def init_params(key):
    """Deterministic init mimicking nn.LSTM / nn.Linear default U(-1/sqrt(H), 1/sqrt(H)).

    Returns (w_packed, raw):
      w_packed : single (44, 4H) f32 buffer, gate columns reordered to [i|f|o|g],
                 weights pre-transposed for (row = input dim, col = gate) MAC layout.
      raw      : torch-layout params for the float64 reference.
    """
    H, D, L = HIDDEN_SIZE, INPUT_SIZE, NUM_LAYERS
    k = 1.0 / np.sqrt(H)
    keys = iter(jax.random.split(key, 4 * L + 2))
    uni = lambda kk, shp: jax.random.uniform(kk, shp, jnp.float32, -k, k)

    wihs, whhs, bsum = [], [], []
    for l in range(L):
        in_dim = D if l == 0 else H
        w_ih = uni(next(keys), (4 * H, in_dim))   # torch layout (4H, in), gate order i,f,g,o
        w_hh = uni(next(keys), (4 * H, H))
        b_ih = uni(next(keys), (4 * H,))
        b_hh = uni(next(keys), (4 * H,))
        wihs.append(w_ih)
        whhs.append(w_hh)
        bsum.append(b_ih + b_hh)

    fcw = uni(next(keys), (OUTPUT_SIZE, H))
    fcb = uni(next(keys), (OUTPUT_SIZE,))

    # Gate-row permutation: torch [i|f|g|o] -> kernel [i|f|o|g] (sigmoid block first).
    perm = np.concatenate([np.arange(0, 2 * H),
                           np.arange(3 * H, 4 * H),
                           np.arange(2 * H, 3 * H)])

    rows = [np.asarray(wihs[0])[perm].T]                           # (D, 4H)
    for l in range(1, L):
        rows.append(np.asarray(wihs[l])[perm].T)                   # (H, 4H) each
    for l in range(L):
        rows.append(np.asarray(whhs[l])[perm].T)                   # (H, 4H) each
    for l in range(L):
        rows.append(np.asarray(bsum[l])[perm].reshape(1, 4 * H))   # (1, 4H) each
    fc_row = np.zeros((1, 4 * H), np.float32)
    fc_row[0, :H] = np.asarray(fcw).reshape(-1)
    fc_row[0, H] = float(np.asarray(fcb).reshape(()))
    rows.append(fc_row)

    w_packed = jnp.asarray(np.concatenate(rows, axis=0), jnp.float32)  # (44, 4H)
    raw = (wihs, whhs, bsum, fcw, fcb)
    return w_packed, raw


# ----------------------------- reference (host, float64) ---------------------
def lstm_reference_np(x, wihs, whhs, bsum, fcw, fcb):
    """Pure-numpy float64 reference matching torch.nn.LSTM (batch_first) + Linear."""
    x = np.asarray(x, np.float64)
    wihs = [np.asarray(w, np.float64) for w in wihs]
    whhs = [np.asarray(w, np.float64) for w in whhs]
    bsum = [np.asarray(b, np.float64) for b in bsum]
    fcw = np.asarray(fcw, np.float64)
    fcb = np.asarray(fcb, np.float64)

    B, T, _ = x.shape
    H = HIDDEN_SIZE
    sigmoid = lambda z: 1.0 / (1.0 + np.exp(-z))

    seq = x
    for l in range(NUM_LAYERS):
        h = np.zeros((B, H))
        c = np.zeros((B, H))
        outs = []
        for t in range(T):
            gates = seq[:, t, :] @ wihs[l].T + h @ whhs[l].T + bsum[l]
            i = sigmoid(gates[:, :H])
            f = sigmoid(gates[:, H:2 * H])
            g = np.tanh(gates[:, 2 * H:3 * H])
            o = sigmoid(gates[:, 3 * H:])
            c = f * c + i * g
            h = o * np.tanh(c)
            outs.append(h)
        seq = np.stack(outs, axis=1)
    return seq[:, -1, :] @ fcw.T + fcb


# ----------------------------- main -------------------------------------------
if __name__ == "__main__":
    key = jax.random.PRNGKey(0)
    k_x, k_p = jax.random.split(key)

    B, T = BATCH, SEQ_LEN
    x = jax.random.uniform(k_x, (B, T, INPUT_SIZE), jnp.float32)  # MinMax-scaled-like [0,1)

    w_packed, raw = init_params(k_p)

    out = jax.block_until_ready(lstm_forward(x, w_packed))

    ref = lstm_reference_np(np.asarray(x), *raw)
    np.testing.assert_allclose(np.asarray(out), ref, rtol=1e-3, atol=1e-3)

    assert out.shape == (B, OUTPUT_SIZE)
    print("KERNEL_OK")
</pallas_src>

<mosaic_0001>
module attributes {stable_mosaic.version = 11 : i64} {
  func.func @lstm_kernel(%arg0: memref<16x4xf32, #tpu.memory_space<vmem>>, %arg1: memref<44x20xf32, #tpu.memory_space<vmem>>, %arg2: memref<2x1xf32, #tpu.memory_space<vmem>>) attributes {dimension_semantics = [], scalar_prefetch = 0 : i64, scratch_operands = 0 : i64, tpu.core_type = #tpu.core_type<tc>} {
    %c0 = arith.constant 0 : index
    %c0_0 = arith.constant 0 : index
    %0 = vector.load %arg0[%c0, %c0_0] : memref<16x4xf32, #tpu.memory_space<vmem>>, vector<16x4xf32>
    %1 = vector.extract_strided_slice %0 {offsets = [0, 0], sizes = [2, 4], strides = [1, 1]} : vector<16x4xf32> to vector<2x4xf32>
    %2 = vector.extract_strided_slice %0 {offsets = [2, 0], sizes = [2, 4], strides = [1, 1]} : vector<16x4xf32> to vector<2x4xf32>
    %3 = vector.extract_strided_slice %0 {offsets = [4, 0], sizes = [2, 4], strides = [1, 1]} : vector<16x4xf32> to vector<2x4xf32>
    %4 = vector.extract_strided_slice %0 {offsets = [6, 0], sizes = [2, 4], strides = [1, 1]} : vector<16x4xf32> to vector<2x4xf32>
    %5 = vector.extract_strided_slice %0 {offsets = [8, 0], sizes = [2, 4], strides = [1, 1]} : vector<16x4xf32> to vector<2x4xf32>
    %6 = vector.extract_strided_slice %0 {offsets = [10, 0], sizes = [2, 4], strides = [1, 1]} : vector<16x4xf32> to vector<2x4xf32>
    %7 = vector.extract_strided_slice %0 {offsets = [12, 0], sizes = [2, 4], strides = [1, 1]} : vector<16x4xf32> to vector<2x4xf32>
    %8 = vector.extract_strided_slice %0 {offsets = [14, 0], sizes = [2, 4], strides = [1, 1]} : vector<16x4xf32> to vector<2x4xf32>
    %c0_1 = arith.constant 0 : index
    %c0_2 = arith.constant 0 : index
    %9 = vector.load %arg1[%c0_1, %c0_2] : memref<44x20xf32, #tpu.memory_space<vmem>>, vector<1x20xf32>
    %c1 = arith.constant 1 : index
    %c0_3 = arith.constant 0 : index
    %10 = vector.load %arg1[%c1, %c0_3] : memref<44x20xf32, #tpu.memory_space<vmem>>, vector<1x20xf32>
    %c2 = arith.constant 2 : index
    %c0_4 = arith.constant 0 : index
    %11 = vector.load %arg1[%c2, %c0_4] : memref<44x20xf32, #tpu.memory_space<vmem>>, vector<1x20xf32>
    %c3 = arith.constant 3 : index
    %c0_5 = arith.constant 0 : index
    %12 = vector.load %arg1[%c3, %c0_5] : memref<44x20xf32, #tpu.memory_space<vmem>>, vector<1x20xf32>
    %c19 = arith.constant 19 : index
    %c0_6 = arith.constant 0 : index
    %13 = vector.load %arg1[%c19, %c0_6] : memref<44x20xf32, #tpu.memory_space<vmem>>, vector<1x20xf32>
    %c20 = arith.constant 20 : index
    %c0_7 = arith.constant 0 : index
    %14 = vector.load %arg1[%c20, %c0_7] : memref<44x20xf32, #tpu.memory_space<vmem>>, vector<1x20xf32>
    %c21 = arith.constant 21 : index
    %c0_8 = arith.constant 0 : index
    %15 = vector.load %arg1[%c21, %c0_8] : memref<44x20xf32, #tpu.memory_space<vmem>>, vector<1x20xf32>
    %c22 = arith.constant 22 : index
    %c0_9 = arith.constant 0 : index
    %16 = vector.load %arg1[%c22, %c0_9] : memref<44x20xf32, #tpu.memory_space<vmem>>, vector<1x20xf32>
    %c23 = arith.constant 23 : index
    %c0_10 = arith.constant 0 : index
    %17 = vector.load %arg1[%c23, %c0_10] : memref<44x20xf32, #tpu.memory_space<vmem>>, vector<1x20xf32>
    %c39 = arith.constant 39 : index
    %c0_11 = arith.constant 0 : index
    %18 = vector.load %arg1[%c39, %c0_11] : memref<44x20xf32, #tpu.memory_space<vmem>>, vector<1x20xf32>
    %19 = vector.extract_strided_slice %1 {offsets = [0, 0], sizes = [2, 1], strides = [1, 1]} : vector<2x4xf32> to vector<2x1xf32>
    %20 = vector.broadcast %19 : vector<2x1xf32> to vector<2x20xf32>
    %21 = vector.broadcast %9 : vector<1x20xf32> to vector<2x20xf32>
    %22 = arith.mulf %20, %21 : vector<2x20xf32>
    %23 = vector.extract_strided_slice %1 {offsets = [0, 1], sizes = [2, 1], strides = [1, 1]} : vector<2x4xf32> to vector<2x1xf32>
    %24 = vector.broadcast %23 : vector<2x1xf32> to vector<2x20xf32>
    %25 = vector.broadcast %10 : vector<1x20xf32> to vector<2x20xf32>
    %26 = arith.mulf %24, %25 : vector<2x20xf32>
    %27 = vector.extract_strided_slice %1 {offsets = [0, 2], sizes = [2, 1], strides = [1, 1]} : vector<2x4xf32> to vector<2x1xf32>
    %28 = vector.broadcast %27 : vector<2x1xf32> to vector<2x20xf32>
    %29 = vector.broadcast %11 : vector<1x20xf32> to vector<2x20xf32>
    %30 = arith.mulf %28, %29 : vector<2x20xf32>
    %31 = vector.extract_strided_slice %1 {offsets = [0, 3], sizes = [2, 1], strides = [1, 1]} : vector<2x4xf32> to vector<2x1xf32>
    %32 = vector.broadcast %31 : vector<2x1xf32> to vector<2x20xf32>
    %33 = vector.broadcast %12 : vector<1x20xf32> to vector<2x20xf32>
    %34 = arith.mulf %32, %33 : vector<2x20xf32>
    %35 = arith.addf %22, %26 : vector<2x20xf32>
    %36 = arith.addf %30, %34 : vector<2x20xf32>
    %37 = arith.addf %35, %36 : vector<2x20xf32>
    %38 = vector.broadcast %18 : vector<1x20xf32> to vector<2x20xf32>
    %39 = arith.addf %38, %37 : vector<2x20xf32>
    %40 = vector.extract_strided_slice %39 {offsets = [0, 0], sizes = [2, 15], strides = [1, 1]} : vector<2x20xf32> to vector<2x15xf32>
    %41 = arith.negf %40 : vector<2x15xf32>
    %42 = math.exp %41 : vector<2x15xf32>
    %cst = arith.constant 1.000000e+00 : f32
    %43 = vector.broadcast %cst : f32 to vector<2x15xf32>
    %44 = arith.addf %43, %42 : vector<2x15xf32>
    %45 = arith.divf %43, %44 : vector<2x15xf32>
    %46 = vector.extract_strided_slice %39 {offsets = [0, 15], sizes = [2, 5], strides = [1, 1]} : vector<2x20xf32> to vector<2x5xf32>
    %47 = math.tanh %46 : vector<2x5xf32>
    %48 = vector.extract_strided_slice %45 {offsets = [0, 0], sizes = [2, 5], strides = [1, 1]} : vector<2x15xf32> to vector<2x5xf32>
    %49 = vector.extract_strided_slice %45 {offsets = [0, 10], sizes = [2, 5], strides = [1, 1]} : vector<2x15xf32> to vector<2x5xf32>
    %50 = arith.mulf %48, %47 : vector<2x5xf32>
    %51 = math.tanh %50 : vector<2x5xf32>
    %52 = arith.mulf %49, %51 : vector<2x5xf32>
    %53 = vector.extract_strided_slice %2 {offsets = [0, 0], sizes = [2, 1], strides = [1, 1]} : vector<2x4xf32> to vector<2x1xf32>
    %54 = vector.broadcast %53 : vector<2x1xf32> to vector<2x20xf32>
    %55 = vector.broadcast %9 : vector<1x20xf32> to vector<2x20xf32>
    %56 = arith.mulf %54, %55 : vector<2x20xf32>
    %57 = vector.extract_strided_slice %2 {offsets = [0, 1], sizes = [2, 1], strides = [1, 1]} : vector<2x4xf32> to vector<2x1xf32>
    %58 = vector.broadcast %57 : vector<2x1xf32> to vector<2x20xf32>
    %59 = vector.broadcast %10 : vector<1x20xf32> to vector<2x20xf32>
    %60 = arith.mulf %58, %59 : vector<2x20xf32>
    %61 = vector.extract_strided_slice %2 {offsets = [0, 2], sizes = [2, 1], strides = [1, 1]} : vector<2x4xf32> to vector<2x1xf32>
    %62 = vector.broadcast %61 : vector<2x1xf32> to vector<2x20xf32>
    %63 = vector.broadcast %11 : vector<1x20xf32> to vector<2x20xf32>
    %64 = arith.mulf %62, %63 : vector<2x20xf32>
    %65 = vector.extract_strided_slice %2 {offsets = [0, 3], sizes = [2, 1], strides = [1, 1]} : vector<2x4xf32> to vector<2x1xf32>
    %66 = vector.broadcast %65 : vector<2x1xf32> to vector<2x20xf32>
    %67 = vector.broadcast %12 : vector<1x20xf32> to vector<2x20xf32>
    %68 = arith.mulf %66, %67 : vector<2x20xf32>
    %69 = arith.addf %56, %60 : vector<2x20xf32>
    %70 = arith.addf %64, %68 : vector<2x20xf32>
    %71 = arith.addf %69, %70 : vector<2x20xf32>
    %72 = vector.broadcast %18 : vector<1x20xf32> to vector<2x20xf32>
    %73 = arith.addf %72, %71 : vector<2x20xf32>
    %74 = vector.extract_strided_slice %52 {offsets = [0, 0], sizes = [2, 1], strides = [1, 1]} : vector<2x5xf32> to vector<2x1xf32>
    %75 = vector.broadcast %74 : vector<2x1xf32> to vector<2x20xf32>
    %76 = vector.broadcast %13 : vector<1x20xf32> to vector<2x20xf32>
    %77 = arith.mulf %75, %76 : vector<2x20xf32>
    %78 = vector.extract_strided_slice %52 {offsets = [0, 1], sizes = [2, 1], strides = [1, 1]} : vector<2x5xf32> to vector<2x1xf32>
    %79 = vector.broadcast %78 : vector<2x1xf32> to vector<2x20xf32>
    %80 = vector.broadcast %14 : vector<1x20xf32> to vector<2x20xf32>
    %81 = arith.mulf %79, %80 : vector<2x20xf32>
    %82 = vector.extract_strided_slice %52 {offsets = [0, 2], sizes = [2, 1], strides = [1, 1]} : vector<2x5xf32> to vector<2x1xf32>
    %83 = vector.broadcast %82 : vector<2x1xf32> to vector<2x20xf32>
    %84 = vector.broadcast %15 : vector<1x20xf32> to vector<2x20xf32>
    %85 = arith.mulf %83, %84 : vector<2x20xf32>
    %86 = vector.extract_strided_slice %52 {offsets = [0, 3], sizes = [2, 1], strides = [1, 1]} : vector<2x5xf32> to vector<2x1xf32>
    %87 = vector.broadcast %86 : vector<2x1xf32> to vector<2x20xf32>
    %88 = vector.broadcast %16 : vector<1x20xf32> to vector<2x20xf32>
    %89 = arith.mulf %87, %88 : vector<2x20xf32>
    %90 = vector.extract_strided_slice %52 {offsets = [0, 4], sizes = [2, 1], strides = [1, 1]} : vector<2x5xf32> to vector<2x1xf32>
    %91 = vector.broadcast %90 : vector<2x1xf32> to vector<2x20xf32>
    %92 = vector.broadcast %17 : vector<1x20xf32> to vector<2x20xf32>
    %93 = arith.mulf %91, %92 : vector<2x20xf32>
    %94 = arith.addf %77, %81 : vector<2x20xf32>
    %95 = arith.addf %85, %89 : vector<2x20xf32>
    %96 = arith.addf %94, %95 : vector<2x20xf32>
    %97 = arith.addf %96, %93 : vector<2x20xf32>
    %98 = arith.addf %73, %97 : vector<2x20xf32>
    %99 = vector.extract_strided_slice %98 {offsets = [0, 0], sizes = [2, 15], strides = [1, 1]} : vector<2x20xf32> to vector<2x15xf32>
    %100 = arith.negf %99 : vector<2x15xf32>
    %101 = math.exp %100 : vector<2x15xf32>
    %cst_12 = arith.constant 1.000000e+00 : f32
    %102 = vector.broadcast %cst_12 : f32 to vector<2x15xf32>
    %103 = arith.addf %102, %101 : vector<2x15xf32>
    %104 = arith.divf %102, %103 : vector<2x15xf32>
    %105 = vector.extract_strided_slice %98 {offsets = [0, 15], sizes = [2, 5], strides = [1, 1]} : vector<2x20xf32> to vector<2x5xf32>
    %106 = math.tanh %105 : vector<2x5xf32>
    %107 = vector.extract_strided_slice %104 {offsets = [0, 0], sizes = [2, 5], strides = [1, 1]} : vector<2x15xf32> to vector<2x5xf32>
    %108 = vector.extract_strided_slice %104 {offsets = [0, 5], sizes = [2, 5], strides = [1, 1]} : vector<2x15xf32> to vector<2x5xf32>
    %109 = vector.extract_strided_slice %104 {offsets = [0, 10], sizes = [2, 5], strides = [1, 1]} : vector<2x15xf32> to vector<2x5xf32>
    %110 = arith.mulf %108, %50 : vector<2x5xf32>
    %111 = arith.mulf %107, %106 : vector<2x5xf32>
    %112 = arith.addf %110, %111 : vector<2x5xf32>
    %113 = math.tanh %112 : vector<2x5xf32>
    %114 = arith.mulf %109, %113 : vector<2x5xf32>
    %115 = vector.extract_strided_slice %3 {offsets = [0, 0], sizes = [2, 1], strides = [1, 1]} : vector<2x4xf32> to vector<2x1xf32>
    %116 = vector.broadcast %115 : vector<2x1xf32> to vector<2x20xf32>
    %117 = vector.broadcast %9 : vector<1x20xf32> to vector<2x20xf32>
    %118 = arith.mulf %116, %117 : vector<2x20xf32>
    %119 = vector.extract_strided_slice %3 {offsets = [0, 1], sizes = [2, 1], strides = [1, 1]} : vector<2x4xf32> to vector<2x1xf32>
    %120 = vector.broadcast %119 : vector<2x1xf32> to vector<2x20xf32>
    %121 = vector.broadcast %10 : vector<1x20xf32> to vector<2x20xf32>
    %122 = arith.mulf %120, %121 : vector<2x20xf32>
    %123 = vector.extract_strided_slice %3 {offsets = [0, 2], sizes = [2, 1], strides = [1, 1]} : vector<2x4xf32> to vector<2x1xf32>
    %124 = vector.broadcast %123 : vector<2x1xf32> to vector<2x20xf32>
    %125 = vector.broadcast %11 : vector<1x20xf32> to vector<2x20xf32>
    %126 = arith.mulf %124, %125 : vector<2x20xf32>
    %127 = vector.extract_strided_slice %3 {offsets = [0, 3], sizes = [2, 1], strides = [1, 1]} : vector<2x4xf32> to vector<2x1xf32>
    %128 = vector.broadcast %127 : vector<2x1xf32> to vector<2x20xf32>
    %129 = vector.broadcast %12 : vector<1x20xf32> to vector<2x20xf32>
    %130 = arith.mulf %128, %129 : vector<2x20xf32>
    %131 = arith.addf %118, %122 : vector<2x20xf32>
    %132 = arith.addf %126, %130 : vector<2x20xf32>
    %133 = arith.addf %131, %132 : vector<2x20xf32>
    %134 = vector.broadcast %18 : vector<1x20xf32> to vector<2x20xf32>
    %135 = arith.addf %134, %133 : vector<2x20xf32>
    %136 = vector.extract_strided_slice %114 {offsets = [0, 0], sizes = [2, 1], strides = [1, 1]} : vector<2x5xf32> to vector<2x1xf32>
    %137 = vector.broadcast %136 : vector<2x1xf32> to vector<2x20xf32>
    %138 = vector.broadcast %13 : vector<1x20xf32> to vector<2x20xf32>
    %139 = arith.mulf %137, %138 : vector<2x20xf32>
    %140 = vector.extract_strided_slice %114 {offsets = [0, 1], sizes = [2, 1], strides = [1, 1]} : vector<2x5xf32> to vector<2x1xf32>
    %141 = vector.broadcast %140 : vector<2x1xf32> to vector<2x20xf32>
    %142 = vector.broadcast %14 : vector<1x20xf32> to vector<2x20xf32>
    %143 = arith.mulf %141, %142 : vector<2x20xf32>
    %144 = vector.extract_strided_slice %114 {offsets = [0, 2], sizes = [2, 1], strides = [1, 1]} : vector<2x5xf32> to vector<2x1xf32>
    %145 = vector.broadcast %144 : vector<2x1xf32> to vector<2x20xf32>
    %146 = vector.broadcast %15 : vector<1x20xf32> to vector<2x20xf32>
    %147 = arith.mulf %145, %146 : vector<2x20xf32>
    %148 = vector.extract_strided_slice %114 {offsets = [0, 3], sizes = [2, 1], strides = [1, 1]} : vector<2x5xf32> to vector<2x1xf32>
    %149 = vector.broadcast %148 : vector<2x1xf32> to vector<2x20xf32>
    %150 = vector.broadcast %16 : vector<1x20xf32> to vector<2x20xf32>
    %151 = arith.mulf %149, %150 : vector<2x20xf32>
    %152 = vector.extract_strided_slice %114 {offsets = [0, 4], sizes = [2, 1], strides = [1, 1]} : vector<2x5xf32> to vector<2x1xf32>
    %153 = vector.broadcast %152 : vector<2x1xf32> to vector<2x20xf32>
    %154 = vector.broadcast %17 : vector<1x20xf32> to vector<2x20xf32>
    %155 = arith.mulf %153, %154 : vector<2x20xf32>
    %156 = arith.addf %139, %143 : vector<2x20xf32>
    %157 = arith.addf %147, %151 : vector<2x20xf32>
    %158 = arith.addf %156, %157 : vector<2x20xf32>
    %159 = arith.addf %158, %155 : vector<2x20xf32>
    %160 = arith.addf %135, %159 : vector<2x20xf32>
    %161 = vector.extract_strided_slice %160 {offsets = [0, 0], sizes = [2, 15], strides = [1, 1]} : vector<2x20xf32> to vector<2x15xf32>
    %162 = arith.negf %161 : vector<2x15xf32>
    %163 = math.exp %162 : vector<2x15xf32>
    %cst_13 = arith.constant 1.000000e+00 : f32
    %164 = vector.broadcast %cst_13 : f32 to vector<2x15xf32>
    %165 = arith.addf %164, %163 : vector<2x15xf32>
    %166 = arith.divf %164, %165 : vector<2x15xf32>
    %167 = vector.extract_strided_slice %160 {offsets = [0, 15], sizes = [2, 5], strides = [1, 1]} : vector<2x20xf32> to vector<2x5xf32>
    %168 = math.tanh %167 : vector<2x5xf32>
    %169 = vector.extract_strided_slice %166 {offsets = [0, 0], sizes = [2, 5], strides = [1, 1]} : vector<2x15xf32> to vector<2x5xf32>
    %170 = vector.extract_strided_slice %166 {offsets = [0, 5], sizes = [2, 5], strides = [1, 1]} : vector<2x15xf32> to vector<2x5xf32>
    %171 = vector.extract_strided_slice %166 {offsets = [0, 10], sizes = [2, 5], strides = [1, 1]} : vector<2x15xf32> to vector<2x5xf32>
    %172 = arith.mulf %170, %112 : vector<2x5xf32>
    %173 = arith.mulf %169, %168 : vector<2x5xf32>
    %174 = arith.addf %172, %173 : vector<2x5xf32>
    %175 = math.tanh %174 : vector<2x5xf32>
    %176 = arith.mulf %171, %175 : vector<2x5xf32>
    %177 = vector.extract_strided_slice %4 {offsets = [0, 0], sizes = [2, 1], strides = [1, 1]} : vector<2x4xf32> to vector<2x1xf32>
    %178 = vector.broadcast %177 : vector<2x1xf32> to vector<2x20xf32>
    %179 = vector.broadcast %9 : vector<1x20xf32> to vector<2x20xf32>
    %180 = arith.mulf %178, %179 : vector<2x20xf32>
    %181 = vector.extract_strided_slice %4 {offsets = [0, 1], sizes = [2, 1], strides = [1, 1]} : vector<2x4xf32> to vector<2x1xf32>
    %182 = vector.broadcast %181 : vector<2x1xf32> to vector<2x20xf32>
    %183 = vector.broadcast %10 : vector<1x20xf32> to vector<2x20xf32>
    %184 = arith.mulf %182, %183 : vector<2x20xf32>
    %185 = vector.extract_strided_slice %4 {offsets = [0, 2], sizes = [2, 1], strides = [1, 1]} : vector<2x4xf32> to vector<2x1xf32>
    %186 = vector.broadcast %185 : vector<2x1xf32> to vector<2x20xf32>
    %187 = vector.broadcast %11 : vector<1x20xf32> to vector<2x20xf32>
    %188 = arith.mulf %186, %187 : vector<2x20xf32>
    %189 = vector.extract_strided_slice %4 {offsets = [0, 3], sizes = [2, 1], strides = [1, 1]} : vector<2x4xf32> to vector<2x1xf32>
    %190 = vector.broadcast %189 : vector<2x1xf32> to vector<2x20xf32>
    %191 = vector.broadcast %12 : vector<1x20xf32> to vector<2x20xf32>
    %192 = arith.mulf %190, %191 : vector<2x20xf32>
    %193 = arith.addf %180, %184 : vector<2x20xf32>
    %194 = arith.addf %188, %192 : vector<2x20xf32>
    %195 = arith.addf %193, %194 : vector<2x20xf32>
    %196 = vector.broadcast %18 : vector<1x20xf32> to vector<2x20xf32>
    %197 = arith.addf %196, %195 : vector<2x20xf32>
    %198 = vector.extract_strided_slice %176 {offsets = [0, 0], sizes = [2, 1], strides = [1, 1]} : vector<2x5xf32> to vector<2x1xf32>
    %199 = vector.broadcast %198 : vector<2x1xf32> to vector<2x20xf32>
    %200 = vector.broadcast %13 : vector<1x20xf32> to vector<2x20xf32>
    %201 = arith.mulf %199, %200 : vector<2x20xf32>
    %202 = vector.extract_strided_slice %176 {offsets = [0, 1], sizes = [2, 1], strides = [1, 1]} : vector<2x5xf32> to vector<2x1xf32>
    %203 = vector.broadcast %202 : vector<2x1xf32> to vector<2x20xf32>
    %204 = vector.broadcast %14 : vector<1x20xf32> to vector<2x20xf32>
    %205 = arith.mulf %203, %204 : vector<2x20xf32>
    %206 = vector.extract_strided_slice %176 {offsets = [0, 2], sizes = [2, 1], strides = [1, 1]} : vector<2x5xf32> to vector<2x1xf32>
    %207 = vector.broadcast %206 : vector<2x1xf32> to vector<2x20xf32>
    %208 = vector.broadcast %15 : vector<1x20xf32> to vector<2x20xf32>
    %209 = arith.mulf %207, %208 : vector<2x20xf32>
    %210 = vector.extract_strided_slice %176 {offsets = [0, 3], sizes = [2, 1], strides = [1, 1]} : vector<2x5xf32> to vector<2x1xf32>
    %211 = vector.broadcast %210 : vector<2x1xf32> to vector<2x20xf32>
    %212 = vector.broadcast %16 : vector<1x20xf32> to vector<2x20xf32>
    %213 = arith.mulf %211, %212 : vector<2x20xf32>
    %214 = vector.extract_strided_slice %176 {offsets = [0, 4], sizes = [2, 1], strides = [1, 1]} : vector<2x5xf32> to vector<2x1xf32>
    %215 = vector.broadcast %214 : vector<2x1xf32> to vector<2x20xf32>
    %216 = vector.broadcast %17 : vector<1x20xf32> to vector<2x20xf32>
    %217 = arith.mulf %215, %216 : vector<2x20xf32>
    %218 = arith.addf %201, %205 : vector<2x20xf32>
    %219 = arith.addf %209, %213 : vector<2x20xf32>
    %220 = arith.addf %218, %219 : vector<2x20xf32>
    %221 = arith.addf %220, %217 : vector<2x20xf32>
    %222 = arith.addf %197, %221 : vector<2x20xf32>
    %223 = vector.extract_strided_slice %222 {offsets = [0, 0], sizes = [2, 15], strides = [1, 1]} : vector<2x20xf32> to vector<2x15xf32>
    %224 = arith.negf %223 : vector<2x15xf32>
    %225 = math.exp %224 : vector<2x15xf32>
    %cst_14 = arith.constant 1.000000e+00 : f32
    %226 = vector.broadcast %cst_14 : f32 to vector<2x15xf32>
    %227 = arith.addf %226, %225 : vector<2x15xf32>
    %228 = arith.divf %226, %227 : vector<2x15xf32>
    %229 = vector.extract_strided_slice %222 {offsets = [0, 15], sizes = [2, 5], strides = [1, 1]} : vector<2x20xf32> to vector<2x5xf32>
    %230 = math.tanh %229 : vector<2x5xf32>
    %231 = vector.extract_strided_slice %228 {offsets = [0, 0], sizes = [2, 5], strides = [1, 1]} : vector<2x15xf32> to vector<2x5xf32>
    %232 = vector.extract_strided_slice %228 {offsets = [0, 5], sizes = [2, 5], strides = [1, 1]} : vector<2x15xf32> to vector<2x5xf32>
    %233 = vector.extract_strided_slice %228 {offsets = [0, 10], sizes = [2, 5], strides = [1, 1]} : vector<2x15xf32> to vector<2x5xf32>
    %234 = arith.mulf %232, %174 : vector<2x5xf32>
    %235 = arith.mulf %231, %230 : vector<2x5xf32>
    %236 = arith.addf %234, %235 : vector<2x5xf32>
    %237 = math.tanh %236 : vector<2x5xf32>
    %238 = arith.mulf %233, %237 : vector<2x5xf32>
    %239 = vector.extract_strided_slice %5 {offsets = [0, 0], sizes = [2, 1], strides = [1, 1]} : vector<2x4xf32> to vector<2x1xf32>
    %240 = vector.broadcast %239 : vector<2x1xf32> to vector<2x20xf32>
    %241 = vector.broadcast %9 : vector<1x20xf32> to vector<2x20xf32>
    %242 = arith.mulf %240, %241 : vector<2x20xf32>
    %243 = vector.extract_strided_slice %5 {offsets = [0, 1], sizes = [2, 1], strides = [1, 1]} : vector<2x4xf32> to vector<2x1xf32>
    %244 = vector.broadcast %243 : vector<2x1xf32> to vector<2x20xf32>
    %245 = vector.broadcast %10 : vector<1x20xf32> to vector<2x20xf32>
    %246 = arith.mulf %244, %245 : vector<2x20xf32>
    %247 = vector.extract_strided_slice %5 {offsets = [0, 2], sizes = [2, 1], strides = [1, 1]} : vector<2x4xf32> to vector<2x1xf32>
    %248 = vector.broadcast %247 : vector<2x1xf32> to vector<2x20xf32>
    %249 = vector.broadcast %11 : vector<1x20xf32> to vector<2x20xf32>
    %250 = arith.mulf %248, %249 : vector<2x20xf32>
    %251 = vector.extract_strided_slice %5 {offsets = [0, 3], sizes = [2, 1], strides = [1, 1]} : vector<2x4xf32> to vector<2x1xf32>
    %252 = vector.broadcast %251 : vector<2x1xf32> to vector<2x20xf32>
    %253 = vector.broadcast %12 : vector<1x20xf32> to vector<2x20xf32>
    %254 = arith.mulf %252, %253 : vector<2x20xf32>
    %255 = arith.addf %242, %246 : vector<2x20xf32>
    %256 = arith.addf %250, %254 : vector<2x20xf32>
    %257 = arith.addf %255, %256 : vector<2x20xf32>
    %258 = vector.broadcast %18 : vector<1x20xf32> to vector<2x20xf32>
    %259 = arith.addf %258, %257 : vector<2x20xf32>
    %260 = vector.extract_strided_slice %238 {offsets = [0, 0], sizes = [2, 1], strides = [1, 1]} : vector<2x5xf32> to vector<2x1xf32>
    %261 = vector.broadcast %260 : vector<2x1xf32> to vector<2x20xf32>
    %262 = vector.broadcast %13 : vector<1x20xf32> to vector<2x20xf32>
    %263 = arith.mulf %261, %262 : vector<2x20xf32>
    %264 = vector.extract_strided_slice %238 {offsets = [0, 1], sizes = [2, 1], strides = [1, 1]} : vector<2x5xf32> to vector<2x1xf32>
    %265 = vector.broadcast %264 : vector<2x1xf32> to vector<2x20xf32>
    %266 = vector.broadcast %14 : vector<1x20xf32> to vector<2x20xf32>
    %267 = arith.mulf %265, %266 : vector<2x20xf32>
    %268 = vector.extract_strided_slice %238 {offsets = [0, 2], sizes = [2, 1], strides = [1, 1]} : vector<2x5xf32> to vector<2x1xf32>
    %269 = vector.broadcast %268 : vector<2x1xf32> to vector<2x20xf32>
    %270 = vector.broadcast %15 : vector<1x20xf32> to vector<2x20xf32>
    %271 = arith.mulf %269, %270 : vector<2x20xf32>
    %272 = vector.extract_strided_slice %238 {offsets = [0, 3], sizes = [2, 1], strides = [1, 1]} : vector<2x5xf32> to vector<2x1xf32>
    %273 = vector.broadcast %272 : vector<2x1xf32> to vector<2x20xf32>
    %274 = vector.broadcast %16 : vector<1x20xf32> to vector<2x20xf32>
    %275 = arith.mulf %273, %274 : vector<2x20xf32>
    %276 = vector.extract_strided_slice %238 {offsets = [0, 4], sizes = [2, 1], strides = [1, 1]} : vector<2x5xf32> to vector<2x1xf32>
    %277 = vector.broadcast %276 : vector<2x1xf32> to vector<2x20xf32>
    %278 = vector.broadcast %17 : vector<1x20xf32> to vector<2x20xf32>
    %279 = arith.mulf %277, %278 : vector<2x20xf32>
    %280 = arith.addf %263, %267 : vector<2x20xf32>
    %281 = arith.addf %271, %275 : vector<2x20xf32>
    %282 = arith.addf %280, %281 : vector<2x20xf32>
    %283 = arith.addf %282, %279 : vector<2x20xf32>
    %284 = arith.addf %259, %283 : vector<2x20xf32>
    %285 = vector.extract_strided_slice %284 {offsets = [0, 0], sizes = [2, 15], strides = [1, 1]} : vector<2x20xf32> to vector<2x15xf32>
    %286 = arith.negf %285 : vector<2x15xf32>
    %287 = math.exp %286 : vector<2x15xf32>
    %cst_15 = arith.constant 1.000000e+00 : f32
    %288 = vector.broadcast %cst_15 : f32 to vector<2x15xf32>
    %289 = arith.addf %288, %287 : vector<2x15xf32>
    %290 = arith.divf %288, %289 : vector<2x15xf32>
    %291 = vector.extract_strided_slice %284 {offsets = [0, 15], sizes = [2, 5], strides = [1, 1]} : vector<2x20xf32> to vector<2x5xf32>
    %292 = math.tanh %291 : vector<2x5xf32>
    %293 = vector.extract_strided_slice %290 {offsets = [0, 0], sizes = [2, 5], strides = [1, 1]} : vector<2x15xf32> to vector<2x5xf32>
    %294 = vector.extract_strided_slice %290 {offsets = [0, 5], sizes = [2, 5], strides = [1, 1]} : vector<2x15xf32> to vector<2x5xf32>
    %295 = vector.extract_strided_slice %290 {offsets = [0, 10], sizes = [2, 5], strides = [1, 1]} : vector<2x15xf32> to vector<2x5xf32>
    %296 = arith.mulf %294, %236 : vector<2x5xf32>
    %297 = arith.mulf %293, %292 : vector<2x5xf32>
    %298 = arith.addf %296, %297 : vector<2x5xf32>
    %299 = math.tanh %298 : vector<2x5xf32>
    %300 = arith.mulf %295, %299 : vector<2x5xf32>
    %301 = vector.extract_strided_slice %6 {offsets = [0, 0], sizes = [2, 1], strides = [1, 1]} : vector<2x4xf32> to vector<2x1xf32>
    %302 = vector.broadcast %301 : vector<2x1xf32> to vector<2x20xf32>
    %303 = vector.broadcast %9 : vector<1x20xf32> to vector<2x20xf32>
    %304 = arith.mulf %302, %303 : vector<2x20xf32>
    %305 = vector.extract_strided_slice %6 {offsets = [0, 1], sizes = [2, 1], strides = [1, 1]} : vector<2x4xf32> to vector<2x1xf32>
    %306 = vector.broadcast %305 : vector<2x1xf32> to vector<2x20xf32>
    %307 = vector.broadcast %10 : vector<1x20xf32> to vector<2x20xf32>
    %308 = arith.mulf %306, %307 : vector<2x20xf32>
    %309 = vector.extract_strided_slice %6 {offsets = [0, 2], sizes = [2, 1], strides = [1, 1]} : vector<2x4xf32> to vector<2x1xf32>
    %310 = vector.broadcast %309 : vector<2x1xf32> to vector<2x20xf32>
    %311 = vector.broadcast %11 : vector<1x20xf32> to vector<2x20xf32>
    %312 = arith.mulf %310, %311 : vector<2x20xf32>
    %313 = vector.extract_strided_slice %6 {offsets = [0, 3], sizes = [2, 1], strides = [1, 1]} : vector<2x4xf32> to vector<2x1xf32>
    %314 = vector.broadcast %313 : vector<2x1xf32> to vector<2x20xf32>
    %315 = vector.broadcast %12 : vector<1x20xf32> to vector<2x20xf32>
    %316 = arith.mulf %314, %315 : vector<2x20xf32>
    %317 = arith.addf %304, %308 : vector<2x20xf32>
    %318 = arith.addf %312, %316 : vector<2x20xf32>
    %319 = arith.addf %317, %318 : vector<2x20xf32>
    %320 = vector.broadcast %18 : vector<1x20xf32> to vector<2x20xf32>
    %321 = arith.addf %320, %319 : vector<2x20xf32>
    %322 = vector.extract_strided_slice %300 {offsets = [0, 0], sizes = [2, 1], strides = [1, 1]} : vector<2x5xf32> to vector<2x1xf32>
    %323 = vector.broadcast %322 : vector<2x1xf32> to vector<2x20xf32>
    %324 = vector.broadcast %13 : vector<1x20xf32> to vector<2x20xf32>
    %325 = arith.mulf %323, %324 : vector<2x20xf32>
    %326 = vector.extract_strided_slice %300 {offsets = [0, 1], sizes = [2, 1], strides = [1, 1]} : vector<2x5xf32> to vector<2x1xf32>
    %327 = vector.broadcast %326 : vector<2x1xf32> to vector<2x20xf32>
    %328 = vector.broadcast %14 : vector<1x20xf32> to vector<2x20xf32>
    %329 = arith.mulf %327, %328 : vector<2x20xf32>
    %330 = vector.extract_strided_slice %300 {offsets = [0, 2], sizes = [2, 1], strides = [1, 1]} : vector<2x5xf32> to vector<2x1xf32>
    %331 = vector.broadcast %330 : vector<2x1xf32> to vector<2x20xf32>
    %332 = vector.broadcast %15 : vector<1x20xf32> to vector<2x20xf32>
    %333 = arith.mulf %331, %332 : vector<2x20xf32>
    %334 = vector.extract_strided_slice %300 {offsets = [0, 3], sizes = [2, 1], strides = [1, 1]} : vector<2x5xf32> to vector<2x1xf32>
    %335 = vector.broadcast %334 : vector<2x1xf32> to vector<2x20xf32>
    %336 = vector.broadcast %16 : vector<1x20xf32> to vector<2x20xf32>
    %337 = arith.mulf %335, %336 : vector<2x20xf32>
    %338 = vector.extract_strided_slice %300 {offsets = [0, 4], sizes = [2, 1], strides = [1, 1]} : vector<2x5xf32> to vector<2x1xf32>
    %339 = vector.broadcast %338 : vector<2x1xf32> to vector<2x20xf32>
    %340 = vector.broadcast %17 : vector<1x20xf32> to vector<2x20xf32>
    %341 = arith.mulf %339, %340 : vector<2x20xf32>
    %342 = arith.addf %325, %329 : vector<2x20xf32>
    %343 = arith.addf %333, %337 : vector<2x20xf32>
    %344 = arith.addf %342, %343 : vector<2x20xf32>
    %345 = arith.addf %344, %341 : vector<2x20xf32>
    %346 = arith.addf %321, %345 : vector<2x20xf32>
    %347 = vector.extract_strided_slice %346 {offsets = [0, 0], sizes = [2, 15], strides = [1, 1]} : vector<2x20xf32> to vector<2x15xf32>
    %348 = arith.negf %347 : vector<2x15xf32>
    %349 = math.exp %348 : vector<2x15xf32>
    %cst_16 = arith.constant 1.000000e+00 : f32
    %350 = vector.broadcast %cst_16 : f32 to vector<2x15xf32>
    %351 = arith.addf %350, %349 : vector<2x15xf32>
    %352 = arith.divf %350, %351 : vector<2x15xf32>
    %353 = vector.extract_strided_slice %346 {offsets = [0, 15], sizes = [2, 5], strides = [1, 1]} : vector<2x20xf32> to vector<2x5xf32>
    %354 = math.tanh %353 : vector<2x5xf32>
    %355 = vector.extract_strided_slice %352 {offsets = [0, 0], sizes = [2, 5], strides = [1, 1]} : vector<2x15xf32> to vector<2x5xf32>
    %356 = vector.extract_strided_slice %352 {offsets = [0, 5], sizes = [2, 5], strides = [1, 1]} : vector<2x15xf32> to vector<2x5xf32>
    %357 = vector.extract_strided_slice %352 {offsets = [0, 10], sizes = [2, 5], strides = [1, 1]} : vector<2x15xf32> to vector<2x5xf32>
    %358 = arith.mulf %356, %298 : vector<2x5xf32>
    %359 = arith.mulf %355, %354 : vector<2x5xf32>
    %360 = arith.addf %358, %359 : vector<2x5xf32>
    %361 = math.tanh %360 : vector<2x5xf32>
    %362 = arith.mulf %357, %361 : vector<2x5xf32>
    %363 = vector.extract_strided_slice %7 {offsets = [0, 0], sizes = [2, 1], strides = [1, 1]} : vector<2x4xf32> to vector<2x1xf32>
    %364 = vector.broadcast %363 : vector<2x1xf32> to vector<2x20xf32>
    %365 = vector.broadcast %9 : vector<1x20xf32> to vector<2x20xf32>
    %366 = arith.mulf %364, %365 : vector<2x20xf32>
    %367 = vector.extract_strided_slice %7 {offsets = [0, 1], sizes = [2, 1], strides = [1, 1]} : vector<2x4xf32> to vector<2x1xf32>
    %368 = vector.broadcast %367 : vector<2x1xf32> to vector<2x20xf32>
    %369 = vector.broadcast %10 : vector<1x20xf32> to vector<2x20xf32>
    %370 = arith.mulf %368, %369 : vector<2x20xf32>
    %371 = vector.extract_strided_slice %7 {offsets = [0, 2], sizes = [2, 1], strides = [1, 1]} : vector<2x4xf32> to vector<2x1xf32>
    %372 = vector.broadcast %371 : vector<2x1xf32> to vector<2x20xf32>
    %373 = vector.broadcast %11 : vector<1x20xf32> to vector<2x20xf32>
    %374 = arith.mulf %372, %373 : vector<2x20xf32>
    %375 = vector.extract_strided_slice %7 {offsets = [0, 3], sizes = [2, 1], strides = [1, 1]} : vector<2x4xf32> to vector<2x1xf32>
    %376 = vector.broadcast %375 : vector<2x1xf32> to vector<2x20xf32>
    %377 = vector.broadcast %12 : vector<1x20xf32> to vector<2x20xf32>
    %378 = arith.mulf %376, %377 : vector<2x20xf32>
    %379 = arith.addf %366, %370 : vector<2x20xf32>
    %380 = arith.addf %374, %378 : vector<2x20xf32>
    %381 = arith.addf %379, %380 : vector<2x20xf32>
    %382 = vector.broadcast %18 : vector<1x20xf32> to vector<2x20xf32>
    %383 = arith.addf %382, %381 : vector<2x20xf32>
    %384 = vector.extract_strided_slice %362 {offsets = [0, 0], sizes = [2, 1], strides = [1, 1]} : vector<2x5xf32> to vector<2x1xf32>
    %385 = vector.broadcast %384 : vector<2x1xf32> to vector<2x20xf32>
    %386 = vector.broadcast %13 : vector<1x20xf32> to vector<2x20xf32>
    %387 = arith.mulf %385, %386 : vector<2x20xf32>
    %388 = vector.extract_strided_slice %362 {offsets = [0, 1], sizes = [2, 1], strides = [1, 1]} : vector<2x5xf32> to vector<2x1xf32>
    %389 = vector.broadcast %388 : vector<2x1xf32> to vector<2x20xf32>
    %390 = vector.broadcast %14 : vector<1x20xf32> to vector<2x20xf32>
    %391 = arith.mulf %389, %390 : vector<2x20xf32>
    %392 = vector.extract_strided_slice %362 {offsets = [0, 2], sizes = [2, 1], strides = [1, 1]} : vector<2x5xf32> to vector<2x1xf32>
    %393 = vector.broadcast %392 : vector<2x1xf32> to vector<2x20xf32>
    %394 = vector.broadcast %15 : vector<1x20xf32> to vector<2x20xf32>
    %395 = arith.mulf %393, %394 : vector<2x20xf32>
    %396 = vector.extract_strided_slice %362 {offsets = [0, 3], sizes = [2, 1], strides = [1, 1]} : vector<2x5xf32> to vector<2x1xf32>
    %397 = vector.broadcast %396 : vector<2x1xf32> to vector<2x20xf32>
    %398 = vector.broadcast %16 : vector<1x20xf32> to vector<2x20xf32>
    %399 = arith.mulf %397, %398 : vector<2x20xf32>
    %400 = vector.extract_strided_slice %362 {offsets = [0, 4], sizes = [2, 1], strides = [1, 1]} : vector<2x5xf32> to vector<2x1xf32>
    %401 = vector.broadcast %400 : vector<2x1xf32> to vector<2x20xf32>
    %402 = vector.broadcast %17 : vector<1x20xf32> to vector<2x20xf32>
    %403 = arith.mulf %401, %402 : vector<2x20xf32>
    %404 = arith.addf %387, %391 : vector<2x20xf32>
    %405 = arith.addf %395, %399 : vector<2x20xf32>
    %406 = arith.addf %404, %405 : vector<2x20xf32>
    %407 = arith.addf %406, %403 : vector<2x20xf32>
    %408 = arith.addf %383, %407 : vector<2x20xf32>
    %409 = vector.extract_strided_slice %408 {offsets = [0, 0], sizes = [2, 15], strides = [1, 1]} : vector<2x20xf32> to vector<2x15xf32>
    %410 = arith.negf %409 : vector<2x15xf32>
    %411 = math.exp %410 : vector<2x15xf32>
    %cst_17 = arith.constant 1.000000e+00 : f32
    %412 = vector.broadcast %cst_17 : f32 to vector<2x15xf32>
    %413 = arith.addf %412, %411 : vector<2x15xf32>
    %414 = arith.divf %412, %413 : vector<2x15xf32>
    %415 = vector.extract_strided_slice %408 {offsets = [0, 15], sizes = [2, 5], strides = [1, 1]} : vector<2x20xf32> to vector<2x5xf32>
    %416 = math.tanh %415 : vector<2x5xf32>
    %417 = vector.extract_strided_slice %414 {offsets = [0, 0], sizes = [2, 5], strides = [1, 1]} : vector<2x15xf32> to vector<2x5xf32>
    %418 = vector.extract_strided_slice %414 {offsets = [0, 5], sizes = [2, 5], strides = [1, 1]} : vector<2x15xf32> to vector<2x5xf32>
    %419 = vector.extract_strided_slice %414 {offsets = [0, 10], sizes = [2, 5], strides = [1, 1]} : vector<2x15xf32> to vector<2x5xf32>
    %420 = arith.mulf %418, %360 : vector<2x5xf32>
    %421 = arith.mulf %417, %416 : vector<2x5xf32>
    %422 = arith.addf %420, %421 : vector<2x5xf32>
    %423 = math.tanh %422 : vector<2x5xf32>
    %424 = arith.mulf %419, %423 : vector<2x5xf32>
    %425 = vector.extract_strided_slice %8 {offsets = [0, 0], sizes = [2, 1], strides = [1, 1]} : vector<2x4xf32> to vector<2x1xf32>
    %426 = vector.broadcast %425 : vector<2x1xf32> to vector<2x20xf32>
    %427 = vector.broadcast %9 : vector<1x20xf32> to vector<2x20xf32>
    %428 = arith.mulf %426, %427 : vector<2x20xf32>
    %429 = vector.extract_strided_slice %8 {offsets = [0, 1], sizes = [2, 1], strides = [1, 1]} : vector<2x4xf32> to vector<2x1xf32>
    %430 = vector.broadcast %429 : vector<2x1xf32> to vector<2x20xf32>
    %431 = vector.broadcast %10 : vector<1x20xf32> to vector<2x20xf32>
    %432 = arith.mulf %430, %431 : vector<2x20xf32>
    %433 = vector.extract_strided_slice %8 {offsets = [0, 2], sizes = [2, 1], strides = [1, 1]} : vector<2x4xf32> to vector<2x1xf32>
    %434 = vector.broadcast %433 : vector<2x1xf32> to vector<2x20xf32>
    %435 = vector.broadcast %11 : vector<1x20xf32> to vector<2x20xf32>
    %436 = arith.mulf %434, %435 : vector<2x20xf32>
    %437 = vector.extract_strided_slice %8 {offsets = [0, 3], sizes = [2, 1], strides = [1, 1]} : vector<2x4xf32> to vector<2x1xf32>
    %438 = vector.broadcast %437 : vector<2x1xf32> to vector<2x20xf32>
    %439 = vector.broadcast %12 : vector<1x20xf32> to vector<2x20xf32>
    %440 = arith.mulf %438, %439 : vector<2x20xf32>
    %441 = arith.addf %428, %432 : vector<2x20xf32>
    %442 = arith.addf %436, %440 : vector<2x20xf32>
    %443 = arith.addf %441, %442 : vector<2x20xf32>
    %444 = vector.broadcast %18 : vector<1x20xf32> to vector<2x20xf32>
    %445 = arith.addf %444, %443 : vector<2x20xf32>
    %446 = vector.extract_strided_slice %424 {offsets = [0, 0], sizes = [2, 1], strides = [1, 1]} : vector<2x5xf32> to vector<2x1xf32>
    %447 = vector.broadcast %446 : vector<2x1xf32> to vector<2x20xf32>
    %448 = vector.broadcast %13 : vector<1x20xf32> to vector<2x20xf32>
    %449 = arith.mulf %447, %448 : vector<2x20xf32>
    %450 = vector.extract_strided_slice %424 {offsets = [0, 1], sizes = [2, 1], strides = [1, 1]} : vector<2x5xf32> to vector<2x1xf32>
    %451 = vector.broadcast %450 : vector<2x1xf32> to vector<2x20xf32>
    %452 = vector.broadcast %14 : vector<1x20xf32> to vector<2x20xf32>
    %453 = arith.mulf %451, %452 : vector<2x20xf32>
    %454 = vector.extract_strided_slice %424 {offsets = [0, 2], sizes = [2, 1], strides = [1, 1]} : vector<2x5xf32> to vector<2x1xf32>
    %455 = vector.broadcast %454 : vector<2x1xf32> to vector<2x20xf32>
    %456 = vector.broadcast %15 : vector<1x20xf32> to vector<2x20xf32>
    %457 = arith.mulf %455, %456 : vector<2x20xf32>
    %458 = vector.extract_strided_slice %424 {offsets = [0, 3], sizes = [2, 1], strides = [1, 1]} : vector<2x5xf32> to vector<2x1xf32>
    %459 = vector.broadcast %458 : vector<2x1xf32> to vector<2x20xf32>
    %460 = vector.broadcast %16 : vector<1x20xf32> to vector<2x20xf32>
    %461 = arith.mulf %459, %460 : vector<2x20xf32>
    %462 = vector.extract_strided_slice %424 {offsets = [0, 4], sizes = [2, 1], strides = [1, 1]} : vector<2x5xf32> to vector<2x1xf32>
    %463 = vector.broadcast %462 : vector<2x1xf32> to vector<2x20xf32>
    %464 = vector.broadcast %17 : vector<1x20xf32> to vector<2x20xf32>
    %465 = arith.mulf %463, %464 : vector<2x20xf32>
    %466 = arith.addf %449, %453 : vector<2x20xf32>
    %467 = arith.addf %457, %461 : vector<2x20xf32>
    %468 = arith.addf %466, %467 : vector<2x20xf32>
    %469 = arith.addf %468, %465 : vector<2x20xf32>
    %470 = arith.addf %445, %469 : vector<2x20xf32>
    %471 = vector.extract_strided_slice %470 {offsets = [0, 0], sizes = [2, 15], strides = [1, 1]} : vector<2x20xf32> to vector<2x15xf32>
    %472 = arith.negf %471 : vector<2x15xf32>
    %473 = math.exp %472 : vector<2x15xf32>
    %cst_18 = arith.constant 1.000000e+00 : f32
    %474 = vector.broadcast %cst_18 : f32 to vector<2x15xf32>
    %475 = arith.addf %474, %473 : vector<2x15xf32>
    %476 = arith.divf %474, %475 : vector<2x15xf32>
    %477 = vector.extract_strided_slice %470 {offsets = [0, 15], sizes = [2, 5], strides = [1, 1]} : vector<2x20xf32> to vector<2x5xf32>
    %478 = math.tanh %477 : vector<2x5xf32>
    %479 = vector.extract_strided_slice %476 {offsets = [0, 0], sizes = [2, 5], strides = [1, 1]} : vector<2x15xf32> to vector<2x5xf32>
    %480 = vector.extract_strided_slice %476 {offsets = [0, 5], sizes = [2, 5], strides = [1, 1]} : vector<2x15xf32> to vector<2x5xf32>
    %481 = vector.extract_strided_slice %476 {offsets = [0, 10], sizes = [2, 5], strides = [1, 1]} : vector<2x15xf32> to vector<2x5xf32>
    %482 = arith.mulf %480, %422 : vector<2x5xf32>
    %483 = arith.mulf %479, %478 : vector<2x5xf32>
    %484 = arith.addf %482, %483 : vector<2x5xf32>
    %485 = math.tanh %484 : vector<2x5xf32>
    %486 = arith.mulf %481, %485 : vector<2x5xf32>
    %c4 = arith.constant 4 : index
    %c0_19 = arith.constant 0 : index
    %487 = vector.load %arg1[%c4, %c0_19] : memref<44x20xf32, #tpu.memory_space<vmem>>, vector<1x20xf32>
    %c5 = arith.constant 5 : index
    %c0_20 = arith.constant 0 : index
    %488 = vector.load %arg1[%c5, %c0_20] : memref<44x20xf32, #tpu.memory_space<vmem>>, vector<1x20xf32>
    %c6 = arith.constant 6 : index
    %c0_21 = arith.constant 0 : index
    %489 = vector.load %arg1[%c6, %c0_21] : memref<44x20xf32, #tpu.memory_space<vmem>>, vector<1x20xf32>
    %c7 = arith.constant 7 : index
    %c0_22 = arith.constant 0 : index
    %490 = vector.load %arg1[%c7, %c0_22] : memref<44x20xf32, #tpu.memory_space<vmem>>, vector<1x20xf32>
    %c8 = arith.constant 8 : index
    %c0_23 = arith.constant 0 : index
    %491 = vector.load %arg1[%c8, %c0_23] : memref<44x20xf32, #tpu.memory_space<vmem>>, vector<1x20xf32>
    %c24 = arith.constant 24 : index
    %c0_24 = arith.constant 0 : index
    %492 = vector.load %arg1[%c24, %c0_24] : memref<44x20xf32, #tpu.memory_space<vmem>>, vector<1x20xf32>
    %c25 = arith.constant 25 : index
    %c0_25 = arith.constant 0 : index
    %493 = vector.load %arg1[%c25, %c0_25] : memref<44x20xf32, #tpu.memory_space<vmem>>, vector<1x20xf32>
    %c26 = arith.constant 26 : index
    %c0_26 = arith.constant 0 : index
    %494 = vector.load %arg1[%c26, %c0_26] : memref<44x20xf32, #tpu.memory_space<vmem>>, vector<1x20xf32>
    %c27 = arith.constant 27 : index
    %c0_27 = arith.constant 0 : index
    %495 = vector.load %arg1[%c27, %c0_27] : memref<44x20xf32, #tpu.memory_space<vmem>>, vector<1x20xf32>
    %c28 = arith.constant 28 : index
    %c0_28 = arith.constant 0 : index
    %496 = vector.load %arg1[%c28, %c0_28] : memref<44x20xf32, #tpu.memory_space<vmem>>, vector<1x20xf32>
    %c40 = arith.constant 40 : index
    %c0_29 = arith.constant 0 : index
    %497 = vector.load %arg1[%c40, %c0_29] : memref<44x20xf32, #tpu.memory_space<vmem>>, vector<1x20xf32>
    %498 = vector.extract_strided_slice %52 {offsets = [0, 0], sizes = [2, 1], strides = [1, 1]} : vector<2x5xf32> to vector<2x1xf32>
    %499 = vector.broadcast %498 : vector<2x1xf32> to vector<2x20xf32>
    %500 = vector.broadcast %487 : vector<1x20xf32> to vector<2x20xf32>
    %501 = arith.mulf %499, %500 : vector<2x20xf32>
    %502 = vector.extract_strided_slice %52 {offsets = [0, 1], sizes = [2, 1], strides = [1, 1]} : vector<2x5xf32> to vector<2x1xf32>
    %503 = vector.broadcast %502 : vector<2x1xf32> to vector<2x20xf32>
    %504 = vector.broadcast %488 : vector<1x20xf32> to vector<2x20xf32>
    %505 = arith.mulf %503, %504 : vector<2x20xf32>
    %506 = vector.extract_strided_slice %52 {offsets = [0, 2], sizes = [2, 1], strides = [1, 1]} : vector<2x5xf32> to vector<2x1xf32>
    %507 = vector.broadcast %506 : vector<2x1xf32> to vector<2x20xf32>
    %508 = vector.broadcast %489 : vector<1x20xf32> to vector<2x20xf32>
    %509 = arith.mulf %507, %508 : vector<2x20xf32>
    %510 = vector.extract_strided_slice %52 {offsets = [0, 3], sizes = [2, 1], strides = [1, 1]} : vector<2x5xf32> to vector<2x1xf32>
    %511 = vector.broadcast %510 : vector<2x1xf32> to vector<2x20xf32>
    %512 = vector.broadcast %490 : vector<1x20xf32> to vector<2x20xf32>
    %513 = arith.mulf %511, %512 : vector<2x20xf32>
    %514 = vector.extract_strided_slice %52 {offsets = [0, 4], sizes = [2, 1], strides = [1, 1]} : vector<2x5xf32> to vector<2x1xf32>
    %515 = vector.broadcast %514 : vector<2x1xf32> to vector<2x20xf32>
    %516 = vector.broadcast %491 : vector<1x20xf32> to vector<2x20xf32>
    %517 = arith.mulf %515, %516 : vector<2x20xf32>
    %518 = arith.addf %501, %505 : vector<2x20xf32>
    %519 = arith.addf %509, %513 : vector<2x20xf32>
    %520 = arith.addf %518, %519 : vector<2x20xf32>
    %521 = arith.addf %520, %517 : vector<2x20xf32>
    %522 = vector.broadcast %497 : vector<1x20xf32> to vector<2x20xf32>
    %523 = arith.addf %522, %521 : vector<2x20xf32>
    %524 = vector.extract_strided_slice %523 {offsets = [0, 0], sizes = [2, 15], strides = [1, 1]} : vector<2x20xf32> to vector<2x15xf32>
    %525 = arith.negf %524 : vector<2x15xf32>
    %526 = math.exp %525 : vector<2x15xf32>
    %cst_30 = arith.constant 1.000000e+00 : f32
    %527 = vector.broadcast %cst_30 : f32 to vector<2x15xf32>
    %528 = arith.addf %527, %526 : vector<2x15xf32>
    %529 = arith.divf %527, %528 : vector<2x15xf32>
    %530 = vector.extract_strided_slice %523 {offsets = [0, 15], sizes = [2, 5], strides = [1, 1]} : vector<2x20xf32> to vector<2x5xf32>
    %531 = math.tanh %530 : vector<2x5xf32>
    %532 = vector.extract_strided_slice %529 {offsets = [0, 0], sizes = [2, 5], strides = [1, 1]} : vector<2x15xf32> to vector<2x5xf32>
    %533 = vector.extract_strided_slice %529 {offsets = [0, 10], sizes = [2, 5], strides = [1, 1]} : vector<2x15xf32> to vector<2x5xf32>
    %534 = arith.mulf %532, %531 : vector<2x5xf32>
    %535 = math.tanh %534 : vector<2x5xf32>
    %536 = arith.mulf %533, %535 : vector<2x5xf32>
    %537 = vector.extract_strided_slice %114 {offsets = [0, 0], sizes = [2, 1], strides = [1, 1]} : vector<2x5xf32> to vector<2x1xf32>
    %538 = vector.broadcast %537 : vector<2x1xf32> to vector<2x20xf32>
    %539 = vector.broadcast %487 : vector<1x20xf32> to vector<2x20xf32>
    %540 = arith.mulf %538, %539 : vector<2x20xf32>
    %541 = vector.extract_strided_slice %114 {offsets = [0, 1], sizes = [2, 1], strides = [1, 1]} : vector<2x5xf32> to vector<2x1xf32>
    %542 = vector.broadcast %541 : vector<2x1xf32> to vector<2x20xf32>
    %543 = vector.broadcast %488 : vector<1x20xf32> to vector<2x20xf32>
    %544 = arith.mulf %542, %543 : vector<2x20xf32>
    %545 = vector.extract_strided_slice %114 {offsets = [0, 2], sizes = [2, 1], strides = [1, 1]} : vector<2x5xf32> to vector<2x1xf32>
    %546 = vector.broadcast %545 : vector<2x1xf32> to vector<2x20xf32>
    %547 = vector.broadcast %489 : vector<1x20xf32> to vector<2x20xf32>
    %548 = arith.mulf %546, %547 : vector<2x20xf32>
    %549 = vector.extract_strided_slice %114 {offsets = [0, 3], sizes = [2, 1], strides = [1, 1]} : vector<2x5xf32> to vector<2x1xf32>
    %550 = vector.broadcast %549 : vector<2x1xf32> to vector<2x20xf32>
    %551 = vector.broadcast %490 : vector<1x20xf32> to vector<2x20xf32>
    %552 = arith.mulf %550, %551 : vector<2x20xf32>
    %553 = vector.extract_strided_slice %114 {offsets = [0, 4], sizes = [2, 1], strides = [1, 1]} : vector<2x5xf32> to vector<2x1xf32>
    %554 = vector.broadcast %553 : vector<2x1xf32> to vector<2x20xf32>
    %555 = vector.broadcast %491 : vector<1x20xf32> to vector<2x20xf32>
    %556 = arith.mulf %554, %555 : vector<2x20xf32>
    %557 = arith.addf %540, %544 : vector<2x20xf32>
    %558 = arith.addf %548, %552 : vector<2x20xf32>
    %559 = arith.addf %557, %558 : vector<2x20xf32>
    %560 = arith.addf %559, %556 : vector<2x20xf32>
    %561 = vector.broadcast %497 : vector<1x20xf32> to vector<2x20xf32>
    %562 = arith.addf %561, %560 : vector<2x20xf32>
    %563 = vector.extract_strided_slice %536 {offsets = [0, 0], sizes = [2, 1], strides = [1, 1]} : vector<2x5xf32> to vector<2x1xf32>
    %564 = vector.broadcast %563 : vector<2x1xf32> to vector<2x20xf32>
    %565 = vector.broadcast %492 : vector<1x20xf32> to vector<2x20xf32>
    %566 = arith.mulf %564, %565 : vector<2x20xf32>
    %567 = vector.extract_strided_slice %536 {offsets = [0, 1], sizes = [2, 1], strides = [1, 1]} : vector<2x5xf32> to vector<2x1xf32>
    %568 = vector.broadcast %567 : vector<2x1xf32> to vector<2x20xf32>
    %569 = vector.broadcast %493 : vector<1x20xf32> to vector<2x20xf32>
    %570 = arith.mulf %568, %569 : vector<2x20xf32>
    %571 = vector.extract_strided_slice %536 {offsets = [0, 2], sizes = [2, 1], strides = [1, 1]} : vector<2x5xf32> to vector<2x1xf32>
    %572 = vector.broadcast %571 : vector<2x1xf32> to vector<2x20xf32>
    %573 = vector.broadcast %494 : vector<1x20xf32> to vector<2x20xf32>
    %574 = arith.mulf %572, %573 : vector<2x20xf32>
    %575 = vector.extract_strided_slice %536 {offsets = [0, 3], sizes = [2, 1], strides = [1, 1]} : vector<2x5xf32> to vector<2x1xf32>
    %576 = vector.broadcast %575 : vector<2x1xf32> to vector<2x20xf32>
    %577 = vector.broadcast %495 : vector<1x20xf32> to vector<2x20xf32>
    %578 = arith.mulf %576, %577 : vector<2x20xf32>
    %579 = vector.extract_strided_slice %536 {offsets = [0, 4], sizes = [2, 1], strides = [1, 1]} : vector<2x5xf32> to vector<2x1xf32>
    %580 = vector.broadcast %579 : vector<2x1xf32> to vector<2x20xf32>
    %581 = vector.broadcast %496 : vector<1x20xf32> to vector<2x20xf32>
    %582 = arith.mulf %580, %581 : vector<2x20xf32>
    %583 = arith.addf %566, %570 : vector<2x20xf32>
    %584 = arith.addf %574, %578 : vector<2x20xf32>
    %585 = arith.addf %583, %584 : vector<2x20xf32>
    %586 = arith.addf %585, %582 : vector<2x20xf32>
    %587 = arith.addf %562, %586 : vector<2x20xf32>
    %588 = vector.extract_strided_slice %587 {offsets = [0, 0], sizes = [2, 15], strides = [1, 1]} : vector<2x20xf32> to vector<2x15xf32>
    %589 = arith.negf %588 : vector<2x15xf32>
    %590 = math.exp %589 : vector<2x15xf32>
    %cst_31 = arith.constant 1.000000e+00 : f32
    %591 = vector.broadcast %cst_31 : f32 to vector<2x15xf32>
    %592 = arith.addf %591, %590 : vector<2x15xf32>
    %593 = arith.divf %591, %592 : vector<2x15xf32>
    %594 = vector.extract_strided_slice %587 {offsets = [0, 15], sizes = [2, 5], strides = [1, 1]} : vector<2x20xf32> to vector<2x5xf32>
    %595 = math.tanh %594 : vector<2x5xf32>
    %596 = vector.extract_strided_slice %593 {offsets = [0, 0], sizes = [2, 5], strides = [1, 1]} : vector<2x15xf32> to vector<2x5xf32>
    %597 = vector.extract_strided_slice %593 {offsets = [0, 5], sizes = [2, 5], strides = [1, 1]} : vector<2x15xf32> to vector<2x5xf32>
    %598 = vector.extract_strided_slice %593 {offsets = [0, 10], sizes = [2, 5], strides = [1, 1]} : vector<2x15xf32> to vector<2x5xf32>
    %599 = arith.mulf %597, %534 : vector<2x5xf32>
    %600 = arith.mulf %596, %595 : vector<2x5xf32>
    %601 = arith.addf %599, %600 : vector<2x5xf32>
    %602 = math.tanh %601 : vector<2x5xf32>
    %603 = arith.mulf %598, %602 : vector<2x5xf32>
    %604 = vector.extract_strided_slice %176 {offsets = [0, 0], sizes = [2, 1], strides = [1, 1]} : vector<2x5xf32> to vector<2x1xf32>
    %605 = vector.broadcast %604 : vector<2x1xf32> to vector<2x20xf32>
    %606 = vector.broadcast %487 : vector<1x20xf32> to vector<2x20xf32>
    %607 = arith.mulf %605, %606 : vector<2x20xf32>
    %608 = vector.extract_strided_slice %176 {offsets = [0, 1], sizes = [2, 1], strides = [1, 1]} : vector<2x5xf32> to vector<2x1xf32>
    %609 = vector.broadcast %608 : vector<2x1xf32> to vector<2x20xf32>
    %610 = vector.broadcast %488 : vector<1x20xf32> to vector<2x20xf32>
    %611 = arith.mulf %609, %610 : vector<2x20xf32>
    %612 = vector.extract_strided_slice %176 {offsets = [0, 2], sizes = [2, 1], strides = [1, 1]} : vector<2x5xf32> to vector<2x1xf32>
    %613 = vector.broadcast %612 : vector<2x1xf32> to vector<2x20xf32>
    %614 = vector.broadcast %489 : vector<1x20xf32> to vector<2x20xf32>
    %615 = arith.mulf %613, %614 : vector<2x20xf32>
    %616 = vector.extract_strided_slice %176 {offsets = [0, 3], sizes = [2, 1], strides = [1, 1]} : vector<2x5xf32> to vector<2x1xf32>
    %617 = vector.broadcast %616 : vector<2x1xf32> to vector<2x20xf32>
    %618 = vector.broadcast %490 : vector<1x20xf32> to vector<2x20xf32>
    %619 = arith.mulf %617, %618 : vector<2x20xf32>
    %620 = vector.extract_strided_slice %176 {offsets = [0, 4], sizes = [2, 1], strides = [1, 1]} : vector<2x5xf32> to vector<2x1xf32>
    %621 = vector.broadcast %620 : vector<2x1xf32> to vector<2x20xf32>
    %622 = vector.broadcast %491 : vector<1x20xf32> to vector<2x20xf32>
    %623 = arith.mulf %621, %622 : vector<2x20xf32>
    %624 = arith.addf %607, %611 : vector<2x20xf32>
    %625 = arith.addf %615, %619 : vector<2x20xf32>
    %626 = arith.addf %624, %625 : vector<2x20xf32>
    %627 = arith.addf %626, %623 : vector<2x20xf32>
    %628 = vector.broadcast %497 : vector<1x20xf32> to vector<2x20xf32>
    %629 = arith.addf %628, %627 : vector<2x20xf32>
    %630 = vector.extract_strided_slice %603 {offsets = [0, 0], sizes = [2, 1], strides = [1, 1]} : vector<2x5xf32> to vector<2x1xf32>
    %631 = vector.broadcast %630 : vector<2x1xf32> to vector<2x20xf32>
    %632 = vector.broadcast %492 : vector<1x20xf32> to vector<2x20xf32>
    %633 = arith.mulf %631, %632 : vector<2x20xf32>
    %634 = vector.extract_strided_slice %603 {offsets = [0, 1], sizes = [2, 1], strides = [1, 1]} : vector<2x5xf32> to vector<2x1xf32>
    %635 = vector.broadcast %634 : vector<2x1xf32> to vector<2x20xf32>
    %636 = vector.broadcast %493 : vector<1x20xf32> to vector<2x20xf32>
    %637 = arith.mulf %635, %636 : vector<2x20xf32>
    %638 = vector.extract_strided_slice %603 {offsets = [0, 2], sizes = [2, 1], strides = [1, 1]} : vector<2x5xf32> to vector<2x1xf32>
    %639 = vector.broadcast %638 : vector<2x1xf32> to vector<2x20xf32>
    %640 = vector.broadcast %494 : vector<1x20xf32> to vector<2x20xf32>
    %641 = arith.mulf %639, %640 : vector<2x20xf32>
    %642 = vector.extract_strided_slice %603 {offsets = [0, 3], sizes = [2, 1], strides = [1, 1]} : vector<2x5xf32> to vector<2x1xf32>
    %643 = vector.broadcast %642 : vector<2x1xf32> to vector<2x20xf32>
    %644 = vector.broadcast %495 : vector<1x20xf32> to vector<2x20xf32>
    %645 = arith.mulf %643, %644 : vector<2x20xf32>
    %646 = vector.extract_strided_slice %603 {offsets = [0, 4], sizes = [2, 1], strides = [1, 1]} : vector<2x5xf32> to vector<2x1xf32>
    %647 = vector.broadcast %646 : vector<2x1xf32> to vector<2x20xf32>
    %648 = vector.broadcast %496 : vector<1x20xf32> to vector<2x20xf32>
    %649 = arith.mulf %647, %648 : vector<2x20xf32>
    %650 = arith.addf %633, %637 : vector<2x20xf32>
    %651 = arith.addf %641, %645 : vector<2x20xf32>
    %652 = arith.addf %650, %651 : vector<2x20xf32>
    %653 = arith.addf %652, %649 : vector<2x20xf32>
    %654 = arith.addf %629, %653 : vector<2x20xf32>
    %655 = vector.extract_strided_slice %654 {offsets = [0, 0], sizes = [2, 15], strides = [1, 1]} : vector<2x20xf32> to vector<2x15xf32>
    %656 = arith.negf %655 : vector<2x15xf32>
    %657 = math.exp %656 : vector<2x15xf32>
    %cst_32 = arith.constant 1.000000e+00 : f32
    %658 = vector.broadcast %cst_32 : f32 to vector<2x15xf32>
    %659 = arith.addf %658, %657 : vector<2x15xf32>
    %660 = arith.divf %658, %659 : vector<2x15xf32>
    %661 = vector.extract_strided_slice %654 {offsets = [0, 15], sizes = [2, 5], strides = [1, 1]} : vector<2x20xf32> to vector<2x5xf32>
    %662 = math.tanh %661 : vector<2x5xf32>
    %663 = vector.extract_strided_slice %660 {offsets = [0, 0], sizes = [2, 5], strides = [1, 1]} : vector<2x15xf32> to vector<2x5xf32>
    %664 = vector.extract_strided_slice %660 {offsets = [0, 5], sizes = [2, 5], strides = [1, 1]} : vector<2x15xf32> to vector<2x5xf32>
    %665 = vector.extract_strided_slice %660 {offsets = [0, 10], sizes = [2, 5], strides = [1, 1]} : vector<2x15xf32> to vector<2x5xf32>
    %666 = arith.mulf %664, %601 : vector<2x5xf32>
    %667 = arith.mulf %663, %662 : vector<2x5xf32>
    %668 = arith.addf %666, %667 : vector<2x5xf32>
    %669 = math.tanh %668 : vector<2x5xf32>
    %670 = arith.mulf %665, %669 : vector<2x5xf32>
    %671 = vector.extract_strided_slice %238 {offsets = [0, 0], sizes = [2, 1], strides = [1, 1]} : vector<2x5xf32> to vector<2x1xf32>
    %672 = vector.broadcast %671 : vector<2x1xf32> to vector<2x20xf32>
    %673 = vector.broadcast %487 : vector<1x20xf32> to vector<2x20xf32>
    %674 = arith.mulf %672, %673 : vector<2x20xf32>
    %675 = vector.extract_strided_slice %238 {offsets = [0, 1], sizes = [2, 1], strides = [1, 1]} : vector<2x5xf32> to vector<2x1xf32>
    %676 = vector.broadcast %675 : vector<2x1xf32> to vector<2x20xf32>
    %677 = vector.broadcast %488 : vector<1x20xf32> to vector<2x20xf32>
    %678 = arith.mulf %676, %677 : vector<2x20xf32>
    %679 = vector.extract_strided_slice %238 {offsets = [0, 2], sizes = [2, 1], strides = [1, 1]} : vector<2x5xf32> to vector<2x1xf32>
    %680 = vector.broadcast %679 : vector<2x1xf32> to vector<2x20xf32>
    %681 = vector.broadcast %489 : vector<1x20xf32> to vector<2x20xf32>
    %682 = arith.mulf %680, %681 : vector<2x20xf32>
    %683 = vector.extract_strided_slice %238 {offsets = [0, 3], sizes = [2, 1], strides = [1, 1]} : vector<2x5xf32> to vector<2x1xf32>
    %684 = vector.broadcast %683 : vector<2x1xf32> to vector<2x20xf32>
    %685 = vector.broadcast %490 : vector<1x20xf32> to vector<2x20xf32>
    %686 = arith.mulf %684, %685 : vector<2x20xf32>
    %687 = vector.extract_strided_slice %238 {offsets = [0, 4], sizes = [2, 1], strides = [1, 1]} : vector<2x5xf32> to vector<2x1xf32>
    %688 = vector.broadcast %687 : vector<2x1xf32> to vector<2x20xf32>
    %689 = vector.broadcast %491 : vector<1x20xf32> to vector<2x20xf32>
    %690 = arith.mulf %688, %689 : vector<2x20xf32>
    %691 = arith.addf %674, %678 : vector<2x20xf32>
    %692 = arith.addf %682, %686 : vector<2x20xf32>
    %693 = arith.addf %691, %692 : vector<2x20xf32>
    %694 = arith.addf %693, %690 : vector<2x20xf32>
    %695 = vector.broadcast %497 : vector<1x20xf32> to vector<2x20xf32>
    %696 = arith.addf %695, %694 : vector<2x20xf32>
    %697 = vector.extract_strided_slice %670 {offsets = [0, 0], sizes = [2, 1], strides = [1, 1]} : vector<2x5xf32> to vector<2x1xf32>
    %698 = vector.broadcast %697 : vector<2x1xf32> to vector<2x20xf32>
    %699 = vector.broadcast %492 : vector<1x20xf32> to vector<2x20xf32>
    %700 = arith.mulf %698, %699 : vector<2x20xf32>
    %701 = vector.extract_strided_slice %670 {offsets = [0, 1], sizes = [2, 1], strides = [1, 1]} : vector<2x5xf32> to vector<2x1xf32>
    %702 = vector.broadcast %701 : vector<2x1xf32> to vector<2x20xf32>
    %703 = vector.broadcast %493 : vector<1x20xf32> to vector<2x20xf32>
    %704 = arith.mulf %702, %703 : vector<2x20xf32>
    %705 = vector.extract_strided_slice %670 {offsets = [0, 2], sizes = [2, 1], strides = [1, 1]} : vector<2x5xf32> to vector<2x1xf32>
    %706 = vector.broadcast %705 : vector<2x1xf32> to vector<2x20xf32>
    %707 = vector.broadcast %494 : vector<1x20xf32> to vector<2x20xf32>
    %708 = arith.mulf %706, %707 : vector<2x20xf32>
    %709 = vector.extract_strided_slice %670 {offsets = [0, 3], sizes = [2, 1], strides = [1, 1]} : vector<2x5xf32> to vector<2x1xf32>
    %710 = vector.broadcast %709 : vector<2x1xf32> to vector<2x20xf32>
    %711 = vector.broadcast %495 : vector<1x20xf32> to vector<2x20xf32>
    %712 = arith.mulf %710, %711 : vector<2x20xf32>
    %713 = vector.extract_strided_slice %670 {offsets = [0, 4], sizes = [2, 1], strides = [1, 1]} : vector<2x5xf32> to vector<2x1xf32>
    %714 = vector.broadcast %713 : vector<2x1xf32> to vector<2x20xf32>
    %715 = vector.broadcast %496 : vector<1x20xf32> to vector<2x20xf32>
    %716 = arith.mulf %714, %715 : vector<2x20xf32>
    %717 = arith.addf %700, %704 : vector<2x20xf32>
    %718 = arith.addf %708, %712 : vector<2x20xf32>
    %719 = arith.addf %717, %718 : vector<2x20xf32>
    %720 = arith.addf %719, %716 : vector<2x20xf32>
    %721 = arith.addf %696, %720 : vector<2x20xf32>
    %722 = vector.extract_strided_slice %721 {offsets = [0, 0], sizes = [2, 15], strides = [1, 1]} : vector<2x20xf32> to vector<2x15xf32>
    %723 = arith.negf %722 : vector<2x15xf32>
    %724 = math.exp %723 : vector<2x15xf32>
    %cst_33 = arith.constant 1.000000e+00 : f32
    %725 = vector.broadcast %cst_33 : f32 to vector<2x15xf32>
    %726 = arith.addf %725, %724 : vector<2x15xf32>
    %727 = arith.divf %725, %726 : vector<2x15xf32>
    %728 = vector.extract_strided_slice %721 {offsets = [0, 15], sizes = [2, 5], strides = [1, 1]} : vector<2x20xf32> to vector<2x5xf32>
    %729 = math.tanh %728 : vector<2x5xf32>
    %730 = vector.extract_strided_slice %727 {offsets = [0, 0], sizes = [2, 5], strides = [1, 1]} : vector<2x15xf32> to vector<2x5xf32>
    %731 = vector.extract_strided_slice %727 {offsets = [0, 5], sizes = [2, 5], strides = [1, 1]} : vector<2x15xf32> to vector<2x5xf32>
    %732 = vector.extract_strided_slice %727 {offsets = [0, 10], sizes = [2, 5], strides = [1, 1]} : vector<2x15xf32> to vector<2x5xf32>
    %733 = arith.mulf %731, %668 : vector<2x5xf32>
    %734 = arith.mulf %730, %729 : vector<2x5xf32>
    %735 = arith.addf %733, %734 : vector<2x5xf32>
    %736 = math.tanh %735 : vector<2x5xf32>
    %737 = arith.mulf %732, %736 : vector<2x5xf32>
    %738 = vector.extract_strided_slice %300 {offsets = [0, 0], sizes = [2, 1], strides = [1, 1]} : vector<2x5xf32> to vector<2x1xf32>
    %739 = vector.broadcast %738 : vector<2x1xf32> to vector<2x20xf32>
    %740 = vector.broadcast %487 : vector<1x20xf32> to vector<2x20xf32>
    %741 = arith.mulf %739, %740 : vector<2x20xf32>
    %742 = vector.extract_strided_slice %300 {offsets = [0, 1], sizes = [2, 1], strides = [1, 1]} : vector<2x5xf32> to vector<2x1xf32>
    %743 = vector.broadcast %742 : vector<2x1xf32> to vector<2x20xf32>
    %744 = vector.broadcast %488 : vector<1x20xf32> to vector<2x20xf32>
    %745 = arith.mulf %743, %744 : vector<2x20xf32>
    %746 = vector.extract_strided_slice %300 {offsets = [0, 2], sizes = [2, 1], strides = [1, 1]} : vector<2x5xf32> to vector<2x1xf32>
    %747 = vector.broadcast %746 : vector<2x1xf32> to vector<2x20xf32>
    %748 = vector.broadcast %489 : vector<1x20xf32> to vector<2x20xf32>
    %749 = arith.mulf %747, %748 : vector<2x20xf32>
    %750 = vector.extract_strided_slice %300 {offsets = [0, 3], sizes = [2, 1], strides = [1, 1]} : vector<2x5xf32> to vector<2x1xf32>
    %751 = vector.broadcast %750 : vector<2x1xf32> to vector<2x20xf32>
    %752 = vector.broadcast %490 : vector<1x20xf32> to vector<2x20xf32>
    %753 = arith.mulf %751, %752 : vector<2x20xf32>
    %754 = vector.extract_strided_slice %300 {offsets = [0, 4], sizes = [2, 1], strides = [1, 1]} : vector<2x5xf32> to vector<2x1xf32>
    %755 = vector.broadcast %754 : vector<2x1xf32> to vector<2x20xf32>
    %756 = vector.broadcast %491 : vector<1x20xf32> to vector<2x20xf32>
    %757 = arith.mulf %755, %756 : vector<2x20xf32>
    %758 = arith.addf %741, %745 : vector<2x20xf32>
    %759 = arith.addf %749, %753 : vector<2x20xf32>
    %760 = arith.addf %758, %759 : vector<2x20xf32>
    %761 = arith.addf %760, %757 : vector<2x20xf32>
    %762 = vector.broadcast %497 : vector<1x20xf32> to vector<2x20xf32>
    %763 = arith.addf %762, %761 : vector<2x20xf32>
    %764 = vector.extract_strided_slice %737 {offsets = [0, 0], sizes = [2, 1], strides = [1, 1]} : vector<2x5xf32> to vector<2x1xf32>
    %765 = vector.broadcast %764 : vector<2x1xf32> to vector<2x20xf32>
    %766 = vector.broadcast %492 : vector<1x20xf32> to vector<2x20xf32>
    %767 = arith.mulf %765, %766 : vector<2x20xf32>
    %768 = vector.extract_strided_slice %737 {offsets = [0, 1], sizes = [2, 1], strides = [1, 1]} : vector<2x5xf32> to vector<2x1xf32>
    %769 = vector.broadcast %768 : vector<2x1xf32> to vector<2x20xf32>
    %770 = vector.broadcast %493 : vector<1x20xf32> to vector<2x20xf32>
    %771 = arith.mulf %769, %770 : vector<2x20xf32>
    %772 = vector.extract_strided_slice %737 {offsets = [0, 2], sizes = [2, 1], strides = [1, 1]} : vector<2x5xf32> to vector<2x1xf32>
    %773 = vector.broadcast %772 : vector<2x1xf32> to vector<2x20xf32>
    %774 = vector.broadcast %494 : vector<1x20xf32> to vector<2x20xf32>
    %775 = arith.mulf %773, %774 : vector<2x20xf32>
    %776 = vector.extract_strided_slice %737 {offsets = [0, 3], sizes = [2, 1], strides = [1, 1]} : vector<2x5xf32> to vector<2x1xf32>
    %777 = vector.broadcast %776 : vector<2x1xf32> to vector<2x20xf32>
    %778 = vector.broadcast %495 : vector<1x20xf32> to vector<2x20xf32>
    %779 = arith.mulf %777, %778 : vector<2x20xf32>
    %780 = vector.extract_strided_slice %737 {offsets = [0, 4], sizes = [2, 1], strides = [1, 1]} : vector<2x5xf32> to vector<2x1xf32>
    %781 = vector.broadcast %780 : vector<2x1xf32> to vector<2x20xf32>
    %782 = vector.broadcast %496 : vector<1x20xf32> to vector<2x20xf32>
    %783 = arith.mulf %781, %782 : vector<2x20xf32>
    %784 = arith.addf %767, %771 : vector<2x20xf32>
    %785 = arith.addf %775, %779 : vector<2x20xf32>
    %786 = arith.addf %784, %785 : vector<2x20xf32>
    %787 = arith.addf %786, %783 : vector<2x20xf32>
    %788 = arith.addf %763, %787 : vector<2x20xf32>
    %789 = vector.extract_strided_slice %788 {offsets = [0, 0], sizes = [2, 15], strides = [1, 1]} : vector<2x20xf32> to vector<2x15xf32>
    %790 = arith.negf %789 : vector<2x15xf32>
    %791 = math.exp %790 : vector<2x15xf32>
    %cst_34 = arith.constant 1.000000e+00 : f32
    %792 = vector.broadcast %cst_34 : f32 to vector<2x15xf32>
    %793 = arith.addf %792, %791 : vector<2x15xf32>
    %794 = arith.divf %792, %793 : vector<2x15xf32>
    %795 = vector.extract_strided_slice %788 {offsets = [0, 15], sizes = [2, 5], strides = [1, 1]} : vector<2x20xf32> to vector<2x5xf32>
    %796 = math.tanh %795 : vector<2x5xf32>
    %797 = vector.extract_strided_slice %794 {offsets = [0, 0], sizes = [2, 5], strides = [1, 1]} : vector<2x15xf32> to vector<2x5xf32>
    %798 = vector.extract_strided_slice %794 {offsets = [0, 5], sizes = [2, 5], strides = [1, 1]} : vector<2x15xf32> to vector<2x5xf32>
    %799 = vector.extract_strided_slice %794 {offsets = [0, 10], sizes = [2, 5], strides = [1, 1]} : vector<2x15xf32> to vector<2x5xf32>
    %800 = arith.mulf %798, %735 : vector<2x5xf32>
    %801 = arith.mulf %797, %796 : vector<2x5xf32>
    %802 = arith.addf %800, %801 : vector<2x5xf32>
    %803 = math.tanh %802 : vector<2x5xf32>
    %804 = arith.mulf %799, %803 : vector<2x5xf32>
    %805 = vector.extract_strided_slice %362 {offsets = [0, 0], sizes = [2, 1], strides = [1, 1]} : vector<2x5xf32> to vector<2x1xf32>
    %806 = vector.broadcast %805 : vector<2x1xf32> to vector<2x20xf32>
    %807 = vector.broadcast %487 : vector<1x20xf32> to vector<2x20xf32>
    %808 = arith.mulf %806, %807 : vector<2x20xf32>
    %809 = vector.extract_strided_slice %362 {offsets = [0, 1], sizes = [2, 1], strides = [1, 1]} : vector<2x5xf32> to vector<2x1xf32>
    %810 = vector.broadcast %809 : vector<2x1xf32> to vector<2x20xf32>
    %811 = vector.broadcast %488 : vector<1x20xf32> to vector<2x20xf32>
    %812 = arith.mulf %810, %811 : vector<2x20xf32>
    %813 = vector.extract_strided_slice %362 {offsets = [0, 2], sizes = [2, 1], strides = [1, 1]} : vector<2x5xf32> to vector<2x1xf32>
    %814 = vector.broadcast %813 : vector<2x1xf32> to vector<2x20xf32>
    %815 = vector.broadcast %489 : vector<1x20xf32> to vector<2x20xf32>
    %816 = arith.mulf %814, %815 : vector<2x20xf32>
    %817 = vector.extract_strided_slice %362 {offsets = [0, 3], sizes = [2, 1], strides = [1, 1]} : vector<2x5xf32> to vector<2x1xf32>
    %818 = vector.broadcast %817 : vector<2x1xf32> to vector<2x20xf32>
    %819 = vector.broadcast %490 : vector<1x20xf32> to vector<2x20xf32>
    %820 = arith.mulf %818, %819 : vector<2x20xf32>
    %821 = vector.extract_strided_slice %362 {offsets = [0, 4], sizes = [2, 1], strides = [1, 1]} : vector<2x5xf32> to vector<2x1xf32>
    %822 = vector.broadcast %821 : vector<2x1xf32> to vector<2x20xf32>
    %823 = vector.broadcast %491 : vector<1x20xf32> to vector<2x20xf32>
    %824 = arith.mulf %822, %823 : vector<2x20xf32>
    %825 = arith.addf %808, %812 : vector<2x20xf32>
    %826 = arith.addf %816, %820 : vector<2x20xf32>
    %827 = arith.addf %825, %826 : vector<2x20xf32>
    %828 = arith.addf %827, %824 : vector<2x20xf32>
    %829 = vector.broadcast %497 : vector<1x20xf32> to vector<2x20xf32>
    %830 = arith.addf %829, %828 : vector<2x20xf32>
    %831 = vector.extract_strided_slice %804 {offsets = [0, 0], sizes = [2, 1], strides = [1, 1]} : vector<2x5xf32> to vector<2x1xf32>
    %832 = vector.broadcast %831 : vector<2x1xf32> to vector<2x20xf32>
    %833 = vector.broadcast %492 : vector<1x20xf32> to vector<2x20xf32>
    %834 = arith.mulf %832, %833 : vector<2x20xf32>
    %835 = vector.extract_strided_slice %804 {offsets = [0, 1], sizes = [2, 1], strides = [1, 1]} : vector<2x5xf32> to vector<2x1xf32>
    %836 = vector.broadcast %835 : vector<2x1xf32> to vector<2x20xf32>
    %837 = vector.broadcast %493 : vector<1x20xf32> to vector<2x20xf32>
    %838 = arith.mulf %836, %837 : vector<2x20xf32>
    %839 = vector.extract_strided_slice %804 {offsets = [0, 2], sizes = [2, 1], strides = [1, 1]} : vector<2x5xf32> to vector<2x1xf32>
    %840 = vector.broadcast %839 : vector<2x1xf32> to vector<2x20xf32>
    %841 = vector.broadcast %494 : vector<1x20xf32> to vector<2x20xf32>
    %842 = arith.mulf %840, %841 : vector<2x20xf32>
    %843 = vector.extract_strided_slice %804 {offsets = [0, 3], sizes = [2, 1], strides = [1, 1]} : vector<2x5xf32> to vector<2x1xf32>
    %844 = vector.broadcast %843 : vector<2x1xf32> to vector<2x20xf32>
    %845 = vector.broadcast %495 : vector<1x20xf32> to vector<2x20xf32>
    %846 = arith.mulf %844, %845 : vector<2x20xf32>
    %847 = vector.extract_strided_slice %804 {offsets = [0, 4], sizes = [2, 1], strides = [1, 1]} : vector<2x5xf32> to vector<2x1xf32>
    %848 = vector.broadcast %847 : vector<2x1xf32> to vector<2x20xf32>
    %849 = vector.broadcast %496 : vector<1x20xf32> to vector<2x20xf32>
    %850 = arith.mulf %848, %849 : vector<2x20xf32>
    %851 = arith.addf %834, %838 : vector<2x20xf32>
    %852 = arith.addf %842, %846 : vector<2x20xf32>
    %853 = arith.addf %851, %852 : vector<2x20xf32>
    %854 = arith.addf %853, %850 : vector<2x20xf32>
    %855 = arith.addf %830, %854 : vector<2x20xf32>
    %856 = vector.extract_strided_slice %855 {offsets = [0, 0], sizes = [2, 15], strides = [1, 1]} : vector<2x20xf32> to vector<2x15xf32>
    %857 = arith.negf %856 : vector<2x15xf32>
    %858 = math.exp %857 : vector<2x15xf32>
    %cst_35 = arith.constant 1.000000e+00 : f32
    %859 = vector.broadcast %cst_35 : f32 to vector<2x15xf32>
    %860 = arith.addf %859, %858 : vector<2x15xf32>
    %861 = arith.divf %859, %860 : vector<2x15xf32>
    %862 = vector.extract_strided_slice %855 {offsets = [0, 15], sizes = [2, 5], strides = [1, 1]} : vector<2x20xf32> to vector<2x5xf32>
    %863 = math.tanh %862 : vector<2x5xf32>
    %864 = vector.extract_strided_slice %861 {offsets = [0, 0], sizes = [2, 5], strides = [1, 1]} : vector<2x15xf32> to vector<2x5xf32>
    %865 = vector.extract_strided_slice %861 {offsets = [0, 5], sizes = [2, 5], strides = [1, 1]} : vector<2x15xf32> to vector<2x5xf32>
    %866 = vector.extract_strided_slice %861 {offsets = [0, 10], sizes = [2, 5], strides = [1, 1]} : vector<2x15xf32> to vector<2x5xf32>
    %867 = arith.mulf %865, %802 : vector<2x5xf32>
    %868 = arith.mulf %864, %863 : vector<2x5xf32>
    %869 = arith.addf %867, %868 : vector<2x5xf32>
    %870 = math.tanh %869 : vector<2x5xf32>
    %871 = arith.mulf %866, %870 : vector<2x5xf32>
    %872 = vector.extract_strided_slice %424 {offsets = [0, 0], sizes = [2, 1], strides = [1, 1]} : vector<2x5xf32> to vector<2x1xf32>
    %873 = vector.broadcast %872 : vector<2x1xf32> to vector<2x20xf32>
    %874 = vector.broadcast %487 : vector<1x20xf32> to vector<2x20xf32>
    %875 = arith.mulf %873, %874 : vector<2x20xf32>
    %876 = vector.extract_strided_slice %424 {offsets = [0, 1], sizes = [2, 1], strides = [1, 1]} : vector<2x5xf32> to vector<2x1xf32>
    %877 = vector.broadcast %876 : vector<2x1xf32> to vector<2x20xf32>
    %878 = vector.broadcast %488 : vector<1x20xf32> to vector<2x20xf32>
    %879 = arith.mulf %877, %878 : vector<2x20xf32>
    %880 = vector.extract_strided_slice %424 {offsets = [0, 2], sizes = [2, 1], strides = [1, 1]} : vector<2x5xf32> to vector<2x1xf32>
    %881 = vector.broadcast %880 : vector<2x1xf32> to vector<2x20xf32>
    %882 = vector.broadcast %489 : vector<1x20xf32> to vector<2x20xf32>
    %883 = arith.mulf %881, %882 : vector<2x20xf32>
    %884 = vector.extract_strided_slice %424 {offsets = [0, 3], sizes = [2, 1], strides = [1, 1]} : vector<2x5xf32> to vector<2x1xf32>
    %885 = vector.broadcast %884 : vector<2x1xf32> to vector<2x20xf32>
    %886 = vector.broadcast %490 : vector<1x20xf32> to vector<2x20xf32>
    %887 = arith.mulf %885, %886 : vector<2x20xf32>
    %888 = vector.extract_strided_slice %424 {offsets = [0, 4], sizes = [2, 1], strides = [1, 1]} : vector<2x5xf32> to vector<2x1xf32>
    %889 = vector.broadcast %888 : vector<2x1xf32> to vector<2x20xf32>
    %890 = vector.broadcast %491 : vector<1x20xf32> to vector<2x20xf32>
    %891 = arith.mulf %889, %890 : vector<2x20xf32>
    %892 = arith.addf %875, %879 : vector<2x20xf32>
    %893 = arith.addf %883, %887 : vector<2x20xf32>
    %894 = arith.addf %892, %893 : vector<2x20xf32>
    %895 = arith.addf %894, %891 : vector<2x20xf32>
    %896 = vector.broadcast %497 : vector<1x20xf32> to vector<2x20xf32>
    %897 = arith.addf %896, %895 : vector<2x20xf32>
    %898 = vector.extract_strided_slice %871 {offsets = [0, 0], sizes = [2, 1], strides = [1, 1]} : vector<2x5xf32> to vector<2x1xf32>
    %899 = vector.broadcast %898 : vector<2x1xf32> to vector<2x20xf32>
    %900 = vector.broadcast %492 : vector<1x20xf32> to vector<2x20xf32>
    %901 = arith.mulf %899, %900 : vector<2x20xf32>
    %902 = vector.extract_strided_slice %871 {offsets = [0, 1], sizes = [2, 1], strides = [1, 1]} : vector<2x5xf32> to vector<2x1xf32>
    %903 = vector.broadcast %902 : vector<2x1xf32> to vector<2x20xf32>
    %904 = vector.broadcast %493 : vector<1x20xf32> to vector<2x20xf32>
    %905 = arith.mulf %903, %904 : vector<2x20xf32>
    %906 = vector.extract_strided_slice %871 {offsets = [0, 2], sizes = [2, 1], strides = [1, 1]} : vector<2x5xf32> to vector<2x1xf32>
    %907 = vector.broadcast %906 : vector<2x1xf32> to vector<2x20xf32>
    %908 = vector.broadcast %494 : vector<1x20xf32> to vector<2x20xf32>
    %909 = arith.mulf %907, %908 : vector<2x20xf32>
    %910 = vector.extract_strided_slice %871 {offsets = [0, 3], sizes = [2, 1], strides = [1, 1]} : vector<2x5xf32> to vector<2x1xf32>
    %911 = vector.broadcast %910 : vector<2x1xf32> to vector<2x20xf32>
    %912 = vector.broadcast %495 : vector<1x20xf32> to vector<2x20xf32>
    %913 = arith.mulf %911, %912 : vector<2x20xf32>
    %914 = vector.extract_strided_slice %871 {offsets = [0, 4], sizes = [2, 1], strides = [1, 1]} : vector<2x5xf32> to vector<2x1xf32>
    %915 = vector.broadcast %914 : vector<2x1xf32> to vector<2x20xf32>
    %916 = vector.broadcast %496 : vector<1x20xf32> to vector<2x20xf32>
    %917 = arith.mulf %915, %916 : vector<2x20xf32>
    %918 = arith.addf %901, %905 : vector<2x20xf32>
    %919 = arith.addf %909, %913 : vector<2x20xf32>
    %920 = arith.addf %918, %919 : vector<2x20xf32>
    %921 = arith.addf %920, %917 : vector<2x20xf32>
    %922 = arith.addf %897, %921 : vector<2x20xf32>
    %923 = vector.extract_strided_slice %922 {offsets = [0, 0], sizes = [2, 15], strides = [1, 1]} : vector<2x20xf32> to vector<2x15xf32>
    %924 = arith.negf %923 : vector<2x15xf32>
    %925 = math.exp %924 : vector<2x15xf32>
    %cst_36 = arith.constant 1.000000e+00 : f32
    %926 = vector.broadcast %cst_36 : f32 to vector<2x15xf32>
    %927 = arith.addf %926, %925 : vector<2x15xf32>
    %928 = arith.divf %926, %927 : vector<2x15xf32>
    %929 = vector.extract_strided_slice %922 {offsets = [0, 15], sizes = [2, 5], strides = [1, 1]} : vector<2x20xf32> to vector<2x5xf32>
    %930 = math.tanh %929 : vector<2x5xf32>
    %931 = vector.extract_strided_slice %928 {offsets = [0, 0], sizes = [2, 5], strides = [1, 1]} : vector<2x15xf32> to vector<2x5xf32>
    %932 = vector.extract_strided_slice %928 {offsets = [0, 5], sizes = [2, 5], strides = [1, 1]} : vector<2x15xf32> to vector<2x5xf32>
    %933 = vector.extract_strided_slice %928 {offsets = [0, 10], sizes = [2, 5], strides = [1, 1]} : vector<2x15xf32> to vector<2x5xf32>
    %934 = arith.mulf %932, %869 : vector<2x5xf32>
    %935 = arith.mulf %931, %930 : vector<2x5xf32>
    %936 = arith.addf %934, %935 : vector<2x5xf32>
    %937 = math.tanh %936 : vector<2x5xf32>
    %938 = arith.mulf %933, %937 : vector<2x5xf32>
    %939 = vector.extract_strided_slice %486 {offsets = [0, 0], sizes = [2, 1], strides = [1, 1]} : vector<2x5xf32> to vector<2x1xf32>
    %940 = vector.broadcast %939 : vector<2x1xf32> to vector<2x20xf32>
    %941 = vector.broadcast %487 : vector<1x20xf32> to vector<2x20xf32>
    %942 = arith.mulf %940, %941 : vector<2x20xf32>
    %943 = vector.extract_strided_slice %486 {offsets = [0, 1], sizes = [2, 1], strides = [1, 1]} : vector<2x5xf32> to vector<2x1xf32>
    %944 = vector.broadcast %943 : vector<2x1xf32> to vector<2x20xf32>
    %945 = vector.broadcast %488 : vector<1x20xf32> to vector<2x20xf32>
    %946 = arith.mulf %944, %945 : vector<2x20xf32>
    %947 = vector.extract_strided_slice %486 {offsets = [0, 2], sizes = [2, 1], strides = [1, 1]} : vector<2x5xf32> to vector<2x1xf32>
    %948 = vector.broadcast %947 : vector<2x1xf32> to vector<2x20xf32>
    %949 = vector.broadcast %489 : vector<1x20xf32> to vector<2x20xf32>
    %950 = arith.mulf %948, %949 : vector<2x20xf32>
    %951 = vector.extract_strided_slice %486 {offsets = [0, 3], sizes = [2, 1], strides = [1, 1]} : vector<2x5xf32> to vector<2x1xf32>
    %952 = vector.broadcast %951 : vector<2x1xf32> to vector<2x20xf32>
    %953 = vector.broadcast %490 : vector<1x20xf32> to vector<2x20xf32>
    %954 = arith.mulf %952, %953 : vector<2x20xf32>
    %955 = vector.extract_strided_slice %486 {offsets = [0, 4], sizes = [2, 1], strides = [1, 1]} : vector<2x5xf32> to vector<2x1xf32>
    %956 = vector.broadcast %955 : vector<2x1xf32> to vector<2x20xf32>
    %957 = vector.broadcast %491 : vector<1x20xf32> to vector<2x20xf32>
    %958 = arith.mulf %956, %957 : vector<2x20xf32>
    %959 = arith.addf %942, %946 : vector<2x20xf32>
    %960 = arith.addf %950, %954 : vector<2x20xf32>
    %961 = arith.addf %959, %960 : vector<2x20xf32>
    %962 = arith.addf %961, %958 : vector<2x20xf32>
    %963 = vector.broadcast %497 : vector<1x20xf32> to vector<2x20xf32>
    %964 = arith.addf %963, %962 : vector<2x20xf32>
    %965 = vector.extract_strided_slice %938 {offsets = [0, 0], sizes = [2, 1], strides = [1, 1]} : vector<2x5xf32> to vector<2x1xf32>
    %966 = vector.broadcast %965 : vector<2x1xf32> to vector<2x20xf32>
    %967 = vector.broadcast %492 : vector<1x20xf32> to vector<2x20xf32>
    %968 = arith.mulf %966, %967 : vector<2x20xf32>
    %969 = vector.extract_strided_slice %938 {offsets = [0, 1], sizes = [2, 1], strides = [1, 1]} : vector<2x5xf32> to vector<2x1xf32>
    %970 = vector.broadcast %969 : vector<2x1xf32> to vector<2x20xf32>
    %971 = vector.broadcast %493 : vector<1x20xf32> to vector<2x20xf32>
    %972 = arith.mulf %970, %971 : vector<2x20xf32>
    %973 = vector.extract_strided_slice %938 {offsets = [0, 2], sizes = [2, 1], strides = [1, 1]} : vector<2x5xf32> to vector<2x1xf32>
    %974 = vector.broadcast %973 : vector<2x1xf32> to vector<2x20xf32>
    %975 = vector.broadcast %494 : vector<1x20xf32> to vector<2x20xf32>
    %976 = arith.mulf %974, %975 : vector<2x20xf32>
    %977 = vector.extract_strided_slice %938 {offsets = [0, 3], sizes = [2, 1], strides = [1, 1]} : vector<2x5xf32> to vector<2x1xf32>
    %978 = vector.broadcast %977 : vector<2x1xf32> to vector<2x20xf32>
    %979 = vector.broadcast %495 : vector<1x20xf32> to vector<2x20xf32>
    %980 = arith.mulf %978, %979 : vector<2x20xf32>
    %981 = vector.extract_strided_slice %938 {offsets = [0, 4], sizes = [2, 1], strides = [1, 1]} : vector<2x5xf32> to vector<2x1xf32>
    %982 = vector.broadcast %981 : vector<2x1xf32> to vector<2x20xf32>
    %983 = vector.broadcast %496 : vector<1x20xf32> to vector<2x20xf32>
    %984 = arith.mulf %982, %983 : vector<2x20xf32>
    %985 = arith.addf %968, %972 : vector<2x20xf32>
    %986 = arith.addf %976, %980 : vector<2x20xf32>
    %987 = arith.addf %985, %986 : vector<2x20xf32>
    %988 = arith.addf %987, %984 : vector<2x20xf32>
    %989 = arith.addf %964, %988 : vector<2x20xf32>
    %990 = vector.extract_strided_slice %989 {offsets = [0, 0], sizes = [2, 15], strides = [1, 1]} : vector<2x20xf32> to vector<2x15xf32>
    %991 = arith.negf %990 : vector<2x15xf32>
    %992 = math.exp %991 : vector<2x15xf32>
    %cst_37 = arith.constant 1.000000e+00 : f32
    %993 = vector.broadcast %cst_37 : f32 to vector<2x15xf32>
    %994 = arith.addf %993, %992 : vector<2x15xf32>
    %995 = arith.divf %993, %994 : vector<2x15xf32>
    %996 = vector.extract_strided_slice %989 {offsets = [0, 15], sizes = [2, 5], strides = [1, 1]} : vector<2x20xf32> to vector<2x5xf32>
    %997 = math.tanh %996 : vector<2x5xf32>
    %998 = vector.extract_strided_slice %995 {offsets = [0, 0], sizes = [2, 5], strides = [1, 1]} : vector<2x15xf32> to vector<2x5xf32>
    %999 = vector.extract_strided_slice %995 {offsets = [0, 5], sizes = [2, 5], strides = [1, 1]} : vector<2x15xf32> to vector<2x5xf32>
    %1000 = vector.extract_strided_slice %995 {offsets = [0, 10], sizes = [2, 5], strides = [1, 1]} : vector<2x15xf32> to vector<2x5xf32>
    %1001 = arith.mulf %999, %936 : vector<2x5xf32>
    %1002 = arith.mulf %998, %997 : vector<2x5xf32>
    %1003 = arith.addf %1001, %1002 : vector<2x5xf32>
    %1004 = math.tanh %1003 : vector<2x5xf32>
    %1005 = arith.mulf %1000, %1004 : vector<2x5xf32>
    %c9 = arith.constant 9 : index
    %c0_38 = arith.constant 0 : index
    %1006 = vector.load %arg1[%c9, %c0_38] : memref<44x20xf32, #tpu.memory_space<vmem>>, vector<1x20xf32>
    %c10 = arith.constant 10 : index
    %c0_39 = arith.constant 0 : index
    %1007 = vector.load %arg1[%c10, %c0_39] : memref<44x20xf32, #tpu.memory_space<vmem>>, vector<1x20xf32>
    %c11 = arith.constant 11 : index
    %c0_40 = arith.constant 0 : index
    %1008 = vector.load %arg1[%c11, %c0_40] : memref<44x20xf32, #tpu.memory_space<vmem>>, vector<1x20xf32>
    %c12 = arith.constant 12 : index
    %c0_41 = arith.constant 0 : index
    %1009 = vector.load %arg1[%c12, %c0_41] : memref<44x20xf32, #tpu.memory_space<vmem>>, vector<1x20xf32>
    %c13 = arith.constant 13 : index
    %c0_42 = arith.constant 0 : index
    %1010 = vector.load %arg1[%c13, %c0_42] : memref<44x20xf32, #tpu.memory_space<vmem>>, vector<1x20xf32>
    %c29 = arith.constant 29 : index
    %c0_43 = arith.constant 0 : index
    %1011 = vector.load %arg1[%c29, %c0_43] : memref<44x20xf32, #tpu.memory_space<vmem>>, vector<1x20xf32>
    %c30 = arith.constant 30 : index
    %c0_44 = arith.constant 0 : index
    %1012 = vector.load %arg1[%c30, %c0_44] : memref<44x20xf32, #tpu.memory_space<vmem>>, vector<1x20xf32>
    %c31 = arith.constant 31 : index
    %c0_45 = arith.constant 0 : index
    %1013 = vector.load %arg1[%c31, %c0_45] : memref<44x20xf32, #tpu.memory_space<vmem>>, vector<1x20xf32>
    %c32 = arith.constant 32 : index
    %c0_46 = arith.constant 0 : index
    %1014 = vector.load %arg1[%c32, %c0_46] : memref<44x20xf32, #tpu.memory_space<vmem>>, vector<1x20xf32>
    %c33 = arith.constant 33 : index
    %c0_47 = arith.constant 0 : index
    %1015 = vector.load %arg1[%c33, %c0_47] : memref<44x20xf32, #tpu.memory_space<vmem>>, vector<1x20xf32>
    %c41 = arith.constant 41 : index
    %c0_48 = arith.constant 0 : index
    %1016 = vector.load %arg1[%c41, %c0_48] : memref<44x20xf32, #tpu.memory_space<vmem>>, vector<1x20xf32>
    %1017 = vector.extract_strided_slice %536 {offsets = [0, 0], sizes = [2, 1], strides = [1, 1]} : vector<2x5xf32> to vector<2x1xf32>
    %1018 = vector.broadcast %1017 : vector<2x1xf32> to vector<2x20xf32>
    %1019 = vector.broadcast %1006 : vector<1x20xf32> to vector<2x20xf32>
    %1020 = arith.mulf %1018, %1019 : vector<2x20xf32>
    %1021 = vector.extract_strided_slice %536 {offsets = [0, 1], sizes = [2, 1], strides = [1, 1]} : vector<2x5xf32> to vector<2x1xf32>
    %1022 = vector.broadcast %1021 : vector<2x1xf32> to vector<2x20xf32>
    %1023 = vector.broadcast %1007 : vector<1x20xf32> to vector<2x20xf32>
    %1024 = arith.mulf %1022, %1023 : vector<2x20xf32>
    %1025 = vector.extract_strided_slice %536 {offsets = [0, 2], sizes = [2, 1], strides = [1, 1]} : vector<2x5xf32> to vector<2x1xf32>
    %1026 = vector.broadcast %1025 : vector<2x1xf32> to vector<2x20xf32>
    %1027 = vector.broadcast %1008 : vector<1x20xf32> to vector<2x20xf32>
    %1028 = arith.mulf %1026, %1027 : vector<2x20xf32>
    %1029 = vector.extract_strided_slice %536 {offsets = [0, 3], sizes = [2, 1], strides = [1, 1]} : vector<2x5xf32> to vector<2x1xf32>
    %1030 = vector.broadcast %1029 : vector<2x1xf32> to vector<2x20xf32>
    %1031 = vector.broadcast %1009 : vector<1x20xf32> to vector<2x20xf32>
    %1032 = arith.mulf %1030, %1031 : vector<2x20xf32>
    %1033 = vector.extract_strided_slice %536 {offsets = [0, 4], sizes = [2, 1], strides = [1, 1]} : vector<2x5xf32> to vector<2x1xf32>
    %1034 = vector.broadcast %1033 : vector<2x1xf32> to vector<2x20xf32>
    %1035 = vector.broadcast %1010 : vector<1x20xf32> to vector<2x20xf32>
    %1036 = arith.mulf %1034, %1035 : vector<2x20xf32>
    %1037 = arith.addf %1020, %1024 : vector<2x20xf32>
    %1038 = arith.addf %1028, %1032 : vector<2x20xf32>
    %1039 = arith.addf %1037, %1038 : vector<2x20xf32>
    %1040 = arith.addf %1039, %1036 : vector<2x20xf32>
    %1041 = vector.broadcast %1016 : vector<1x20xf32> to vector<2x20xf32>
    %1042 = arith.addf %1041, %1040 : vector<2x20xf32>
    %1043 = vector.extract_strided_slice %1042 {offsets = [0, 0], sizes = [2, 15], strides = [1, 1]} : vector<2x20xf32> to vector<2x15xf32>
    %1044 = arith.negf %1043 : vector<2x15xf32>
    %1045 = math.exp %1044 : vector<2x15xf32>
    %cst_49 = arith.constant 1.000000e+00 : f32
    %1046 = vector.broadcast %cst_49 : f32 to vector<2x15xf32>
    %1047 = arith.addf %1046, %1045 : vector<2x15xf32>
    %1048 = arith.divf %1046, %1047 : vector<2x15xf32>
    %1049 = vector.extract_strided_slice %1042 {offsets = [0, 15], sizes = [2, 5], strides = [1, 1]} : vector<2x20xf32> to vector<2x5xf32>
    %1050 = math.tanh %1049 : vector<2x5xf32>
    %1051 = vector.extract_strided_slice %1048 {offsets = [0, 0], sizes = [2, 5], strides = [1, 1]} : vector<2x15xf32> to vector<2x5xf32>
    %1052 = vector.extract_strided_slice %1048 {offsets = [0, 10], sizes = [2, 5], strides = [1, 1]} : vector<2x15xf32> to vector<2x5xf32>
    %1053 = arith.mulf %1051, %1050 : vector<2x5xf32>
    %1054 = math.tanh %1053 : vector<2x5xf32>
    %1055 = arith.mulf %1052, %1054 : vector<2x5xf32>
    %1056 = vector.extract_strided_slice %603 {offsets = [0, 0], sizes = [2, 1], strides = [1, 1]} : vector<2x5xf32> to vector<2x1xf32>
    %1057 = vector.broadcast %1056 : vector<2x1xf32> to vector<2x20xf32>
    %1058 = vector.broadcast %1006 : vector<1x20xf32> to vector<2x20xf32>
    %1059 = arith.mulf %1057, %1058 : vector<2x20xf32>
    %1060 = vector.extract_strided_slice %603 {offsets = [0, 1], sizes = [2, 1], strides = [1, 1]} : vector<2x5xf32> to vector<2x1xf32>
    %1061 = vector.broadcast %1060 : vector<2x1xf32> to vector<2x20xf32>
    %1062 = vector.broadcast %1007 : vector<1x20xf32> to vector<2x20xf32>
    %1063 = arith.mulf %1061, %1062 : vector<2x20xf32>
    %1064 = vector.extract_strided_slice %603 {offsets = [0, 2], sizes = [2, 1], strides = [1, 1]} : vector<2x5xf32> to vector<2x1xf32>
    %1065 = vector.broadcast %1064 : vector<2x1xf32> to vector<2x20xf32>
    %1066 = vector.broadcast %1008 : vector<1x20xf32> to vector<2x20xf32>
    %1067 = arith.mulf %1065, %1066 : vector<2x20xf32>
    %1068 = vector.extract_strided_slice %603 {offsets = [0, 3], sizes = [2, 1], strides = [1, 1]} : vector<2x5xf32> to vector<2x1xf32>
    %1069 = vector.broadcast %1068 : vector<2x1xf32> to vector<2x20xf32>
    %1070 = vector.broadcast %1009 : vector<1x20xf32> to vector<2x20xf32>
    %1071 = arith.mulf %1069, %1070 : vector<2x20xf32>
    %1072 = vector.extract_strided_slice %603 {offsets = [0, 4], sizes = [2, 1], strides = [1, 1]} : vector<2x5xf32> to vector<2x1xf32>
    %1073 = vector.broadcast %1072 : vector<2x1xf32> to vector<2x20xf32>
    %1074 = vector.broadcast %1010 : vector<1x20xf32> to vector<2x20xf32>
    %1075 = arith.mulf %1073, %1074 : vector<2x20xf32>
    %1076 = arith.addf %1059, %1063 : vector<2x20xf32>
    %1077 = arith.addf %1067, %1071 : vector<2x20xf32>
    %1078 = arith.addf %1076, %1077 : vector<2x20xf32>
    %1079 = arith.addf %1078, %1075 : vector<2x20xf32>
    %1080 = vector.broadcast %1016 : vector<1x20xf32> to vector<2x20xf32>
    %1081 = arith.addf %1080, %1079 : vector<2x20xf32>
    %1082 = vector.extract_strided_slice %1055 {offsets = [0, 0], sizes = [2, 1], strides = [1, 1]} : vector<2x5xf32> to vector<2x1xf32>
    %1083 = vector.broadcast %1082 : vector<2x1xf32> to vector<2x20xf32>
    %1084 = vector.broadcast %1011 : vector<1x20xf32> to vector<2x20xf32>
    %1085 = arith.mulf %1083, %1084 : vector<2x20xf32>
    %1086 = vector.extract_strided_slice %1055 {offsets = [0, 1], sizes = [2, 1], strides = [1, 1]} : vector<2x5xf32> to vector<2x1xf32>
    %1087 = vector.broadcast %1086 : vector<2x1xf32> to vector<2x20xf32>
    %1088 = vector.broadcast %1012 : vector<1x20xf32> to vector<2x20xf32>
    %1089 = arith.mulf %1087, %1088 : vector<2x20xf32>
    %1090 = vector.extract_strided_slice %1055 {offsets = [0, 2], sizes = [2, 1], strides = [1, 1]} : vector<2x5xf32> to vector<2x1xf32>
    %1091 = vector.broadcast %1090 : vector<2x1xf32> to vector<2x20xf32>
    %1092 = vector.broadcast %1013 : vector<1x20xf32> to vector<2x20xf32>
    %1093 = arith.mulf %1091, %1092 : vector<2x20xf32>
    %1094 = vector.extract_strided_slice %1055 {offsets = [0, 3], sizes = [2, 1], strides = [1, 1]} : vector<2x5xf32> to vector<2x1xf32>
    %1095 = vector.broadcast %1094 : vector<2x1xf32> to vector<2x20xf32>
    %1096 = vector.broadcast %1014 : vector<1x20xf32> to vector<2x20xf32>
    %1097 = arith.mulf %1095, %1096 : vector<2x20xf32>
    %1098 = vector.extract_strided_slice %1055 {offsets = [0, 4], sizes = [2, 1], strides = [1, 1]} : vector<2x5xf32> to vector<2x1xf32>
    %1099 = vector.broadcast %1098 : vector<2x1xf32> to vector<2x20xf32>
    %1100 = vector.broadcast %1015 : vector<1x20xf32> to vector<2x20xf32>
    %1101 = arith.mulf %1099, %1100 : vector<2x20xf32>
    %1102 = arith.addf %1085, %1089 : vector<2x20xf32>
    %1103 = arith.addf %1093, %1097 : vector<2x20xf32>
    %1104 = arith.addf %1102, %1103 : vector<2x20xf32>
    %1105 = arith.addf %1104, %1101 : vector<2x20xf32>
    %1106 = arith.addf %1081, %1105 : vector<2x20xf32>
    %1107 = vector.extract_strided_slice %1106 {offsets = [0, 0], sizes = [2, 15], strides = [1, 1]} : vector<2x20xf32> to vector<2x15xf32>
    %1108 = arith.negf %1107 : vector<2x15xf32>
    %1109 = math.exp %1108 : vector<2x15xf32>
    %cst_50 = arith.constant 1.000000e+00 : f32
    %1110 = vector.broadcast %cst_50 : f32 to vector<2x15xf32>
    %1111 = arith.addf %1110, %1109 : vector<2x15xf32>
    %1112 = arith.divf %1110, %1111 : vector<2x15xf32>
    %1113 = vector.extract_strided_slice %1106 {offsets = [0, 15], sizes = [2, 5], strides = [1, 1]} : vector<2x20xf32> to vector<2x5xf32>
    %1114 = math.tanh %1113 : vector<2x5xf32>
    %1115 = vector.extract_strided_slice %1112 {offsets = [0, 0], sizes = [2, 5], strides = [1, 1]} : vector<2x15xf32> to vector<2x5xf32>
    %1116 = vector.extract_strided_slice %1112 {offsets = [0, 5], sizes = [2, 5], strides = [1, 1]} : vector<2x15xf32> to vector<2x5xf32>
    %1117 = vector.extract_strided_slice %1112 {offsets = [0, 10], sizes = [2, 5], strides = [1, 1]} : vector<2x15xf32> to vector<2x5xf32>
    %1118 = arith.mulf %1116, %1053 : vector<2x5xf32>
    %1119 = arith.mulf %1115, %1114 : vector<2x5xf32>
    %1120 = arith.addf %1118, %1119 : vector<2x5xf32>
    %1121 = math.tanh %1120 : vector<2x5xf32>
    %1122 = arith.mulf %1117, %1121 : vector<2x5xf32>
    %1123 = vector.extract_strided_slice %670 {offsets = [0, 0], sizes = [2, 1], strides = [1, 1]} : vector<2x5xf32> to vector<2x1xf32>
    %1124 = vector.broadcast %1123 : vector<2x1xf32> to vector<2x20xf32>
    %1125 = vector.broadcast %1006 : vector<1x20xf32> to vector<2x20xf32>
    %1126 = arith.mulf %1124, %1125 : vector<2x20xf32>
    %1127 = vector.extract_strided_slice %670 {offsets = [0, 1], sizes = [2, 1], strides = [1, 1]} : vector<2x5xf32> to vector<2x1xf32>
    %1128 = vector.broadcast %1127 : vector<2x1xf32> to vector<2x20xf32>
    %1129 = vector.broadcast %1007 : vector<1x20xf32> to vector<2x20xf32>
    %1130 = arith.mulf %1128, %1129 : vector<2x20xf32>
    %1131 = vector.extract_strided_slice %670 {offsets = [0, 2], sizes = [2, 1], strides = [1, 1]} : vector<2x5xf32> to vector<2x1xf32>
    %1132 = vector.broadcast %1131 : vector<2x1xf32> to vector<2x20xf32>
    %1133 = vector.broadcast %1008 : vector<1x20xf32> to vector<2x20xf32>
    %1134 = arith.mulf %1132, %1133 : vector<2x20xf32>
    %1135 = vector.extract_strided_slice %670 {offsets = [0, 3], sizes = [2, 1], strides = [1, 1]} : vector<2x5xf32> to vector<2x1xf32>
    %1136 = vector.broadcast %1135 : vector<2x1xf32> to vector<2x20xf32>
    %1137 = vector.broadcast %1009 : vector<1x20xf32> to vector<2x20xf32>
    %1138 = arith.mulf %1136, %1137 : vector<2x20xf32>
    %1139 = vector.extract_strided_slice %670 {offsets = [0, 4], sizes = [2, 1], strides = [1, 1]} : vector<2x5xf32> to vector<2x1xf32>
    %1140 = vector.broadcast %1139 : vector<2x1xf32> to vector<2x20xf32>
    %1141 = vector.broadcast %1010 : vector<1x20xf32> to vector<2x20xf32>
    %1142 = arith.mulf %1140, %1141 : vector<2x20xf32>
    %1143 = arith.addf %1126, %1130 : vector<2x20xf32>
    %1144 = arith.addf %1134, %1138 : vector<2x20xf32>
    %1145 = arith.addf %1143, %1144 : vector<2x20xf32>
    %1146 = arith.addf %1145, %1142 : vector<2x20xf32>
    %1147 = vector.broadcast %1016 : vector<1x20xf32> to vector<2x20xf32>
    %1148 = arith.addf %1147, %1146 : vector<2x20xf32>
    %1149 = vector.extract_strided_slice %1122 {offsets = [0, 0], sizes = [2, 1], strides = [1, 1]} : vector<2x5xf32> to vector<2x1xf32>
    %1150 = vector.broadcast %1149 : vector<2x1xf32> to vector<2x20xf32>
    %1151 = vector.broadcast %1011 : vector<1x20xf32> to vector<2x20xf32>
    %1152 = arith.mulf %1150, %1151 : vector<2x20xf32>
    %1153 = vector.extract_strided_slice %1122 {offsets = [0, 1], sizes = [2, 1], strides = [1, 1]} : vector<2x5xf32> to vector<2x1xf32>
    %1154 = vector.broadcast %1153 : vector<2x1xf32> to vector<2x20xf32>
    %1155 = vector.broadcast %1012 : vector<1x20xf32> to vector<2x20xf32>
    %1156 = arith.mulf %1154, %1155 : vector<2x20xf32>
    %1157 = vector.extract_strided_slice %1122 {offsets = [0, 2], sizes = [2, 1], strides = [1, 1]} : vector<2x5xf32> to vector<2x1xf32>
    %1158 = vector.broadcast %1157 : vector<2x1xf32> to vector<2x20xf32>
    %1159 = vector.broadcast %1013 : vector<1x20xf32> to vector<2x20xf32>
    %1160 = arith.mulf %1158, %1159 : vector<2x20xf32>
    %1161 = vector.extract_strided_slice %1122 {offsets = [0, 3], sizes = [2, 1], strides = [1, 1]} : vector<2x5xf32> to vector<2x1xf32>
    %1162 = vector.broadcast %1161 : vector<2x1xf32> to vector<2x20xf32>
    %1163 = vector.broadcast %1014 : vector<1x20xf32> to vector<2x20xf32>
    %1164 = arith.mulf %1162, %1163 : vector<2x20xf32>
    %1165 = vector.extract_strided_slice %1122 {offsets = [0, 4], sizes = [2, 1], strides = [1, 1]} : vector<2x5xf32> to vector<2x1xf32>
    %1166 = vector.broadcast %1165 : vector<2x1xf32> to vector<2x20xf32>
    %1167 = vector.broadcast %1015 : vector<1x20xf32> to vector<2x20xf32>
    %1168 = arith.mulf %1166, %1167 : vector<2x20xf32>
    %1169 = arith.addf %1152, %1156 : vector<2x20xf32>
    %1170 = arith.addf %1160, %1164 : vector<2x20xf32>
    %1171 = arith.addf %1169, %1170 : vector<2x20xf32>
    %1172 = arith.addf %1171, %1168 : vector<2x20xf32>
    %1173 = arith.addf %1148, %1172 : vector<2x20xf32>
    %1174 = vector.extract_strided_slice %1173 {offsets = [0, 0], sizes = [2, 15], strides = [1, 1]} : vector<2x20xf32> to vector<2x15xf32>
    %1175 = arith.negf %1174 : vector<2x15xf32>
    %1176 = math.exp %1175 : vector<2x15xf32>
    %cst_51 = arith.constant 1.000000e+00 : f32
    %1177 = vector.broadcast %cst_51 : f32 to vector<2x15xf32>
    %1178 = arith.addf %1177, %1176 : vector<2x15xf32>
    %1179 = arith.divf %1177, %1178 : vector<2x15xf32>
    %1180 = vector.extract_strided_slice %1173 {offsets = [0, 15], sizes = [2, 5], strides = [1, 1]} : vector<2x20xf32> to vector<2x5xf32>
    %1181 = math.tanh %1180 : vector<2x5xf32>
    %1182 = vector.extract_strided_slice %1179 {offsets = [0, 0], sizes = [2, 5], strides = [1, 1]} : vector<2x15xf32> to vector<2x5xf32>
    %1183 = vector.extract_strided_slice %1179 {offsets = [0, 5], sizes = [2, 5], strides = [1, 1]} : vector<2x15xf32> to vector<2x5xf32>
    %1184 = vector.extract_strided_slice %1179 {offsets = [0, 10], sizes = [2, 5], strides = [1, 1]} : vector<2x15xf32> to vector<2x5xf32>
    %1185 = arith.mulf %1183, %1120 : vector<2x5xf32>
    %1186 = arith.mulf %1182, %1181 : vector<2x5xf32>
    %1187 = arith.addf %1185, %1186 : vector<2x5xf32>
    %1188 = math.tanh %1187 : vector<2x5xf32>
    %1189 = arith.mulf %1184, %1188 : vector<2x5xf32>
    %1190 = vector.extract_strided_slice %737 {offsets = [0, 0], sizes = [2, 1], strides = [1, 1]} : vector<2x5xf32> to vector<2x1xf32>
    %1191 = vector.broadcast %1190 : vector<2x1xf32> to vector<2x20xf32>
    %1192 = vector.broadcast %1006 : vector<1x20xf32> to vector<2x20xf32>
    %1193 = arith.mulf %1191, %1192 : vector<2x20xf32>
    %1194 = vector.extract_strided_slice %737 {offsets = [0, 1], sizes = [2, 1], strides = [1, 1]} : vector<2x5xf32> to vector<2x1xf32>
    %1195 = vector.broadcast %1194 : vector<2x1xf32> to vector<2x20xf32>
    %1196 = vector.broadcast %1007 : vector<1x20xf32> to vector<2x20xf32>
    %1197 = arith.mulf %1195, %1196 : vector<2x20xf32>
    %1198 = vector.extract_strided_slice %737 {offsets = [0, 2], sizes = [2, 1], strides = [1, 1]} : vector<2x5xf32> to vector<2x1xf32>
    %1199 = vector.broadcast %1198 : vector<2x1xf32> to vector<2x20xf32>
    %1200 = vector.broadcast %1008 : vector<1x20xf32> to vector<2x20xf32>
    %1201 = arith.mulf %1199, %1200 : vector<2x20xf32>
    %1202 = vector.extract_strided_slice %737 {offsets = [0, 3], sizes = [2, 1], strides = [1, 1]} : vector<2x5xf32> to vector<2x1xf32>
    %1203 = vector.broadcast %1202 : vector<2x1xf32> to vector<2x20xf32>
    %1204 = vector.broadcast %1009 : vector<1x20xf32> to vector<2x20xf32>
    %1205 = arith.mulf %1203, %1204 : vector<2x20xf32>
    %1206 = vector.extract_strided_slice %737 {offsets = [0, 4], sizes = [2, 1], strides = [1, 1]} : vector<2x5xf32> to vector<2x1xf32>
    %1207 = vector.broadcast %1206 : vector<2x1xf32> to vector<2x20xf32>
    %1208 = vector.broadcast %1010 : vector<1x20xf32> to vector<2x20xf32>
    %1209 = arith.mulf %1207, %1208 : vector<2x20xf32>
    %1210 = arith.addf %1193, %1197 : vector<2x20xf32>
    %1211 = arith.addf %1201, %1205 : vector<2x20xf32>
    %1212 = arith.addf %1210, %1211 : vector<2x20xf32>
    %1213 = arith.addf %1212, %1209 : vector<2x20xf32>
    %1214 = vector.broadcast %1016 : vector<1x20xf32> to vector<2x20xf32>
    %1215 = arith.addf %1214, %1213 : vector<2x20xf32>
    %1216 = vector.extract_strided_slice %1189 {offsets = [0, 0], sizes = [2, 1], strides = [1, 1]} : vector<2x5xf32> to vector<2x1xf32>
    %1217 = vector.broadcast %1216 : vector<2x1xf32> to vector<2x20xf32>
    %1218 = vector.broadcast %1011 : vector<1x20xf32> to vector<2x20xf32>
    %1219 = arith.mulf %1217, %1218 : vector<2x20xf32>
    %1220 = vector.extract_strided_slice %1189 {offsets = [0, 1], sizes = [2, 1], strides = [1, 1]} : vector<2x5xf32> to vector<2x1xf32>
    %1221 = vector.broadcast %1220 : vector<2x1xf32> to vector<2x20xf32>
    %1222 = vector.broadcast %1012 : vector<1x20xf32> to vector<2x20xf32>
    %1223 = arith.mulf %1221, %1222 : vector<2x20xf32>
    %1224 = vector.extract_strided_slice %1189 {offsets = [0, 2], sizes = [2, 1], strides = [1, 1]} : vector<2x5xf32> to vector<2x1xf32>
    %1225 = vector.broadcast %1224 : vector<2x1xf32> to vector<2x20xf32>
    %1226 = vector.broadcast %1013 : vector<1x20xf32> to vector<2x20xf32>
    %1227 = arith.mulf %1225, %1226 : vector<2x20xf32>
    %1228 = vector.extract_strided_slice %1189 {offsets = [0, 3], sizes = [2, 1], strides = [1, 1]} : vector<2x5xf32> to vector<2x1xf32>
    %1229 = vector.broadcast %1228 : vector<2x1xf32> to vector<2x20xf32>
    %1230 = vector.broadcast %1014 : vector<1x20xf32> to vector<2x20xf32>
    %1231 = arith.mulf %1229, %1230 : vector<2x20xf32>
    %1232 = vector.extract_strided_slice %1189 {offsets = [0, 4], sizes = [2, 1], strides = [1, 1]} : vector<2x5xf32> to vector<2x1xf32>
    %1233 = vector.broadcast %1232 : vector<2x1xf32> to vector<2x20xf32>
    %1234 = vector.broadcast %1015 : vector<1x20xf32> to vector<2x20xf32>
    %1235 = arith.mulf %1233, %1234 : vector<2x20xf32>
    %1236 = arith.addf %1219, %1223 : vector<2x20xf32>
    %1237 = arith.addf %1227, %1231 : vector<2x20xf32>
    %1238 = arith.addf %1236, %1237 : vector<2x20xf32>
    %1239 = arith.addf %1238, %1235 : vector<2x20xf32>
    %1240 = arith.addf %1215, %1239 : vector<2x20xf32>
    %1241 = vector.extract_strided_slice %1240 {offsets = [0, 0], sizes = [2, 15], strides = [1, 1]} : vector<2x20xf32> to vector<2x15xf32>
    %1242 = arith.negf %1241 : vector<2x15xf32>
    %1243 = math.exp %1242 : vector<2x15xf32>
    %cst_52 = arith.constant 1.000000e+00 : f32
    %1244 = vector.broadcast %cst_52 : f32 to vector<2x15xf32>
    %1245 = arith.addf %1244, %1243 : vector<2x15xf32>
    %1246 = arith.divf %1244, %1245 : vector<2x15xf32>
    %1247 = vector.extract_strided_slice %1240 {offsets = [0, 15], sizes = [2, 5], strides = [1, 1]} : vector<2x20xf32> to vector<2x5xf32>
    %1248 = math.tanh %1247 : vector<2x5xf32>
    %1249 = vector.extract_strided_slice %1246 {offsets = [0, 0], sizes = [2, 5], strides = [1, 1]} : vector<2x15xf32> to vector<2x5xf32>
    %1250 = vector.extract_strided_slice %1246 {offsets = [0, 5], sizes = [2, 5], strides = [1, 1]} : vector<2x15xf32> to vector<2x5xf32>
    %1251 = vector.extract_strided_slice %1246 {offsets = [0, 10], sizes = [2, 5], strides = [1, 1]} : vector<2x15xf32> to vector<2x5xf32>
    %1252 = arith.mulf %1250, %1187 : vector<2x5xf32>
    %1253 = arith.mulf %1249, %1248 : vector<2x5xf32>
    %1254 = arith.addf %1252, %1253 : vector<2x5xf32>
    %1255 = math.tanh %1254 : vector<2x5xf32>
    %1256 = arith.mulf %1251, %1255 : vector<2x5xf32>
    %1257 = vector.extract_strided_slice %804 {offsets = [0, 0], sizes = [2, 1], strides = [1, 1]} : vector<2x5xf32> to vector<2x1xf32>
    %1258 = vector.broadcast %1257 : vector<2x1xf32> to vector<2x20xf32>
    %1259 = vector.broadcast %1006 : vector<1x20xf32> to vector<2x20xf32>
    %1260 = arith.mulf %1258, %1259 : vector<2x20xf32>
    %1261 = vector.extract_strided_slice %804 {offsets = [0, 1], sizes = [2, 1], strides = [1, 1]} : vector<2x5xf32> to vector<2x1xf32>
    %1262 = vector.broadcast %1261 : vector<2x1xf32> to vector<2x20xf32>
    %1263 = vector.broadcast %1007 : vector<1x20xf32> to vector<2x20xf32>
    %1264 = arith.mulf %1262, %1263 : vector<2x20xf32>
    %1265 = vector.extract_strided_slice %804 {offsets = [0, 2], sizes = [2, 1], strides = [1, 1]} : vector<2x5xf32> to vector<2x1xf32>
    %1266 = vector.broadcast %1265 : vector<2x1xf32> to vector<2x20xf32>
    %1267 = vector.broadcast %1008 : vector<1x20xf32> to vector<2x20xf32>
    %1268 = arith.mulf %1266, %1267 : vector<2x20xf32>
    %1269 = vector.extract_strided_slice %804 {offsets = [0, 3], sizes = [2, 1], strides = [1, 1]} : vector<2x5xf32> to vector<2x1xf32>
    %1270 = vector.broadcast %1269 : vector<2x1xf32> to vector<2x20xf32>
    %1271 = vector.broadcast %1009 : vector<1x20xf32> to vector<2x20xf32>
    %1272 = arith.mulf %1270, %1271 : vector<2x20xf32>
    %1273 = vector.extract_strided_slice %804 {offsets = [0, 4], sizes = [2, 1], strides = [1, 1]} : vector<2x5xf32> to vector<2x1xf32>
    %1274 = vector.broadcast %1273 : vector<2x1xf32> to vector<2x20xf32>
    %1275 = vector.broadcast %1010 : vector<1x20xf32> to vector<2x20xf32>
    %1276 = arith.mulf %1274, %1275 : vector<2x20xf32>
    %1277 = arith.addf %1260, %1264 : vector<2x20xf32>
    %1278 = arith.addf %1268, %1272 : vector<2x20xf32>
    %1279 = arith.addf %1277, %1278 : vector<2x20xf32>
    %1280 = arith.addf %1279, %1276 : vector<2x20xf32>
    %1281 = vector.broadcast %1016 : vector<1x20xf32> to vector<2x20xf32>
    %1282 = arith.addf %1281, %1280 : vector<2x20xf32>
    %1283 = vector.extract_strided_slice %1256 {offsets = [0, 0], sizes = [2, 1], strides = [1, 1]} : vector<2x5xf32> to vector<2x1xf32>
    %1284 = vector.broadcast %1283 : vector<2x1xf32> to vector<2x20xf32>
    %1285 = vector.broadcast %1011 : vector<1x20xf32> to vector<2x20xf32>
    %1286 = arith.mulf %1284, %1285 : vector<2x20xf32>
    %1287 = vector.extract_strided_slice %1256 {offsets = [0, 1], sizes = [2, 1], strides = [1, 1]} : vector<2x5xf32> to vector<2x1xf32>
    %1288 = vector.broadcast %1287 : vector<2x1xf32> to vector<2x20xf32>
    %1289 = vector.broadcast %1012 : vector<1x20xf32> to vector<2x20xf32>
    %1290 = arith.mulf %1288, %1289 : vector<2x20xf32>
    %1291 = vector.extract_strided_slice %1256 {offsets = [0, 2], sizes = [2, 1], strides = [1, 1]} : vector<2x5xf32> to vector<2x1xf32>
    %1292 = vector.broadcast %1291 : vector<2x1xf32> to vector<2x20xf32>
    %1293 = vector.broadcast %1013 : vector<1x20xf32> to vector<2x20xf32>
    %1294 = arith.mulf %1292, %1293 : vector<2x20xf32>
    %1295 = vector.extract_strided_slice %1256 {offsets = [0, 3], sizes = [2, 1], strides = [1, 1]} : vector<2x5xf32> to vector<2x1xf32>
    %1296 = vector.broadcast %1295 : vector<2x1xf32> to vector<2x20xf32>
    %1297 = vector.broadcast %1014 : vector<1x20xf32> to vector<2x20xf32>
    %1298 = arith.mulf %1296, %1297 : vector<2x20xf32>
    %1299 = vector.extract_strided_slice %1256 {offsets = [0, 4], sizes = [2, 1], strides = [1, 1]} : vector<2x5xf32> to vector<2x1xf32>
    %1300 = vector.broadcast %1299 : vector<2x1xf32> to vector<2x20xf32>
    %1301 = vector.broadcast %1015 : vector<1x20xf32> to vector<2x20xf32>
    %1302 = arith.mulf %1300, %1301 : vector<2x20xf32>
    %1303 = arith.addf %1286, %1290 : vector<2x20xf32>
    %1304 = arith.addf %1294, %1298 : vector<2x20xf32>
    %1305 = arith.addf %1303, %1304 : vector<2x20xf32>
    %1306 = arith.addf %1305, %1302 : vector<2x20xf32>
    %1307 = arith.addf %1282, %1306 : vector<2x20xf32>
    %1308 = vector.extract_strided_slice %1307 {offsets = [0, 0], sizes = [2, 15], strides = [1, 1]} : vector<2x20xf32> to vector<2x15xf32>
    %1309 = arith.negf %1308 : vector<2x15xf32>
    %1310 = math.exp %1309 : vector<2x15xf32>
    %cst_53 = arith.constant 1.000000e+00 : f32
    %1311 = vector.broadcast %cst_53 : f32 to vector<2x15xf32>
    %1312 = arith.addf %1311, %1310 : vector<2x15xf32>
    %1313 = arith.divf %1311, %1312 : vector<2x15xf32>
    %1314 = vector.extract_strided_slice %1307 {offsets = [0, 15], sizes = [2, 5], strides = [1, 1]} : vector<2x20xf32> to vector<2x5xf32>
    %1315 = math.tanh %1314 : vector<2x5xf32>
    %1316 = vector.extract_strided_slice %1313 {offsets = [0, 0], sizes = [2, 5], strides = [1, 1]} : vector<2x15xf32> to vector<2x5xf32>
    %1317 = vector.extract_strided_slice %1313 {offsets = [0, 5], sizes = [2, 5], strides = [1, 1]} : vector<2x15xf32> to vector<2x5xf32>
    %1318 = vector.extract_strided_slice %1313 {offsets = [0, 10], sizes = [2, 5], strides = [1, 1]} : vector<2x15xf32> to vector<2x5xf32>
    %1319 = arith.mulf %1317, %1254 : vector<2x5xf32>
    %1320 = arith.mulf %1316, %1315 : vector<2x5xf32>
    %1321 = arith.addf %1319, %1320 : vector<2x5xf32>
    %1322 = math.tanh %1321 : vector<2x5xf32>
    %1323 = arith.mulf %1318, %1322 : vector<2x5xf32>
    %1324 = vector.extract_strided_slice %871 {offsets = [0, 0], sizes = [2, 1], strides = [1, 1]} : vector<2x5xf32> to vector<2x1xf32>
    %1325 = vector.broadcast %1324 : vector<2x1xf32> to vector<2x20xf32>
    %1326 = vector.broadcast %1006 : vector<1x20xf32> to vector<2x20xf32>
    %1327 = arith.mulf %1325, %1326 : vector<2x20xf32>
    %1328 = vector.extract_strided_slice %871 {offsets = [0, 1], sizes = [2, 1], strides = [1, 1]} : vector<2x5xf32> to vector<2x1xf32>
    %1329 = vector.broadcast %1328 : vector<2x1xf32> to vector<2x20xf32>
    %1330 = vector.broadcast %1007 : vector<1x20xf32> to vector<2x20xf32>
    %1331 = arith.mulf %1329, %1330 : vector<2x20xf32>
    %1332 = vector.extract_strided_slice %871 {offsets = [0, 2], sizes = [2, 1], strides = [1, 1]} : vector<2x5xf32> to vector<2x1xf32>
    %1333 = vector.broadcast %1332 : vector<2x1xf32> to vector<2x20xf32>
    %1334 = vector.broadcast %1008 : vector<1x20xf32> to vector<2x20xf32>
    %1335 = arith.mulf %1333, %1334 : vector<2x20xf32>
    %1336 = vector.extract_strided_slice %871 {offsets = [0, 3], sizes = [2, 1], strides = [1, 1]} : vector<2x5xf32> to vector<2x1xf32>
    %1337 = vector.broadcast %1336 : vector<2x1xf32> to vector<2x20xf32>
    %1338 = vector.broadcast %1009 : vector<1x20xf32> to vector<2x20xf32>
    %1339 = arith.mulf %1337, %1338 : vector<2x20xf32>
    %1340 = vector.extract_strided_slice %871 {offsets = [0, 4], sizes = [2, 1], strides = [1, 1]} : vector<2x5xf32> to vector<2x1xf32>
    %1341 = vector.broadcast %1340 : vector<2x1xf32> to vector<2x20xf32>
    %1342 = vector.broadcast %1010 : vector<1x20xf32> to vector<2x20xf32>
    %1343 = arith.mulf %1341, %1342 : vector<2x20xf32>
    %1344 = arith.addf %1327, %1331 : vector<2x20xf32>
    %1345 = arith.addf %1335, %1339 : vector<2x20xf32>
    %1346 = arith.addf %1344, %1345 : vector<2x20xf32>
    %1347 = arith.addf %1346, %1343 : vector<2x20xf32>
    %1348 = vector.broadcast %1016 : vector<1x20xf32> to vector<2x20xf32>
    %1349 = arith.addf %1348, %1347 : vector<2x20xf32>
    %1350 = vector.extract_strided_slice %1323 {offsets = [0, 0], sizes = [2, 1], strides = [1, 1]} : vector<2x5xf32> to vector<2x1xf32>
    %1351 = vector.broadcast %1350 : vector<2x1xf32> to vector<2x20xf32>
    %1352 = vector.broadcast %1011 : vector<1x20xf32> to vector<2x20xf32>
    %1353 = arith.mulf %1351, %1352 : vector<2x20xf32>
    %1354 = vector.extract_strided_slice %1323 {offsets = [0, 1], sizes = [2, 1], strides = [1, 1]} : vector<2x5xf32> to vector<2x1xf32>
    %1355 = vector.broadcast %1354 : vector<2x1xf32> to vector<2x20xf32>
    %1356 = vector.broadcast %1012 : vector<1x20xf32> to vector<2x20xf32>
    %1357 = arith.mulf %1355, %1356 : vector<2x20xf32>
    %1358 = vector.extract_strided_slice %1323 {offsets = [0, 2], sizes = [2, 1], strides = [1, 1]} : vector<2x5xf32> to vector<2x1xf32>
    %1359 = vector.broadcast %1358 : vector<2x1xf32> to vector<2x20xf32>
    %1360 = vector.broadcast %1013 : vector<1x20xf32> to vector<2x20xf32>
    %1361 = arith.mulf %1359, %1360 : vector<2x20xf32>
    %1362 = vector.extract_strided_slice %1323 {offsets = [0, 3], sizes = [2, 1], strides = [1, 1]} : vector<2x5xf32> to vector<2x1xf32>
    %1363 = vector.broadcast %1362 : vector<2x1xf32> to vector<2x20xf32>
    %1364 = vector.broadcast %1014 : vector<1x20xf32> to vector<2x20xf32>
    %1365 = arith.mulf %1363, %1364 : vector<2x20xf32>
    %1366 = vector.extract_strided_slice %1323 {offsets = [0, 4], sizes = [2, 1], strides = [1, 1]} : vector<2x5xf32> to vector<2x1xf32>
    %1367 = vector.broadcast %1366 : vector<2x1xf32> to vector<2x20xf32>
    %1368 = vector.broadcast %1015 : vector<1x20xf32> to vector<2x20xf32>
    %1369 = arith.mulf %1367, %1368 : vector<2x20xf32>
    %1370 = arith.addf %1353, %1357 : vector<2x20xf32>
    %1371 = arith.addf %1361, %1365 : vector<2x20xf32>
    %1372 = arith.addf %1370, %1371 : vector<2x20xf32>
    %1373 = arith.addf %1372, %1369 : vector<2x20xf32>
    %1374 = arith.addf %1349, %1373 : vector<2x20xf32>
    %1375 = vector.extract_strided_slice %1374 {offsets = [0, 0], sizes = [2, 15], strides = [1, 1]} : vector<2x20xf32> to vector<2x15xf32>
    %1376 = arith.negf %1375 : vector<2x15xf32>
    %1377 = math.exp %1376 : vector<2x15xf32>
    %cst_54 = arith.constant 1.000000e+00 : f32
    %1378 = vector.broadcast %cst_54 : f32 to vector<2x15xf32>
    %1379 = arith.addf %1378, %1377 : vector<2x15xf32>
    %1380 = arith.divf %1378, %1379 : vector<2x15xf32>
    %1381 = vector.extract_strided_slice %1374 {offsets = [0, 15], sizes = [2, 5], strides = [1, 1]} : vector<2x20xf32> to vector<2x5xf32>
    %1382 = math.tanh %1381 : vector<2x5xf32>
    %1383 = vector.extract_strided_slice %1380 {offsets = [0, 0], sizes = [2, 5], strides = [1, 1]} : vector<2x15xf32> to vector<2x5xf32>
    %1384 = vector.extract_strided_slice %1380 {offsets = [0, 5], sizes = [2, 5], strides = [1, 1]} : vector<2x15xf32> to vector<2x5xf32>
    %1385 = vector.extract_strided_slice %1380 {offsets = [0, 10], sizes = [2, 5], strides = [1, 1]} : vector<2x15xf32> to vector<2x5xf32>
    %1386 = arith.mulf %1384, %1321 : vector<2x5xf32>
    %1387 = arith.mulf %1383, %1382 : vector<2x5xf32>
    %1388 = arith.addf %1386, %1387 : vector<2x5xf32>
    %1389 = math.tanh %1388 : vector<2x5xf32>
    %1390 = arith.mulf %1385, %1389 : vector<2x5xf32>
    %1391 = vector.extract_strided_slice %938 {offsets = [0, 0], sizes = [2, 1], strides = [1, 1]} : vector<2x5xf32> to vector<2x1xf32>
    %1392 = vector.broadcast %1391 : vector<2x1xf32> to vector<2x20xf32>
    %1393 = vector.broadcast %1006 : vector<1x20xf32> to vector<2x20xf32>
    %1394 = arith.mulf %1392, %1393 : vector<2x20xf32>
    %1395 = vector.extract_strided_slice %938 {offsets = [0, 1], sizes = [2, 1], strides = [1, 1]} : vector<2x5xf32> to vector<2x1xf32>
    %1396 = vector.broadcast %1395 : vector<2x1xf32> to vector<2x20xf32>
    %1397 = vector.broadcast %1007 : vector<1x20xf32> to vector<2x20xf32>
    %1398 = arith.mulf %1396, %1397 : vector<2x20xf32>
    %1399 = vector.extract_strided_slice %938 {offsets = [0, 2], sizes = [2, 1], strides = [1, 1]} : vector<2x5xf32> to vector<2x1xf32>
    %1400 = vector.broadcast %1399 : vector<2x1xf32> to vector<2x20xf32>
    %1401 = vector.broadcast %1008 : vector<1x20xf32> to vector<2x20xf32>
    %1402 = arith.mulf %1400, %1401 : vector<2x20xf32>
    %1403 = vector.extract_strided_slice %938 {offsets = [0, 3], sizes = [2, 1], strides = [1, 1]} : vector<2x5xf32> to vector<2x1xf32>
    %1404 = vector.broadcast %1403 : vector<2x1xf32> to vector<2x20xf32>
    %1405 = vector.broadcast %1009 : vector<1x20xf32> to vector<2x20xf32>
    %1406 = arith.mulf %1404, %1405 : vector<2x20xf32>
    %1407 = vector.extract_strided_slice %938 {offsets = [0, 4], sizes = [2, 1], strides = [1, 1]} : vector<2x5xf32> to vector<2x1xf32>
    %1408 = vector.broadcast %1407 : vector<2x1xf32> to vector<2x20xf32>
    %1409 = vector.broadcast %1010 : vector<1x20xf32> to vector<2x20xf32>
    %1410 = arith.mulf %1408, %1409 : vector<2x20xf32>
    %1411 = arith.addf %1394, %1398 : vector<2x20xf32>
    %1412 = arith.addf %1402, %1406 : vector<2x20xf32>
    %1413 = arith.addf %1411, %1412 : vector<2x20xf32>
    %1414 = arith.addf %1413, %1410 : vector<2x20xf32>
    %1415 = vector.broadcast %1016 : vector<1x20xf32> to vector<2x20xf32>
    %1416 = arith.addf %1415, %1414 : vector<2x20xf32>
    %1417 = vector.extract_strided_slice %1390 {offsets = [0, 0], sizes = [2, 1], strides = [1, 1]} : vector<2x5xf32> to vector<2x1xf32>
    %1418 = vector.broadcast %1417 : vector<2x1xf32> to vector<2x20xf32>
    %1419 = vector.broadcast %1011 : vector<1x20xf32> to vector<2x20xf32>
    %1420 = arith.mulf %1418, %1419 : vector<2x20xf32>
    %1421 = vector.extract_strided_slice %1390 {offsets = [0, 1], sizes = [2, 1], strides = [1, 1]} : vector<2x5xf32> to vector<2x1xf32>
    %1422 = vector.broadcast %1421 : vector<2x1xf32> to vector<2x20xf32>
    %1423 = vector.broadcast %1012 : vector<1x20xf32> to vector<2x20xf32>
    %1424 = arith.mulf %1422, %1423 : vector<2x20xf32>
    %1425 = vector.extract_strided_slice %1390 {offsets = [0, 2], sizes = [2, 1], strides = [1, 1]} : vector<2x5xf32> to vector<2x1xf32>
    %1426 = vector.broadcast %1425 : vector<2x1xf32> to vector<2x20xf32>
    %1427 = vector.broadcast %1013 : vector<1x20xf32> to vector<2x20xf32>
    %1428 = arith.mulf %1426, %1427 : vector<2x20xf32>
    %1429 = vector.extract_strided_slice %1390 {offsets = [0, 3], sizes = [2, 1], strides = [1, 1]} : vector<2x5xf32> to vector<2x1xf32>
    %1430 = vector.broadcast %1429 : vector<2x1xf32> to vector<2x20xf32>
    %1431 = vector.broadcast %1014 : vector<1x20xf32> to vector<2x20xf32>
    %1432 = arith.mulf %1430, %1431 : vector<2x20xf32>
    %1433 = vector.extract_strided_slice %1390 {offsets = [0, 4], sizes = [2, 1], strides = [1, 1]} : vector<2x5xf32> to vector<2x1xf32>
    %1434 = vector.broadcast %1433 : vector<2x1xf32> to vector<2x20xf32>
    %1435 = vector.broadcast %1015 : vector<1x20xf32> to vector<2x20xf32>
    %1436 = arith.mulf %1434, %1435 : vector<2x20xf32>
    %1437 = arith.addf %1420, %1424 : vector<2x20xf32>
    %1438 = arith.addf %1428, %1432 : vector<2x20xf32>
    %1439 = arith.addf %1437, %1438 : vector<2x20xf32>
    %1440 = arith.addf %1439, %1436 : vector<2x20xf32>
    %1441 = arith.addf %1416, %1440 : vector<2x20xf32>
    %1442 = vector.extract_strided_slice %1441 {offsets = [0, 0], sizes = [2, 15], strides = [1, 1]} : vector<2x20xf32> to vector<2x15xf32>
    %1443 = arith.negf %1442 : vector<2x15xf32>
    %1444 = math.exp %1443 : vector<2x15xf32>
    %cst_55 = arith.constant 1.000000e+00 : f32
    %1445 = vector.broadcast %cst_55 : f32 to vector<2x15xf32>
    %1446 = arith.addf %1445, %1444 : vector<2x15xf32>
    %1447 = arith.divf %1445, %1446 : vector<2x15xf32>
    %1448 = vector.extract_strided_slice %1441 {offsets = [0, 15], sizes = [2, 5], strides = [1, 1]} : vector<2x20xf32> to vector<2x5xf32>
    %1449 = math.tanh %1448 : vector<2x5xf32>
    %1450 = vector.extract_strided_slice %1447 {offsets = [0, 0], sizes = [2, 5], strides = [1, 1]} : vector<2x15xf32> to vector<2x5xf32>
    %1451 = vector.extract_strided_slice %1447 {offsets = [0, 5], sizes = [2, 5], strides = [1, 1]} : vector<2x15xf32> to vector<2x5xf32>
    %1452 = vector.extract_strided_slice %1447 {offsets = [0, 10], sizes = [2, 5], strides = [1, 1]} : vector<2x15xf32> to vector<2x5xf32>
    %1453 = arith.mulf %1451, %1388 : vector<2x5xf32>
    %1454 = arith.mulf %1450, %1449 : vector<2x5xf32>
    %1455 = arith.addf %1453, %1454 : vector<2x5xf32>
    %1456 = math.tanh %1455 : vector<2x5xf32>
    %1457 = arith.mulf %1452, %1456 : vector<2x5xf32>
    %1458 = vector.extract_strided_slice %1005 {offsets = [0, 0], sizes = [2, 1], strides = [1, 1]} : vector<2x5xf32> to vector<2x1xf32>
    %1459 = vector.broadcast %1458 : vector<2x1xf32> to vector<2x20xf32>
    %1460 = vector.broadcast %1006 : vector<1x20xf32> to vector<2x20xf32>
    %1461 = arith.mulf %1459, %1460 : vector<2x20xf32>
    %1462 = vector.extract_strided_slice %1005 {offsets = [0, 1], sizes = [2, 1], strides = [1, 1]} : vector<2x5xf32> to vector<2x1xf32>
    %1463 = vector.broadcast %1462 : vector<2x1xf32> to vector<2x20xf32>
    %1464 = vector.broadcast %1007 : vector<1x20xf32> to vector<2x20xf32>
    %1465 = arith.mulf %1463, %1464 : vector<2x20xf32>
    %1466 = vector.extract_strided_slice %1005 {offsets = [0, 2], sizes = [2, 1], strides = [1, 1]} : vector<2x5xf32> to vector<2x1xf32>
    %1467 = vector.broadcast %1466 : vector<2x1xf32> to vector<2x20xf32>
    %1468 = vector.broadcast %1008 : vector<1x20xf32> to vector<2x20xf32>
    %1469 = arith.mulf %1467, %1468 : vector<2x20xf32>
    %1470 = vector.extract_strided_slice %1005 {offsets = [0, 3], sizes = [2, 1], strides = [1, 1]} : vector<2x5xf32> to vector<2x1xf32>
    %1471 = vector.broadcast %1470 : vector<2x1xf32> to vector<2x20xf32>
    %1472 = vector.broadcast %1009 : vector<1x20xf32> to vector<2x20xf32>
    %1473 = arith.mulf %1471, %1472 : vector<2x20xf32>
    %1474 = vector.extract_strided_slice %1005 {offsets = [0, 4], sizes = [2, 1], strides = [1, 1]} : vector<2x5xf32> to vector<2x1xf32>
    %1475 = vector.broadcast %1474 : vector<2x1xf32> to vector<2x20xf32>
    %1476 = vector.broadcast %1010 : vector<1x20xf32> to vector<2x20xf32>
    %1477 = arith.mulf %1475, %1476 : vector<2x20xf32>
    %1478 = arith.addf %1461, %1465 : vector<2x20xf32>
    %1479 = arith.addf %1469, %1473 : vector<2x20xf32>
    %1480 = arith.addf %1478, %1479 : vector<2x20xf32>
    %1481 = arith.addf %1480, %1477 : vector<2x20xf32>
    %1482 = vector.broadcast %1016 : vector<1x20xf32> to vector<2x20xf32>
    %1483 = arith.addf %1482, %1481 : vector<2x20xf32>
    %1484 = vector.extract_strided_slice %1457 {offsets = [0, 0], sizes = [2, 1], strides = [1, 1]} : vector<2x5xf32> to vector<2x1xf32>
    %1485 = vector.broadcast %1484 : vector<2x1xf32> to vector<2x20xf32>
    %1486 = vector.broadcast %1011 : vector<1x20xf32> to vector<2x20xf32>
    %1487 = arith.mulf %1485, %1486 : vector<2x20xf32>
    %1488 = vector.extract_strided_slice %1457 {offsets = [0, 1], sizes = [2, 1], strides = [1, 1]} : vector<2x5xf32> to vector<2x1xf32>
    %1489 = vector.broadcast %1488 : vector<2x1xf32> to vector<2x20xf32>
    %1490 = vector.broadcast %1012 : vector<1x20xf32> to vector<2x20xf32>
    %1491 = arith.mulf %1489, %1490 : vector<2x20xf32>
    %1492 = vector.extract_strided_slice %1457 {offsets = [0, 2], sizes = [2, 1], strides = [1, 1]} : vector<2x5xf32> to vector<2x1xf32>
    %1493 = vector.broadcast %1492 : vector<2x1xf32> to vector<2x20xf32>
    %1494 = vector.broadcast %1013 : vector<1x20xf32> to vector<2x20xf32>
    %1495 = arith.mulf %1493, %1494 : vector<2x20xf32>
    %1496 = vector.extract_strided_slice %1457 {offsets = [0, 3], sizes = [2, 1], strides = [1, 1]} : vector<2x5xf32> to vector<2x1xf32>
    %1497 = vector.broadcast %1496 : vector<2x1xf32> to vector<2x20xf32>
    %1498 = vector.broadcast %1014 : vector<1x20xf32> to vector<2x20xf32>
    %1499 = arith.mulf %1497, %1498 : vector<2x20xf32>
    %1500 = vector.extract_strided_slice %1457 {offsets = [0, 4], sizes = [2, 1], strides = [1, 1]} : vector<2x5xf32> to vector<2x1xf32>
    %1501 = vector.broadcast %1500 : vector<2x1xf32> to vector<2x20xf32>
    %1502 = vector.broadcast %1015 : vector<1x20xf32> to vector<2x20xf32>
    %1503 = arith.mulf %1501, %1502 : vector<2x20xf32>
    %1504 = arith.addf %1487, %1491 : vector<2x20xf32>
    %1505 = arith.addf %1495, %1499 : vector<2x20xf32>
    %1506 = arith.addf %1504, %1505 : vector<2x20xf32>
    %1507 = arith.addf %1506, %1503 : vector<2x20xf32>
    %1508 = arith.addf %1483, %1507 : vector<2x20xf32>
    %1509 = vector.extract_strided_slice %1508 {offsets = [0, 0], sizes = [2, 15], strides = [1, 1]} : vector<2x20xf32> to vector<2x15xf32>
    %1510 = arith.negf %1509 : vector<2x15xf32>
    %1511 = math.exp %1510 : vector<2x15xf32>
    %cst_56 = arith.constant 1.000000e+00 : f32
    %1512 = vector.broadcast %cst_56 : f32 to vector<2x15xf32>
    %1513 = arith.addf %1512, %1511 : vector<2x15xf32>
    %1514 = arith.divf %1512, %1513 : vector<2x15xf32>
    %1515 = vector.extract_strided_slice %1508 {offsets = [0, 15], sizes = [2, 5], strides = [1, 1]} : vector<2x20xf32> to vector<2x5xf32>
    %1516 = math.tanh %1515 : vector<2x5xf32>
    %1517 = vector.extract_strided_slice %1514 {offsets = [0, 0], sizes = [2, 5], strides = [1, 1]} : vector<2x15xf32> to vector<2x5xf32>
    %1518 = vector.extract_strided_slice %1514 {offsets = [0, 5], sizes = [2, 5], strides = [1, 1]} : vector<2x15xf32> to vector<2x5xf32>
    %1519 = vector.extract_strided_slice %1514 {offsets = [0, 10], sizes = [2, 5], strides = [1, 1]} : vector<2x15xf32> to vector<2x5xf32>
    %1520 = arith.mulf %1518, %1455 : vector<2x5xf32>
    %1521 = arith.mulf %1517, %1516 : vector<2x5xf32>
    %1522 = arith.addf %1520, %1521 : vector<2x5xf32>
    %1523 = math.tanh %1522 : vector<2x5xf32>
    %1524 = arith.mulf %1519, %1523 : vector<2x5xf32>
    %c14 = arith.constant 14 : index
    %c0_57 = arith.constant 0 : index
    %1525 = vector.load %arg1[%c14, %c0_57] : memref<44x20xf32, #tpu.memory_space<vmem>>, vector<1x20xf32>
    %c15 = arith.constant 15 : index
    %c0_58 = arith.constant 0 : index
    %1526 = vector.load %arg1[%c15, %c0_58] : memref<44x20xf32, #tpu.memory_space<vmem>>, vector<1x20xf32>
    %c16 = arith.constant 16 : index
    %c0_59 = arith.constant 0 : index
    %1527 = vector.load %arg1[%c16, %c0_59] : memref<44x20xf32, #tpu.memory_space<vmem>>, vector<1x20xf32>
    %c17 = arith.constant 17 : index
    %c0_60 = arith.constant 0 : index
    %1528 = vector.load %arg1[%c17, %c0_60] : memref<44x20xf32, #tpu.memory_space<vmem>>, vector<1x20xf32>
    %c18 = arith.constant 18 : index
    %c0_61 = arith.constant 0 : index
    %1529 = vector.load %arg1[%c18, %c0_61] : memref<44x20xf32, #tpu.memory_space<vmem>>, vector<1x20xf32>
    %c34 = arith.constant 34 : index
    %c0_62 = arith.constant 0 : index
    %1530 = vector.load %arg1[%c34, %c0_62] : memref<44x20xf32, #tpu.memory_space<vmem>>, vector<1x20xf32>
    %c35 = arith.constant 35 : index
    %c0_63 = arith.constant 0 : index
    %1531 = vector.load %arg1[%c35, %c0_63] : memref<44x20xf32, #tpu.memory_space<vmem>>, vector<1x20xf32>
    %c36 = arith.constant 36 : index
    %c0_64 = arith.constant 0 : index
    %1532 = vector.load %arg1[%c36, %c0_64] : memref<44x20xf32, #tpu.memory_space<vmem>>, vector<1x20xf32>
    %c37 = arith.constant 37 : index
    %c0_65 = arith.constant 0 : index
    %1533 = vector.load %arg1[%c37, %c0_65] : memref<44x20xf32, #tpu.memory_space<vmem>>, vector<1x20xf32>
    %c38 = arith.constant 38 : index
    %c0_66 = arith.constant 0 : index
    %1534 = vector.load %arg1[%c38, %c0_66] : memref<44x20xf32, #tpu.memory_space<vmem>>, vector<1x20xf32>
    %c42 = arith.constant 42 : index
    %c0_67 = arith.constant 0 : index
    %1535 = vector.load %arg1[%c42, %c0_67] : memref<44x20xf32, #tpu.memory_space<vmem>>, vector<1x20xf32>
    %1536 = vector.extract_strided_slice %1055 {offsets = [0, 0], sizes = [2, 1], strides = [1, 1]} : vector<2x5xf32> to vector<2x1xf32>
    %1537 = vector.broadcast %1536 : vector<2x1xf32> to vector<2x20xf32>
    %1538 = vector.broadcast %1525 : vector<1x20xf32> to vector<2x20xf32>
    %1539 = arith.mulf %1537, %1538 : vector<2x20xf32>
    %1540 = vector.extract_strided_slice %1055 {offsets = [0, 1], sizes = [2, 1], strides = [1, 1]} : vector<2x5xf32> to vector<2x1xf32>
    %1541 = vector.broadcast %1540 : vector<2x1xf32> to vector<2x20xf32>
    %1542 = vector.broadcast %1526 : vector<1x20xf32> to vector<2x20xf32>
    %1543 = arith.mulf %1541, %1542 : vector<2x20xf32>
    %1544 = vector.extract_strided_slice %1055 {offsets = [0, 2], sizes = [2, 1], strides = [1, 1]} : vector<2x5xf32> to vector<2x1xf32>
    %1545 = vector.broadcast %1544 : vector<2x1xf32> to vector<2x20xf32>
    %1546 = vector.broadcast %1527 : vector<1x20xf32> to vector<2x20xf32>
    %1547 = arith.mulf %1545, %1546 : vector<2x20xf32>
    %1548 = vector.extract_strided_slice %1055 {offsets = [0, 3], sizes = [2, 1], strides = [1, 1]} : vector<2x5xf32> to vector<2x1xf32>
    %1549 = vector.broadcast %1548 : vector<2x1xf32> to vector<2x20xf32>
    %1550 = vector.broadcast %1528 : vector<1x20xf32> to vector<2x20xf32>
    %1551 = arith.mulf %1549, %1550 : vector<2x20xf32>
    %1552 = vector.extract_strided_slice %1055 {offsets = [0, 4], sizes = [2, 1], strides = [1, 1]} : vector<2x5xf32> to vector<2x1xf32>
    %1553 = vector.broadcast %1552 : vector<2x1xf32> to vector<2x20xf32>
    %1554 = vector.broadcast %1529 : vector<1x20xf32> to vector<2x20xf32>
    %1555 = arith.mulf %1553, %1554 : vector<2x20xf32>
    %1556 = arith.addf %1539, %1543 : vector<2x20xf32>
    %1557 = arith.addf %1547, %1551 : vector<2x20xf32>
    %1558 = arith.addf %1556, %1557 : vector<2x20xf32>
    %1559 = arith.addf %1558, %1555 : vector<2x20xf32>
    %1560 = vector.broadcast %1535 : vector<1x20xf32> to vector<2x20xf32>
    %1561 = arith.addf %1560, %1559 : vector<2x20xf32>
    %1562 = vector.extract_strided_slice %1561 {offsets = [0, 0], sizes = [2, 15], strides = [1, 1]} : vector<2x20xf32> to vector<2x15xf32>
    %1563 = arith.negf %1562 : vector<2x15xf32>
    %1564 = math.exp %1563 : vector<2x15xf32>
    %cst_68 = arith.constant 1.000000e+00 : f32
    %1565 = vector.broadcast %cst_68 : f32 to vector<2x15xf32>
    %1566 = arith.addf %1565, %1564 : vector<2x15xf32>
    %1567 = arith.divf %1565, %1566 : vector<2x15xf32>
    %1568 = vector.extract_strided_slice %1561 {offsets = [0, 15], sizes = [2, 5], strides = [1, 1]} : vector<2x20xf32> to vector<2x5xf32>
    %1569 = math.tanh %1568 : vector<2x5xf32>
    %1570 = vector.extract_strided_slice %1567 {offsets = [0, 0], sizes = [2, 5], strides = [1, 1]} : vector<2x15xf32> to vector<2x5xf32>
    %1571 = vector.extract_strided_slice %1567 {offsets = [0, 10], sizes = [2, 5], strides = [1, 1]} : vector<2x15xf32> to vector<2x5xf32>
    %1572 = arith.mulf %1570, %1569 : vector<2x5xf32>
    %1573 = math.tanh %1572 : vector<2x5xf32>
    %1574 = arith.mulf %1571, %1573 : vector<2x5xf32>
    %1575 = vector.extract_strided_slice %1122 {offsets = [0, 0], sizes = [2, 1], strides = [1, 1]} : vector<2x5xf32> to vector<2x1xf32>
    %1576 = vector.broadcast %1575 : vector<2x1xf32> to vector<2x20xf32>
    %1577 = vector.broadcast %1525 : vector<1x20xf32> to vector<2x20xf32>
    %1578 = arith.mulf %1576, %1577 : vector<2x20xf32>
    %1579 = vector.extract_strided_slice %1122 {offsets = [0, 1], sizes = [2, 1], strides = [1, 1]} : vector<2x5xf32> to vector<2x1xf32>
    %1580 = vector.broadcast %1579 : vector<2x1xf32> to vector<2x20xf32>
    %1581 = vector.broadcast %1526 : vector<1x20xf32> to vector<2x20xf32>
    %1582 = arith.mulf %1580, %1581 : vector<2x20xf32>
    %1583 = vector.extract_strided_slice %1122 {offsets = [0, 2], sizes = [2, 1], strides = [1, 1]} : vector<2x5xf32> to vector<2x1xf32>
    %1584 = vector.broadcast %1583 : vector<2x1xf32> to vector<2x20xf32>
    %1585 = vector.broadcast %1527 : vector<1x20xf32> to vector<2x20xf32>
    %1586 = arith.mulf %1584, %1585 : vector<2x20xf32>
    %1587 = vector.extract_strided_slice %1122 {offsets = [0, 3], sizes = [2, 1], strides = [1, 1]} : vector<2x5xf32> to vector<2x1xf32>
    %1588 = vector.broadcast %1587 : vector<2x1xf32> to vector<2x20xf32>
    %1589 = vector.broadcast %1528 : vector<1x20xf32> to vector<2x20xf32>
    %1590 = arith.mulf %1588, %1589 : vector<2x20xf32>
    %1591 = vector.extract_strided_slice %1122 {offsets = [0, 4], sizes = [2, 1], strides = [1, 1]} : vector<2x5xf32> to vector<2x1xf32>
    %1592 = vector.broadcast %1591 : vector<2x1xf32> to vector<2x20xf32>
    %1593 = vector.broadcast %1529 : vector<1x20xf32> to vector<2x20xf32>
    %1594 = arith.mulf %1592, %1593 : vector<2x20xf32>
    %1595 = arith.addf %1578, %1582 : vector<2x20xf32>
    %1596 = arith.addf %1586, %1590 : vector<2x20xf32>
    %1597 = arith.addf %1595, %1596 : vector<2x20xf32>
    %1598 = arith.addf %1597, %1594 : vector<2x20xf32>
    %1599 = vector.broadcast %1535 : vector<1x20xf32> to vector<2x20xf32>
    %1600 = arith.addf %1599, %1598 : vector<2x20xf32>
    %1601 = vector.extract_strided_slice %1574 {offsets = [0, 0], sizes = [2, 1], strides = [1, 1]} : vector<2x5xf32> to vector<2x1xf32>
    %1602 = vector.broadcast %1601 : vector<2x1xf32> to vector<2x20xf32>
    %1603 = vector.broadcast %1530 : vector<1x20xf32> to vector<2x20xf32>
    %1604 = arith.mulf %1602, %1603 : vector<2x20xf32>
    %1605 = vector.extract_strided_slice %1574 {offsets = [0, 1], sizes = [2, 1], strides = [1, 1]} : vector<2x5xf32> to vector<2x1xf32>
    %1606 = vector.broadcast %1605 : vector<2x1xf32> to vector<2x20xf32>
    %1607 = vector.broadcast %1531 : vector<1x20xf32> to vector<2x20xf32>
    %1608 = arith.mulf %1606, %1607 : vector<2x20xf32>
    %1609 = vector.extract_strided_slice %1574 {offsets = [0, 2], sizes = [2, 1], strides = [1, 1]} : vector<2x5xf32> to vector<2x1xf32>
    %1610 = vector.broadcast %1609 : vector<2x1xf32> to vector<2x20xf32>
    %1611 = vector.broadcast %1532 : vector<1x20xf32> to vector<2x20xf32>
    %1612 = arith.mulf %1610, %1611 : vector<2x20xf32>
    %1613 = vector.extract_strided_slice %1574 {offsets = [0, 3], sizes = [2, 1], strides = [1, 1]} : vector<2x5xf32> to vector<2x1xf32>
    %1614 = vector.broadcast %1613 : vector<2x1xf32> to vector<2x20xf32>
    %1615 = vector.broadcast %1533 : vector<1x20xf32> to vector<2x20xf32>
    %1616 = arith.mulf %1614, %1615 : vector<2x20xf32>
    %1617 = vector.extract_strided_slice %1574 {offsets = [0, 4], sizes = [2, 1], strides = [1, 1]} : vector<2x5xf32> to vector<2x1xf32>
    %1618 = vector.broadcast %1617 : vector<2x1xf32> to vector<2x20xf32>
    %1619 = vector.broadcast %1534 : vector<1x20xf32> to vector<2x20xf32>
    %1620 = arith.mulf %1618, %1619 : vector<2x20xf32>
    %1621 = arith.addf %1604, %1608 : vector<2x20xf32>
    %1622 = arith.addf %1612, %1616 : vector<2x20xf32>
    %1623 = arith.addf %1621, %1622 : vector<2x20xf32>
    %1624 = arith.addf %1623, %1620 : vector<2x20xf32>
    %1625 = arith.addf %1600, %1624 : vector<2x20xf32>
    %1626 = vector.extract_strided_slice %1625 {offsets = [0, 0], sizes = [2, 15], strides = [1, 1]} : vector<2x20xf32> to vector<2x15xf32>
    %1627 = arith.negf %1626 : vector<2x15xf32>
    %1628 = math.exp %1627 : vector<2x15xf32>
    %cst_69 = arith.constant 1.000000e+00 : f32
    %1629 = vector.broadcast %cst_69 : f32 to vector<2x15xf32>
    %1630 = arith.addf %1629, %1628 : vector<2x15xf32>
    %1631 = arith.divf %1629, %1630 : vector<2x15xf32>
    %1632 = vector.extract_strided_slice %1625 {offsets = [0, 15], sizes = [2, 5], strides = [1, 1]} : vector<2x20xf32> to vector<2x5xf32>
    %1633 = math.tanh %1632 : vector<2x5xf32>
    %1634 = vector.extract_strided_slice %1631 {offsets = [0, 0], sizes = [2, 5], strides = [1, 1]} : vector<2x15xf32> to vector<2x5xf32>
    %1635 = vector.extract_strided_slice %1631 {offsets = [0, 5], sizes = [2, 5], strides = [1, 1]} : vector<2x15xf32> to vector<2x5xf32>
    %1636 = vector.extract_strided_slice %1631 {offsets = [0, 10], sizes = [2, 5], strides = [1, 1]} : vector<2x15xf32> to vector<2x5xf32>
    %1637 = arith.mulf %1635, %1572 : vector<2x5xf32>
    %1638 = arith.mulf %1634, %1633 : vector<2x5xf32>
    %1639 = arith.addf %1637, %1638 : vector<2x5xf32>
    %1640 = math.tanh %1639 : vector<2x5xf32>
    %1641 = arith.mulf %1636, %1640 : vector<2x5xf32>
    %1642 = vector.extract_strided_slice %1189 {offsets = [0, 0], sizes = [2, 1], strides = [1, 1]} : vector<2x5xf32> to vector<2x1xf32>
    %1643 = vector.broadcast %1642 : vector<2x1xf32> to vector<2x20xf32>
    %1644 = vector.broadcast %1525 : vector<1x20xf32> to vector<2x20xf32>
    %1645 = arith.mulf %1643, %1644 : vector<2x20xf32>
    %1646 = vector.extract_strided_slice %1189 {offsets = [0, 1], sizes = [2, 1], strides = [1, 1]} : vector<2x5xf32> to vector<2x1xf32>
    %1647 = vector.broadcast %1646 : vector<2x1xf32> to vector<2x20xf32>
    %1648 = vector.broadcast %1526 : vector<1x20xf32> to vector<2x20xf32>
    %1649 = arith.mulf %1647, %1648 : vector<2x20xf32>
    %1650 = vector.extract_strided_slice %1189 {offsets = [0, 2], sizes = [2, 1], strides = [1, 1]} : vector<2x5xf32> to vector<2x1xf32>
    %1651 = vector.broadcast %1650 : vector<2x1xf32> to vector<2x20xf32>
    %1652 = vector.broadcast %1527 : vector<1x20xf32> to vector<2x20xf32>
    %1653 = arith.mulf %1651, %1652 : vector<2x20xf32>
    %1654 = vector.extract_strided_slice %1189 {offsets = [0, 3], sizes = [2, 1], strides = [1, 1]} : vector<2x5xf32> to vector<2x1xf32>
    %1655 = vector.broadcast %1654 : vector<2x1xf32> to vector<2x20xf32>
    %1656 = vector.broadcast %1528 : vector<1x20xf32> to vector<2x20xf32>
    %1657 = arith.mulf %1655, %1656 : vector<2x20xf32>
    %1658 = vector.extract_strided_slice %1189 {offsets = [0, 4], sizes = [2, 1], strides = [1, 1]} : vector<2x5xf32> to vector<2x1xf32>
    %1659 = vector.broadcast %1658 : vector<2x1xf32> to vector<2x20xf32>
    %1660 = vector.broadcast %1529 : vector<1x20xf32> to vector<2x20xf32>
    %1661 = arith.mulf %1659, %1660 : vector<2x20xf32>
    %1662 = arith.addf %1645, %1649 : vector<2x20xf32>
    %1663 = arith.addf %1653, %1657 : vector<2x20xf32>
    %1664 = arith.addf %1662, %1663 : vector<2x20xf32>
    %1665 = arith.addf %1664, %1661 : vector<2x20xf32>
    %1666 = vector.broadcast %1535 : vector<1x20xf32> to vector<2x20xf32>
    %1667 = arith.addf %1666, %1665 : vector<2x20xf32>
    %1668 = vector.extract_strided_slice %1641 {offsets = [0, 0], sizes = [2, 1], strides = [1, 1]} : vector<2x5xf32> to vector<2x1xf32>
    %1669 = vector.broadcast %1668 : vector<2x1xf32> to vector<2x20xf32>
    %1670 = vector.broadcast %1530 : vector<1x20xf32> to vector<2x20xf32>
    %1671 = arith.mulf %1669, %1670 : vector<2x20xf32>
    %1672 = vector.extract_strided_slice %1641 {offsets = [0, 1], sizes = [2, 1], strides = [1, 1]} : vector<2x5xf32> to vector<2x1xf32>
    %1673 = vector.broadcast %1672 : vector<2x1xf32> to vector<2x20xf32>
    %1674 = vector.broadcast %1531 : vector<1x20xf32> to vector<2x20xf32>
    %1675 = arith.mulf %1673, %1674 : vector<2x20xf32>
    %1676 = vector.extract_strided_slice %1641 {offsets = [0, 2], sizes = [2, 1], strides = [1, 1]} : vector<2x5xf32> to vector<2x1xf32>
    %1677 = vector.broadcast %1676 : vector<2x1xf32> to vector<2x20xf32>
    %1678 = vector.broadcast %1532 : vector<1x20xf32> to vector<2x20xf32>
    %1679 = arith.mulf %1677, %1678 : vector<2x20xf32>
    %1680 = vector.extract_strided_slice %1641 {offsets = [0, 3], sizes = [2, 1], strides = [1, 1]} : vector<2x5xf32> to vector<2x1xf32>
    %1681 = vector.broadcast %1680 : vector<2x1xf32> to vector<2x20xf32>
    %1682 = vector.broadcast %1533 : vector<1x20xf32> to vector<2x20xf32>
    %1683 = arith.mulf %1681, %1682 : vector<2x20xf32>
    %1684 = vector.extract_strided_slice %1641 {offsets = [0, 4], sizes = [2, 1], strides = [1, 1]} : vector<2x5xf32> to vector<2x1xf32>
    %1685 = vector.broadcast %1684 : vector<2x1xf32> to vector<2x20xf32>
    %1686 = vector.broadcast %1534 : vector<1x20xf32> to vector<2x20xf32>
    %1687 = arith.mulf %1685, %1686 : vector<2x20xf32>
    %1688 = arith.addf %1671, %1675 : vector<2x20xf32>
    %1689 = arith.addf %1679, %1683 : vector<2x20xf32>
    %1690 = arith.addf %1688, %1689 : vector<2x20xf32>
    %1691 = arith.addf %1690, %1687 : vector<2x20xf32>
    %1692 = arith.addf %1667, %1691 : vector<2x20xf32>
    %1693 = vector.extract_strided_slice %1692 {offsets = [0, 0], sizes = [2, 15], strides = [1, 1]} : vector<2x20xf32> to vector<2x15xf32>
    %1694 = arith.negf %1693 : vector<2x15xf32>
    %1695 = math.exp %1694 : vector<2x15xf32>
    %cst_70 = arith.constant 1.000000e+00 : f32
    %1696 = vector.broadcast %cst_70 : f32 to vector<2x15xf32>
    %1697 = arith.addf %1696, %1695 : vector<2x15xf32>
    %1698 = arith.divf %1696, %1697 : vector<2x15xf32>
    %1699 = vector.extract_strided_slice %1692 {offsets = [0, 15], sizes = [2, 5], strides = [1, 1]} : vector<2x20xf32> to vector<2x5xf32>
    %1700 = math.tanh %1699 : vector<2x5xf32>
    %1701 = vector.extract_strided_slice %1698 {offsets = [0, 0], sizes = [2, 5], strides = [1, 1]} : vector<2x15xf32> to vector<2x5xf32>
    %1702 = vector.extract_strided_slice %1698 {offsets = [0, 5], sizes = [2, 5], strides = [1, 1]} : vector<2x15xf32> to vector<2x5xf32>
    %1703 = vector.extract_strided_slice %1698 {offsets = [0, 10], sizes = [2, 5], strides = [1, 1]} : vector<2x15xf32> to vector<2x5xf32>
    %1704 = arith.mulf %1702, %1639 : vector<2x5xf32>
    %1705 = arith.mulf %1701, %1700 : vector<2x5xf32>
    %1706 = arith.addf %1704, %1705 : vector<2x5xf32>
    %1707 = math.tanh %1706 : vector<2x5xf32>
    %1708 = arith.mulf %1703, %1707 : vector<2x5xf32>
    %1709 = vector.extract_strided_slice %1256 {offsets = [0, 0], sizes = [2, 1], strides = [1, 1]} : vector<2x5xf32> to vector<2x1xf32>
    %1710 = vector.broadcast %1709 : vector<2x1xf32> to vector<2x20xf32>
    %1711 = vector.broadcast %1525 : vector<1x20xf32> to vector<2x20xf32>
    %1712 = arith.mulf %1710, %1711 : vector<2x20xf32>
    %1713 = vector.extract_strided_slice %1256 {offsets = [0, 1], sizes = [2, 1], strides = [1, 1]} : vector<2x5xf32> to vector<2x1xf32>
    %1714 = vector.broadcast %1713 : vector<2x1xf32> to vector<2x20xf32>
    %1715 = vector.broadcast %1526 : vector<1x20xf32> to vector<2x20xf32>
    %1716 = arith.mulf %1714, %1715 : vector<2x20xf32>
    %1717 = vector.extract_strided_slice %1256 {offsets = [0, 2], sizes = [2, 1], strides = [1, 1]} : vector<2x5xf32> to vector<2x1xf32>
    %1718 = vector.broadcast %1717 : vector<2x1xf32> to vector<2x20xf32>
    %1719 = vector.broadcast %1527 : vector<1x20xf32> to vector<2x20xf32>
    %1720 = arith.mulf %1718, %1719 : vector<2x20xf32>
    %1721 = vector.extract_strided_slice %1256 {offsets = [0, 3], sizes = [2, 1], strides = [1, 1]} : vector<2x5xf32> to vector<2x1xf32>
    %1722 = vector.broadcast %1721 : vector<2x1xf32> to vector<2x20xf32>
    %1723 = vector.broadcast %1528 : vector<1x20xf32> to vector<2x20xf32>
    %1724 = arith.mulf %1722, %1723 : vector<2x20xf32>
    %1725 = vector.extract_strided_slice %1256 {offsets = [0, 4], sizes = [2, 1], strides = [1, 1]} : vector<2x5xf32> to vector<2x1xf32>
    %1726 = vector.broadcast %1725 : vector<2x1xf32> to vector<2x20xf32>
    %1727 = vector.broadcast %1529 : vector<1x20xf32> to vector<2x20xf32>
    %1728 = arith.mulf %1726, %1727 : vector<2x20xf32>
    %1729 = arith.addf %1712, %1716 : vector<2x20xf32>
    %1730 = arith.addf %1720, %1724 : vector<2x20xf32>
    %1731 = arith.addf %1729, %1730 : vector<2x20xf32>
    %1732 = arith.addf %1731, %1728 : vector<2x20xf32>
    %1733 = vector.broadcast %1535 : vector<1x20xf32> to vector<2x20xf32>
    %1734 = arith.addf %1733, %1732 : vector<2x20xf32>
    %1735 = vector.extract_strided_slice %1708 {offsets = [0, 0], sizes = [2, 1], strides = [1, 1]} : vector<2x5xf32> to vector<2x1xf32>
    %1736 = vector.broadcast %1735 : vector<2x1xf32> to vector<2x20xf32>
    %1737 = vector.broadcast %1530 : vector<1x20xf32> to vector<2x20xf32>
    %1738 = arith.mulf %1736, %1737 : vector<2x20xf32>
    %1739 = vector.extract_strided_slice %1708 {offsets = [0, 1], sizes = [2, 1], strides = [1, 1]} : vector<2x5xf32> to vector<2x1xf32>
    %1740 = vector.broadcast %1739 : vector<2x1xf32> to vector<2x20xf32>
    %1741 = vector.broadcast %1531 : vector<1x20xf32> to vector<2x20xf32>
    %1742 = arith.mulf %1740, %1741 : vector<2x20xf32>
    %1743 = vector.extract_strided_slice %1708 {offsets = [0, 2], sizes = [2, 1], strides = [1, 1]} : vector<2x5xf32> to vector<2x1xf32>
    %1744 = vector.broadcast %1743 : vector<2x1xf32> to vector<2x20xf32>
    %1745 = vector.broadcast %1532 : vector<1x20xf32> to vector<2x20xf32>
    %1746 = arith.mulf %1744, %1745 : vector<2x20xf32>
    %1747 = vector.extract_strided_slice %1708 {offsets = [0, 3], sizes = [2, 1], strides = [1, 1]} : vector<2x5xf32> to vector<2x1xf32>
    %1748 = vector.broadcast %1747 : vector<2x1xf32> to vector<2x20xf32>
    %1749 = vector.broadcast %1533 : vector<1x20xf32> to vector<2x20xf32>
    %1750 = arith.mulf %1748, %1749 : vector<2x20xf32>
    %1751 = vector.extract_strided_slice %1708 {offsets = [0, 4], sizes = [2, 1], strides = [1, 1]} : vector<2x5xf32> to vector<2x1xf32>
    %1752 = vector.broadcast %1751 : vector<2x1xf32> to vector<2x20xf32>
    %1753 = vector.broadcast %1534 : vector<1x20xf32> to vector<2x20xf32>
    %1754 = arith.mulf %1752, %1753 : vector<2x20xf32>
    %1755 = arith.addf %1738, %1742 : vector<2x20xf32>
    %1756 = arith.addf %1746, %1750 : vector<2x20xf32>
    %1757 = arith.addf %1755, %1756 : vector<2x20xf32>
    %1758 = arith.addf %1757, %1754 : vector<2x20xf32>
    %1759 = arith.addf %1734, %1758 : vector<2x20xf32>
    %1760 = vector.extract_strided_slice %1759 {offsets = [0, 0], sizes = [2, 15], strides = [1, 1]} : vector<2x20xf32> to vector<2x15xf32>
    %1761 = arith.negf %1760 : vector<2x15xf32>
    %1762 = math.exp %1761 : vector<2x15xf32>
    %cst_71 = arith.constant 1.000000e+00 : f32
    %1763 = vector.broadcast %cst_71 : f32 to vector<2x15xf32>
    %1764 = arith.addf %1763, %1762 : vector<2x15xf32>
    %1765 = arith.divf %1763, %1764 : vector<2x15xf32>
    %1766 = vector.extract_strided_slice %1759 {offsets = [0, 15], sizes = [2, 5], strides = [1, 1]} : vector<2x20xf32> to vector<2x5xf32>
    %1767 = math.tanh %1766 : vector<2x5xf32>
    %1768 = vector.extract_strided_slice %1765 {offsets = [0, 0], sizes = [2, 5], strides = [1, 1]} : vector<2x15xf32> to vector<2x5xf32>
    %1769 = vector.extract_strided_slice %1765 {offsets = [0, 5], sizes = [2, 5], strides = [1, 1]} : vector<2x15xf32> to vector<2x5xf32>
    %1770 = vector.extract_strided_slice %1765 {offsets = [0, 10], sizes = [2, 5], strides = [1, 1]} : vector<2x15xf32> to vector<2x5xf32>
    %1771 = arith.mulf %1769, %1706 : vector<2x5xf32>
    %1772 = arith.mulf %1768, %1767 : vector<2x5xf32>
    %1773 = arith.addf %1771, %1772 : vector<2x5xf32>
    %1774 = math.tanh %1773 : vector<2x5xf32>
    %1775 = arith.mulf %1770, %1774 : vector<2x5xf32>
    %1776 = vector.extract_strided_slice %1323 {offsets = [0, 0], sizes = [2, 1], strides = [1, 1]} : vector<2x5xf32> to vector<2x1xf32>
    %1777 = vector.broadcast %1776 : vector<2x1xf32> to vector<2x20xf32>
    %1778 = vector.broadcast %1525 : vector<1x20xf32> to vector<2x20xf32>
    %1779 = arith.mulf %1777, %1778 : vector<2x20xf32>
    %1780 = vector.extract_strided_slice %1323 {offsets = [0, 1], sizes = [2, 1], strides = [1, 1]} : vector<2x5xf32> to vector<2x1xf32>
    %1781 = vector.broadcast %1780 : vector<2x1xf32> to vector<2x20xf32>
    %1782 = vector.broadcast %1526 : vector<1x20xf32> to vector<2x20xf32>
    %1783 = arith.mulf %1781, %1782 : vector<2x20xf32>
    %1784 = vector.extract_strided_slice %1323 {offsets = [0, 2], sizes = [2, 1], strides = [1, 1]} : vector<2x5xf32> to vector<2x1xf32>
    %1785 = vector.broadcast %1784 : vector<2x1xf32> to vector<2x20xf32>
    %1786 = vector.broadcast %1527 : vector<1x20xf32> to vector<2x20xf32>
    %1787 = arith.mulf %1785, %1786 : vector<2x20xf32>
    %1788 = vector.extract_strided_slice %1323 {offsets = [0, 3], sizes = [2, 1], strides = [1, 1]} : vector<2x5xf32> to vector<2x1xf32>
    %1789 = vector.broadcast %1788 : vector<2x1xf32> to vector<2x20xf32>
    %1790 = vector.broadcast %1528 : vector<1x20xf32> to vector<2x20xf32>
    %1791 = arith.mulf %1789, %1790 : vector<2x20xf32>
    %1792 = vector.extract_strided_slice %1323 {offsets = [0, 4], sizes = [2, 1], strides = [1, 1]} : vector<2x5xf32> to vector<2x1xf32>
    %1793 = vector.broadcast %1792 : vector<2x1xf32> to vector<2x20xf32>
    %1794 = vector.broadcast %1529 : vector<1x20xf32> to vector<2x20xf32>
    %1795 = arith.mulf %1793, %1794 : vector<2x20xf32>
    %1796 = arith.addf %1779, %1783 : vector<2x20xf32>
    %1797 = arith.addf %1787, %1791 : vector<2x20xf32>
    %1798 = arith.addf %1796, %1797 : vector<2x20xf32>
    %1799 = arith.addf %1798, %1795 : vector<2x20xf32>
    %1800 = vector.broadcast %1535 : vector<1x20xf32> to vector<2x20xf32>
    %1801 = arith.addf %1800, %1799 : vector<2x20xf32>
    %1802 = vector.extract_strided_slice %1775 {offsets = [0, 0], sizes = [2, 1], strides = [1, 1]} : vector<2x5xf32> to vector<2x1xf32>
    %1803 = vector.broadcast %1802 : vector<2x1xf32> to vector<2x20xf32>
    %1804 = vector.broadcast %1530 : vector<1x20xf32> to vector<2x20xf32>
    %1805 = arith.mulf %1803, %1804 : vector<2x20xf32>
    %1806 = vector.extract_strided_slice %1775 {offsets = [0, 1], sizes = [2, 1], strides = [1, 1]} : vector<2x5xf32> to vector<2x1xf32>
    %1807 = vector.broadcast %1806 : vector<2x1xf32> to vector<2x20xf32>
    %1808 = vector.broadcast %1531 : vector<1x20xf32> to vector<2x20xf32>
    %1809 = arith.mulf %1807, %1808 : vector<2x20xf32>
    %1810 = vector.extract_strided_slice %1775 {offsets = [0, 2], sizes = [2, 1], strides = [1, 1]} : vector<2x5xf32> to vector<2x1xf32>
    %1811 = vector.broadcast %1810 : vector<2x1xf32> to vector<2x20xf32>
    %1812 = vector.broadcast %1532 : vector<1x20xf32> to vector<2x20xf32>
    %1813 = arith.mulf %1811, %1812 : vector<2x20xf32>
    %1814 = vector.extract_strided_slice %1775 {offsets = [0, 3], sizes = [2, 1], strides = [1, 1]} : vector<2x5xf32> to vector<2x1xf32>
    %1815 = vector.broadcast %1814 : vector<2x1xf32> to vector<2x20xf32>
    %1816 = vector.broadcast %1533 : vector<1x20xf32> to vector<2x20xf32>
    %1817 = arith.mulf %1815, %1816 : vector<2x20xf32>
    %1818 = vector.extract_strided_slice %1775 {offsets = [0, 4], sizes = [2, 1], strides = [1, 1]} : vector<2x5xf32> to vector<2x1xf32>
    %1819 = vector.broadcast %1818 : vector<2x1xf32> to vector<2x20xf32>
    %1820 = vector.broadcast %1534 : vector<1x20xf32> to vector<2x20xf32>
    %1821 = arith.mulf %1819, %1820 : vector<2x20xf32>
    %1822 = arith.addf %1805, %1809 : vector<2x20xf32>
    %1823 = arith.addf %1813, %1817 : vector<2x20xf32>
    %1824 = arith.addf %1822, %1823 : vector<2x20xf32>
    %1825 = arith.addf %1824, %1821 : vector<2x20xf32>
    %1826 = arith.addf %1801, %1825 : vector<2x20xf32>
    %1827 = vector.extract_strided_slice %1826 {offsets = [0, 0], sizes = [2, 15], strides = [1, 1]} : vector<2x20xf32> to vector<2x15xf32>
    %1828 = arith.negf %1827 : vector<2x15xf32>
    %1829 = math.exp %1828 : vector<2x15xf32>
    %cst_72 = arith.constant 1.000000e+00 : f32
    %1830 = vector.broadcast %cst_72 : f32 to vector<2x15xf32>
    %1831 = arith.addf %1830, %1829 : vector<2x15xf32>
    %1832 = arith.divf %1830, %1831 : vector<2x15xf32>
    %1833 = vector.extract_strided_slice %1826 {offsets = [0, 15], sizes = [2, 5], strides = [1, 1]} : vector<2x20xf32> to vector<2x5xf32>
    %1834 = math.tanh %1833 : vector<2x5xf32>
    %1835 = vector.extract_strided_slice %1832 {offsets = [0, 0], sizes = [2, 5], strides = [1, 1]} : vector<2x15xf32> to vector<2x5xf32>
    %1836 = vector.extract_strided_slice %1832 {offsets = [0, 5], sizes = [2, 5], strides = [1, 1]} : vector<2x15xf32> to vector<2x5xf32>
    %1837 = vector.extract_strided_slice %1832 {offsets = [0, 10], sizes = [2, 5], strides = [1, 1]} : vector<2x15xf32> to vector<2x5xf32>
    %1838 = arith.mulf %1836, %1773 : vector<2x5xf32>
    %1839 = arith.mulf %1835, %1834 : vector<2x5xf32>
    %1840 = arith.addf %1838, %1839 : vector<2x5xf32>
    %1841 = math.tanh %1840 : vector<2x5xf32>
    %1842 = arith.mulf %1837, %1841 : vector<2x5xf32>
    %1843 = vector.extract_strided_slice %1390 {offsets = [0, 0], sizes = [2, 1], strides = [1, 1]} : vector<2x5xf32> to vector<2x1xf32>
    %1844 = vector.broadcast %1843 : vector<2x1xf32> to vector<2x20xf32>
    %1845 = vector.broadcast %1525 : vector<1x20xf32> to vector<2x20xf32>
    %1846 = arith.mulf %1844, %1845 : vector<2x20xf32>
    %1847 = vector.extract_strided_slice %1390 {offsets = [0, 1], sizes = [2, 1], strides = [1, 1]} : vector<2x5xf32> to vector<2x1xf32>
    %1848 = vector.broadcast %1847 : vector<2x1xf32> to vector<2x20xf32>
    %1849 = vector.broadcast %1526 : vector<1x20xf32> to vector<2x20xf32>
    %1850 = arith.mulf %1848, %1849 : vector<2x20xf32>
    %1851 = vector.extract_strided_slice %1390 {offsets = [0, 2], sizes = [2, 1], strides = [1, 1]} : vector<2x5xf32> to vector<2x1xf32>
    %1852 = vector.broadcast %1851 : vector<2x1xf32> to vector<2x20xf32>
    %1853 = vector.broadcast %1527 : vector<1x20xf32> to vector<2x20xf32>
    %1854 = arith.mulf %1852, %1853 : vector<2x20xf32>
    %1855 = vector.extract_strided_slice %1390 {offsets = [0, 3], sizes = [2, 1], strides = [1, 1]} : vector<2x5xf32> to vector<2x1xf32>
    %1856 = vector.broadcast %1855 : vector<2x1xf32> to vector<2x20xf32>
    %1857 = vector.broadcast %1528 : vector<1x20xf32> to vector<2x20xf32>
    %1858 = arith.mulf %1856, %1857 : vector<2x20xf32>
    %1859 = vector.extract_strided_slice %1390 {offsets = [0, 4], sizes = [2, 1], strides = [1, 1]} : vector<2x5xf32> to vector<2x1xf32>
    %1860 = vector.broadcast %1859 : vector<2x1xf32> to vector<2x20xf32>
    %1861 = vector.broadcast %1529 : vector<1x20xf32> to vector<2x20xf32>
    %1862 = arith.mulf %1860, %1861 : vector<2x20xf32>
    %1863 = arith.addf %1846, %1850 : vector<2x20xf32>
    %1864 = arith.addf %1854, %1858 : vector<2x20xf32>
    %1865 = arith.addf %1863, %1864 : vector<2x20xf32>
    %1866 = arith.addf %1865, %1862 : vector<2x20xf32>
    %1867 = vector.broadcast %1535 : vector<1x20xf32> to vector<2x20xf32>
    %1868 = arith.addf %1867, %1866 : vector<2x20xf32>
    %1869 = vector.extract_strided_slice %1842 {offsets = [0, 0], sizes = [2, 1], strides = [1, 1]} : vector<2x5xf32> to vector<2x1xf32>
    %1870 = vector.broadcast %1869 : vector<2x1xf32> to vector<2x20xf32>
    %1871 = vector.broadcast %1530 : vector<1x20xf32> to vector<2x20xf32>
    %1872 = arith.mulf %1870, %1871 : vector<2x20xf32>
    %1873 = vector.extract_strided_slice %1842 {offsets = [0, 1], sizes = [2, 1], strides = [1, 1]} : vector<2x5xf32> to vector<2x1xf32>
    %1874 = vector.broadcast %1873 : vector<2x1xf32> to vector<2x20xf32>
    %1875 = vector.broadcast %1531 : vector<1x20xf32> to vector<2x20xf32>
    %1876 = arith.mulf %1874, %1875 : vector<2x20xf32>
    %1877 = vector.extract_strided_slice %1842 {offsets = [0, 2], sizes = [2, 1], strides = [1, 1]} : vector<2x5xf32> to vector<2x1xf32>
    %1878 = vector.broadcast %1877 : vector<2x1xf32> to vector<2x20xf32>
    %1879 = vector.broadcast %1532 : vector<1x20xf32> to vector<2x20xf32>
    %1880 = arith.mulf %1878, %1879 : vector<2x20xf32>
    %1881 = vector.extract_strided_slice %1842 {offsets = [0, 3], sizes = [2, 1], strides = [1, 1]} : vector<2x5xf32> to vector<2x1xf32>
    %1882 = vector.broadcast %1881 : vector<2x1xf32> to vector<2x20xf32>
    %1883 = vector.broadcast %1533 : vector<1x20xf32> to vector<2x20xf32>
    %1884 = arith.mulf %1882, %1883 : vector<2x20xf32>
    %1885 = vector.extract_strided_slice %1842 {offsets = [0, 4], sizes = [2, 1], strides = [1, 1]} : vector<2x5xf32> to vector<2x1xf32>
    %1886 = vector.broadcast %1885 : vector<2x1xf32> to vector<2x20xf32>
    %1887 = vector.broadcast %1534 : vector<1x20xf32> to vector<2x20xf32>
    %1888 = arith.mulf %1886, %1887 : vector<2x20xf32>
    %1889 = arith.addf %1872, %1876 : vector<2x20xf32>
    %1890 = arith.addf %1880, %1884 : vector<2x20xf32>
    %1891 = arith.addf %1889, %1890 : vector<2x20xf32>
    %1892 = arith.addf %1891, %1888 : vector<2x20xf32>
    %1893 = arith.addf %1868, %1892 : vector<2x20xf32>
    %1894 = vector.extract_strided_slice %1893 {offsets = [0, 0], sizes = [2, 15], strides = [1, 1]} : vector<2x20xf32> to vector<2x15xf32>
    %1895 = arith.negf %1894 : vector<2x15xf32>
    %1896 = math.exp %1895 : vector<2x15xf32>
    %cst_73 = arith.constant 1.000000e+00 : f32
    %1897 = vector.broadcast %cst_73 : f32 to vector<2x15xf32>
    %1898 = arith.addf %1897, %1896 : vector<2x15xf32>
    %1899 = arith.divf %1897, %1898 : vector<2x15xf32>
    %1900 = vector.extract_strided_slice %1893 {offsets = [0, 15], sizes = [2, 5], strides = [1, 1]} : vector<2x20xf32> to vector<2x5xf32>
    %1901 = math.tanh %1900 : vector<2x5xf32>
    %1902 = vector.extract_strided_slice %1899 {offsets = [0, 0], sizes = [2, 5], strides = [1, 1]} : vector<2x15xf32> to vector<2x5xf32>
    %1903 = vector.extract_strided_slice %1899 {offsets = [0, 5], sizes = [2, 5], strides = [1, 1]} : vector<2x15xf32> to vector<2x5xf32>
    %1904 = vector.extract_strided_slice %1899 {offsets = [0, 10], sizes = [2, 5], strides = [1, 1]} : vector<2x15xf32> to vector<2x5xf32>
    %1905 = arith.mulf %1903, %1840 : vector<2x5xf32>
    %1906 = arith.mulf %1902, %1901 : vector<2x5xf32>
    %1907 = arith.addf %1905, %1906 : vector<2x5xf32>
    %1908 = math.tanh %1907 : vector<2x5xf32>
    %1909 = arith.mulf %1904, %1908 : vector<2x5xf32>
    %1910 = vector.extract_strided_slice %1457 {offsets = [0, 0], sizes = [2, 1], strides = [1, 1]} : vector<2x5xf32> to vector<2x1xf32>
    %1911 = vector.broadcast %1910 : vector<2x1xf32> to vector<2x20xf32>
    %1912 = vector.broadcast %1525 : vector<1x20xf32> to vector<2x20xf32>
    %1913 = arith.mulf %1911, %1912 : vector<2x20xf32>
    %1914 = vector.extract_strided_slice %1457 {offsets = [0, 1], sizes = [2, 1], strides = [1, 1]} : vector<2x5xf32> to vector<2x1xf32>
    %1915 = vector.broadcast %1914 : vector<2x1xf32> to vector<2x20xf32>
    %1916 = vector.broadcast %1526 : vector<1x20xf32> to vector<2x20xf32>
    %1917 = arith.mulf %1915, %1916 : vector<2x20xf32>
    %1918 = vector.extract_strided_slice %1457 {offsets = [0, 2], sizes = [2, 1], strides = [1, 1]} : vector<2x5xf32> to vector<2x1xf32>
    %1919 = vector.broadcast %1918 : vector<2x1xf32> to vector<2x20xf32>
    %1920 = vector.broadcast %1527 : vector<1x20xf32> to vector<2x20xf32>
    %1921 = arith.mulf %1919, %1920 : vector<2x20xf32>
    %1922 = vector.extract_strided_slice %1457 {offsets = [0, 3], sizes = [2, 1], strides = [1, 1]} : vector<2x5xf32> to vector<2x1xf32>
    %1923 = vector.broadcast %1922 : vector<2x1xf32> to vector<2x20xf32>
    %1924 = vector.broadcast %1528 : vector<1x20xf32> to vector<2x20xf32>
    %1925 = arith.mulf %1923, %1924 : vector<2x20xf32>
    %1926 = vector.extract_strided_slice %1457 {offsets = [0, 4], sizes = [2, 1], strides = [1, 1]} : vector<2x5xf32> to vector<2x1xf32>
    %1927 = vector.broadcast %1926 : vector<2x1xf32> to vector<2x20xf32>
    %1928 = vector.broadcast %1529 : vector<1x20xf32> to vector<2x20xf32>
    %1929 = arith.mulf %1927, %1928 : vector<2x20xf32>
    %1930 = arith.addf %1913, %1917 : vector<2x20xf32>
    %1931 = arith.addf %1921, %1925 : vector<2x20xf32>
    %1932 = arith.addf %1930, %1931 : vector<2x20xf32>
    %1933 = arith.addf %1932, %1929 : vector<2x20xf32>
    %1934 = vector.broadcast %1535 : vector<1x20xf32> to vector<2x20xf32>
    %1935 = arith.addf %1934, %1933 : vector<2x20xf32>
    %1936 = vector.extract_strided_slice %1909 {offsets = [0, 0], sizes = [2, 1], strides = [1, 1]} : vector<2x5xf32> to vector<2x1xf32>
    %1937 = vector.broadcast %1936 : vector<2x1xf32> to vector<2x20xf32>
    %1938 = vector.broadcast %1530 : vector<1x20xf32> to vector<2x20xf32>
    %1939 = arith.mulf %1937, %1938 : vector<2x20xf32>
    %1940 = vector.extract_strided_slice %1909 {offsets = [0, 1], sizes = [2, 1], strides = [1, 1]} : vector<2x5xf32> to vector<2x1xf32>
    %1941 = vector.broadcast %1940 : vector<2x1xf32> to vector<2x20xf32>
    %1942 = vector.broadcast %1531 : vector<1x20xf32> to vector<2x20xf32>
    %1943 = arith.mulf %1941, %1942 : vector<2x20xf32>
    %1944 = vector.extract_strided_slice %1909 {offsets = [0, 2], sizes = [2, 1], strides = [1, 1]} : vector<2x5xf32> to vector<2x1xf32>
    %1945 = vector.broadcast %1944 : vector<2x1xf32> to vector<2x20xf32>
    %1946 = vector.broadcast %1532 : vector<1x20xf32> to vector<2x20xf32>
    %1947 = arith.mulf %1945, %1946 : vector<2x20xf32>
    %1948 = vector.extract_strided_slice %1909 {offsets = [0, 3], sizes = [2, 1], strides = [1, 1]} : vector<2x5xf32> to vector<2x1xf32>
    %1949 = vector.broadcast %1948 : vector<2x1xf32> to vector<2x20xf32>
    %1950 = vector.broadcast %1533 : vector<1x20xf32> to vector<2x20xf32>
    %1951 = arith.mulf %1949, %1950 : vector<2x20xf32>
    %1952 = vector.extract_strided_slice %1909 {offsets = [0, 4], sizes = [2, 1], strides = [1, 1]} : vector<2x5xf32> to vector<2x1xf32>
    %1953 = vector.broadcast %1952 : vector<2x1xf32> to vector<2x20xf32>
    %1954 = vector.broadcast %1534 : vector<1x20xf32> to vector<2x20xf32>
    %1955 = arith.mulf %1953, %1954 : vector<2x20xf32>
    %1956 = arith.addf %1939, %1943 : vector<2x20xf32>
    %1957 = arith.addf %1947, %1951 : vector<2x20xf32>
    %1958 = arith.addf %1956, %1957 : vector<2x20xf32>
    %1959 = arith.addf %1958, %1955 : vector<2x20xf32>
    %1960 = arith.addf %1935, %1959 : vector<2x20xf32>
    %1961 = vector.extract_strided_slice %1960 {offsets = [0, 0], sizes = [2, 15], strides = [1, 1]} : vector<2x20xf32> to vector<2x15xf32>
    %1962 = arith.negf %1961 : vector<2x15xf32>
    %1963 = math.exp %1962 : vector<2x15xf32>
    %cst_74 = arith.constant 1.000000e+00 : f32
    %1964 = vector.broadcast %cst_74 : f32 to vector<2x15xf32>
    %1965 = arith.addf %1964, %1963 : vector<2x15xf32>
    %1966 = arith.divf %1964, %1965 : vector<2x15xf32>
    %1967 = vector.extract_strided_slice %1960 {offsets = [0, 15], sizes = [2, 5], strides = [1, 1]} : vector<2x20xf32> to vector<2x5xf32>
    %1968 = math.tanh %1967 : vector<2x5xf32>
    %1969 = vector.extract_strided_slice %1966 {offsets = [0, 0], sizes = [2, 5], strides = [1, 1]} : vector<2x15xf32> to vector<2x5xf32>
    %1970 = vector.extract_strided_slice %1966 {offsets = [0, 5], sizes = [2, 5], strides = [1, 1]} : vector<2x15xf32> to vector<2x5xf32>
    %1971 = vector.extract_strided_slice %1966 {offsets = [0, 10], sizes = [2, 5], strides = [1, 1]} : vector<2x15xf32> to vector<2x5xf32>
    %1972 = arith.mulf %1970, %1907 : vector<2x5xf32>
    %1973 = arith.mulf %1969, %1968 : vector<2x5xf32>
    %1974 = arith.addf %1972, %1973 : vector<2x5xf32>
    %1975 = math.tanh %1974 : vector<2x5xf32>
    %1976 = arith.mulf %1971, %1975 : vector<2x5xf32>
    %1977 = vector.extract_strided_slice %1524 {offsets = [0, 0], sizes = [2, 1], strides = [1, 1]} : vector<2x5xf32> to vector<2x1xf32>
    %1978 = vector.broadcast %1977 : vector<2x1xf32> to vector<2x20xf32>
    %1979 = vector.broadcast %1525 : vector<1x20xf32> to vector<2x20xf32>
    %1980 = arith.mulf %1978, %1979 : vector<2x20xf32>
    %1981 = vector.extract_strided_slice %1524 {offsets = [0, 1], sizes = [2, 1], strides = [1, 1]} : vector<2x5xf32> to vector<2x1xf32>
    %1982 = vector.broadcast %1981 : vector<2x1xf32> to vector<2x20xf32>
    %1983 = vector.broadcast %1526 : vector<1x20xf32> to vector<2x20xf32>
    %1984 = arith.mulf %1982, %1983 : vector<2x20xf32>
    %1985 = vector.extract_strided_slice %1524 {offsets = [0, 2], sizes = [2, 1], strides = [1, 1]} : vector<2x5xf32> to vector<2x1xf32>
    %1986 = vector.broadcast %1985 : vector<2x1xf32> to vector<2x20xf32>
    %1987 = vector.broadcast %1527 : vector<1x20xf32> to vector<2x20xf32>
    %1988 = arith.mulf %1986, %1987 : vector<2x20xf32>
    %1989 = vector.extract_strided_slice %1524 {offsets = [0, 3], sizes = [2, 1], strides = [1, 1]} : vector<2x5xf32> to vector<2x1xf32>
    %1990 = vector.broadcast %1989 : vector<2x1xf32> to vector<2x20xf32>
    %1991 = vector.broadcast %1528 : vector<1x20xf32> to vector<2x20xf32>
    %1992 = arith.mulf %1990, %1991 : vector<2x20xf32>
    %1993 = vector.extract_strided_slice %1524 {offsets = [0, 4], sizes = [2, 1], strides = [1, 1]} : vector<2x5xf32> to vector<2x1xf32>
    %1994 = vector.broadcast %1993 : vector<2x1xf32> to vector<2x20xf32>
    %1995 = vector.broadcast %1529 : vector<1x20xf32> to vector<2x20xf32>
    %1996 = arith.mulf %1994, %1995 : vector<2x20xf32>
    %1997 = arith.addf %1980, %1984 : vector<2x20xf32>
    %1998 = arith.addf %1988, %1992 : vector<2x20xf32>
    %1999 = arith.addf %1997, %1998 : vector<2x20xf32>
    %2000 = arith.addf %1999, %1996 : vector<2x20xf32>
    %2001 = vector.broadcast %1535 : vector<1x20xf32> to vector<2x20xf32>
    %2002 = arith.addf %2001, %2000 : vector<2x20xf32>
    %2003 = vector.extract_strided_slice %1976 {offsets = [0, 0], sizes = [2, 1], strides = [1, 1]} : vector<2x5xf32> to vector<2x1xf32>
    %2004 = vector.broadcast %2003 : vector<2x1xf32> to vector<2x20xf32>
    %2005 = vector.broadcast %1530 : vector<1x20xf32> to vector<2x20xf32>
    %2006 = arith.mulf %2004, %2005 : vector<2x20xf32>
    %2007 = vector.extract_strided_slice %1976 {offsets = [0, 1], sizes = [2, 1], strides = [1, 1]} : vector<2x5xf32> to vector<2x1xf32>
    %2008 = vector.broadcast %2007 : vector<2x1xf32> to vector<2x20xf32>
    %2009 = vector.broadcast %1531 : vector<1x20xf32> to vector<2x20xf32>
    %2010 = arith.mulf %2008, %2009 : vector<2x20xf32>
    %2011 = vector.extract_strided_slice %1976 {offsets = [0, 2], sizes = [2, 1], strides = [1, 1]} : vector<2x5xf32> to vector<2x1xf32>
    %2012 = vector.broadcast %2011 : vector<2x1xf32> to vector<2x20xf32>
    %2013 = vector.broadcast %1532 : vector<1x20xf32> to vector<2x20xf32>
    %2014 = arith.mulf %2012, %2013 : vector<2x20xf32>
    %2015 = vector.extract_strided_slice %1976 {offsets = [0, 3], sizes = [2, 1], strides = [1, 1]} : vector<2x5xf32> to vector<2x1xf32>
    %2016 = vector.broadcast %2015 : vector<2x1xf32> to vector<2x20xf32>
    %2017 = vector.broadcast %1533 : vector<1x20xf32> to vector<2x20xf32>
    %2018 = arith.mulf %2016, %2017 : vector<2x20xf32>
    %2019 = vector.extract_strided_slice %1976 {offsets = [0, 4], sizes = [2, 1], strides = [1, 1]} : vector<2x5xf32> to vector<2x1xf32>
    %2020 = vector.broadcast %2019 : vector<2x1xf32> to vector<2x20xf32>
    %2021 = vector.broadcast %1534 : vector<1x20xf32> to vector<2x20xf32>
    %2022 = arith.mulf %2020, %2021 : vector<2x20xf32>
    %2023 = arith.addf %2006, %2010 : vector<2x20xf32>
    %2024 = arith.addf %2014, %2018 : vector<2x20xf32>
    %2025 = arith.addf %2023, %2024 : vector<2x20xf32>
    %2026 = arith.addf %2025, %2022 : vector<2x20xf32>
    %2027 = arith.addf %2002, %2026 : vector<2x20xf32>
    %2028 = vector.extract_strided_slice %2027 {offsets = [0, 0], sizes = [2, 15], strides = [1, 1]} : vector<2x20xf32> to vector<2x15xf32>
    %2029 = arith.negf %2028 : vector<2x15xf32>
    %2030 = math.exp %2029 : vector<2x15xf32>
    %cst_75 = arith.constant 1.000000e+00 : f32
    %2031 = vector.broadcast %cst_75 : f32 to vector<2x15xf32>
    %2032 = arith.addf %2031, %2030 : vector<2x15xf32>
    %2033 = arith.divf %2031, %2032 : vector<2x15xf32>
    %2034 = vector.extract_strided_slice %2027 {offsets = [0, 15], sizes = [2, 5], strides = [1, 1]} : vector<2x20xf32> to vector<2x5xf32>
    %2035 = math.tanh %2034 : vector<2x5xf32>
    %2036 = vector.extract_strided_slice %2033 {offsets = [0, 0], sizes = [2, 5], strides = [1, 1]} : vector<2x15xf32> to vector<2x5xf32>
    %2037 = vector.extract_strided_slice %2033 {offsets = [0, 5], sizes = [2, 5], strides = [1, 1]} : vector<2x15xf32> to vector<2x5xf32>
    %2038 = vector.extract_strided_slice %2033 {offsets = [0, 10], sizes = [2, 5], strides = [1, 1]} : vector<2x15xf32> to vector<2x5xf32>
    %2039 = arith.mulf %2037, %1974 : vector<2x5xf32>
    %2040 = arith.mulf %2036, %2035 : vector<2x5xf32>
    %2041 = arith.addf %2039, %2040 : vector<2x5xf32>
    %2042 = math.tanh %2041 : vector<2x5xf32>
    %2043 = arith.mulf %2038, %2042 : vector<2x5xf32>
    %c43 = arith.constant 43 : index
    %c0_76 = arith.constant 0 : index
    %2044 = vector.load %arg1[%c43, %c0_76] : memref<44x20xf32, #tpu.memory_space<vmem>>, vector<1x5xf32>
    %c43_77 = arith.constant 43 : index
    %c5_78 = arith.constant 5 : index
    %2045 = vector.load %arg1[%c43_77, %c5_78] : memref<44x20xf32, #tpu.memory_space<vmem>>, vector<1x1xf32>
    %2046 = vector.broadcast %2044 : vector<1x5xf32> to vector<2x5xf32>
    %2047 = arith.mulf %2043, %2046 : vector<2x5xf32>
    %cst_79 = arith.constant dense<0.000000e+00> : vector<2xf32>
    %2048 = vector.multi_reduction <add>, %2047, %cst_79 [1] : vector<2x5xf32> to vector<2xf32>
    %2049 = vector.shape_cast %2048 : vector<2xf32> to vector<2x1xf32>
    %2050 = vector.broadcast %2045 : vector<1x1xf32> to vector<2x1xf32>
    %2051 = arith.addf %2049, %2050 : vector<2x1xf32>
    %c0_80 = arith.constant 0 : index
    %c0_81 = arith.constant 0 : index
    %2052 = vector.load %arg2[%c0_80, %c0_81] : memref<2x1xf32, #tpu.memory_space<vmem>>, vector<2x1xf32>
    tpu.vector_store %arg2[%c0_80, %c0_81], %2051 {strides = array<i32>} : memref<2x1xf32, #tpu.memory_space<vmem>>, vector<2x1xf32>,
    return
  }
}

</mosaic_0001>

<bundles_post_ra>
// kernel: lstm_forward.1
= control target key start
LH: loop header
LB: loop body
LE: loop exit
PB: predicated region body
PF: predicated region fallthrough
CT: control target
= control target key end

     0   :  { %v4223_v0 = vmov 2   ;;  %v2967_v1 = vmov 0   ;;  %v4233_v3 = vmov 3   ;;  %v4224_v4 = vmov 1   ;;  %s2970_s21 = smov 113   ;;  %s2973_s22 = smov 10   ;;  %s4218_s0 = inlined_call_operand.vmem [shape: f32[16,4], index: 0, kind: input, shape index: {}]   ;;  %s4219_s1 = inlined_call_operand.vmem [shape: f32[44,20], index: 1, kind: input, shape index: {}]   ;;  %s4220_s2 = inlined_call_operand.vmem [shape: f32[2,1], index: 2, kind: output, shape index: {}]  }
   0x1   :  { %2490 = vset.pattern.permute.xlu1 %v4223_v0  ;;  %2488 = vset.pattern.permute.xlu0 %v2967_v1  ;;  %v11_v2 = vld [vmem:[%s4218_s0] sm:$0xff]  ;;  %v4227_v29 = vmov 10   ;;  %v4231_v30 = vmov 11   ;;  %v4221_v34 = vmov 14   ;;  %v4229_v35 = vmov 12   ;;  %s2977_s17 = smov 5  }
   0x2   :  { %43 = vperm.xlu1 %2490, %v11_v2   ;;  %25 = vperm.xlu0 %2488, %v11_v2   ;;  %v2400_v7 = vld [vmem:[%s4219_s1 + $0x2] ss:$0 sm:$0xff]  ;;  %v2398_v8 = vld [vmem:[%s4219_s1] ss:$0 sm:$0xff]  ;;  %v2401_v9 = vld [vmem:[%s4219_s1 + $0x3] ss:$0 sm:$0xff] }
   0x3   :  { %v2399_v10 = vld [vmem:[%s4219_s1 + $0x1] ss:$0 sm:$0xff]  ;;  %v2402_v19 = vld [vmem:[%s4219_s1 + $0x27] ss:$0 sm:$0xff]  ;;  %v4225_v36 = vmov 13   ;;  %vm2383_vm0 = vcmask 39942  }
   0x4   :  { %v3036_v39 = vld [vmem:[%s4219_s1 + $0x14] ss:$0 sm:$0xff]  ;;  %v3041_v41 = vld [vmem:[%s4219_s1 + $0x13] ss:$0 sm:$0xff]  ;;  %v3046_v42 = vld [vmem:[%s4219_s1 + $0x15] ss:$0 sm:$0xff] }
   0x5   :  { %v3051_v43 = vld [vmem:[%s4219_s1 + $0x16] ss:$0 sm:$0xff]  ;;  %v3056_v44 = vld [vmem:[%s4219_s1 + $0x7] ss:$0 sm:$0xff]  ;;  %v3061_v45 = vld [vmem:[%s4219_s1 + $0x5] ss:$0 sm:$0xff] }
   0x6   :  { %2491 = vset.pattern.permute.xlu1 %v4233_v3  ;;  %2489 = vset.pattern.permute.xlu0 %v4224_v4  ;;  %v3068_v48 = vld [vmem:[%s4219_s1 + $0x4] ss:$0 sm:$0xff]  ;;  %v3073_v49 = vld [vmem:[%s4219_s1 + $0x6] ss:$0 sm:$0xff]  ;;  %v3082_v55 = vld [vmem:[%s4219_s1 + $0x17] ss:$0 sm:$0xff] }
   0x7   :  { %52 = vperm.xlu1 %2491, %v11_v2   ;;  %34 = vperm.xlu0 %2489, %v11_v2   ;;  %4283 = vst [vmem:[#allocation2_spill] sm:$0xff] %v3068_v48  ;;  %4284 = vst [vmem:[#allocation3_spill] sm:$0xff] %v3073_v49  ;;  %vm2392_vm1 = vcmask 7174  }
   0xb   :  { %2492 = vset.pattern.permute.xlu1 %v4227_v29  ;;  %2493 = vset.pattern.permute.xlu0 %v4231_v30 }
  0x81   :  { %v44_v5 = vpop.permute.xlu1 %43  ;;  %v26_v6 = vpop.permute.xlu0 %25 }
  0x82   :  { %v50_v13 = vmul.f32 %v2400_v7, %v44_v5  ;;  %v32_v14 = vmul.f32 %v2398_v8, %v26_v6  ;;  %v3090_v6 = vld [vmem:[%s4219_s1 + $0x8] ss:$0 sm:$0xff] }
  0x86   :  { %v53_v11 = vpop.permute.xlu1 %52  ;;  %v35_v12 = vpop.permute.xlu0 %34 }
  0x87   :  { %v59_v15 = vmul.f32 %v2401_v9, %v53_v11  ;;  %v41_v16 = vmul.f32 %v2399_v10, %v35_v12  ;;  %v3097_v12 = vld [vmem:[%s4219_s1 + $0x28] ss:$0 sm:$0xff] }
  0x89   :  { %v61_v17 = vadd.f32 %v59_v15, %v50_v13  ;;  %v60_v18 = vadd.f32 %v41_v16, %v32_v14 }
  0x8b   :  { %v62_v20 = vadd.f32 %v61_v17, %v60_v18 }
  0x8d   :  { %v3017_v21 = vadd.f32 %v2402_v19, %v62_v20 }
  0x8f   :  { %2638 = vtanh.f32 %v3017_v21  ;;  %v2403_v23 = vmul.f32 -1.442695, %v3017_v21 }
  0x91   :  { %2640 = vpow2.f32 %v2403_v23 }
  0x99   :  { %v2639_v22 = vpop.eup %2638 }
  0x9a   :  { %76 = vrot.lane.b32.xlu1 %v2639_v22, %s2970_s21 }
  0x9b   :  { %v2641_v24 = vpop.eup %2640 }
  0x9c   :  { %v71_v25 = vadd.f32 1.0, %v2641_v24 }
  0x9e   :  { %2642 = vrcp.f32 %v71_v25 }
  0xa8   :  { %v2643_v26 = vpop.eup %2642 }
 0x10c   :  { %v77_v27 = vpop.permute.xlu1 %76 }
 0x10d   :  { %v3022_v28 = vmul.f32 %v2643_v26, %v77_v27 }
 0x10f   :  { %2644 = vtanh.f32 %v3022_v28  ;;  %v148_v15 = vrot.slane %v3022_v28, 6 }
 0x119   :  { %v2645_v31 = vpop.eup %2644 }
 0x11a   :  { %82 = vrot.lane.b32.xlu0 %v2645_v31, %s2973_s22 }
 0x18c   :  { %v83_v32 = vpop.permute.xlu0 %82 }
 0x18d   :  { %v85_v33 = vmul.f32 %v2643_v26, %v83_v32 }
 0x18f   :  { %97 = vperm.xlu0 %2493, %v85_v33   ;;  %88 = vperm.xlu1 %2492, %v85_v33  }
 0x193   :  { %2496 = vset.pattern.permute.xlu0 %v4221_v34  ;;  %2494 = vset.pattern.permute.xlu1 %v4229_v35 }
 0x194   :  { %124 = vperm.xlu0 %2496, %v85_v33   ;;  %106 = vperm.xlu1 %2494, %v85_v33  }
 0x198   :  { %2495 = vset.pattern.permute.xlu1 %v4225_v36  ;;  %2499 = vset.pattern.permute.xlu0 %v4229_v35 }
 0x199   :  { %115 = vperm.xlu1 %2495, %v85_v33  }
 0x19d   :  { %2497 = vset.pattern.permute.xlu1 %v4227_v29 }
 0x20e   :  { %v89_v37 = vpop.permute.xlu1 %88  ;;  %v98_v40 = vpop.permute.xlu0 %97 }
 0x20f   :  { %v104_v46 = vmul.f32 %v3036_v39, %v98_v40  ;;  %v95_v47 = vmul.f32 %v3041_v41, %v89_v37  ;;  %v580_v54 = vmul.f32 %v3061_v45, %v98_v40  ;;  %v575_v58 = vmul.f32 %v3068_v48, %v89_v37 }
 0x211   :  { %v132_v57 = vadd.f32 %v104_v46, %v95_v47  ;;  %v596_v2 = vadd.f32 %v580_v54, %v575_v58 }
 0x213   :  { %v107_v38 = vpop.permute.xlu1 %106  ;;  %v125_v56 = vpop.permute.xlu0 %124 }
 0x214   :  { %v113_v51 = vmul.f32 %v3046_v42, %v107_v38  ;;  %v585_v59 = vmul.f32 %v3073_v49, %v107_v38  ;;  %v131_v61 = vmul.f32 %v3082_v55, %v125_v56  ;;  %v595_v9 = vmul.f32 %v3090_v6, %v125_v56 }
 0x218   :  { %v116_v50 = vpop.permute.xlu1 %115 }
 0x219   :  { %v122_v52 = vmul.f32 %v3051_v43, %v116_v50  ;;  %v590_v53 = vmul.f32 %v3056_v44, %v116_v50 }
 0x21b   :  { %v133_v60 = vadd.f32 %v122_v52, %v113_v51  ;;  %v597_v63 = vadd.f32 %v590_v53, %v585_v59  ;;  %v3126_v59 = vld [vmem:[%s4219_s1 + $0x1b] ss:$0 sm:$0xff] }
 0x21d   :  { %v134_v62 = vadd.f32 %v133_v60, %v132_v57  ;;  %v598_v8 = vadd.f32 %v597_v63, %v596_v2  ;;  %v3136_v63 = vld [vmem:[%s4219_s1 + $0x19] ss:$0 sm:$0xff] }
 0x21e   :  { %4285 = vst [vmem:[#allocation4_spill] sm:$0xff] %v3136_v63 }
 0x21f   :  { %v135_v5 = vadd.f32 %v134_v62, %v131_v61  ;;  %v599_v11 = vadd.f32 %v598_v8, %v595_v9  ;;  %v3131_v62 = vld [vmem:[%s4219_s1 + $0x1a] ss:$0 sm:$0xff] }
 0x221   :  { %v137_v7 = vrot.slane %v135_v5, 6  ;;  %v604_v13 = vadd.f32 %v3097_v12, %v599_v11  ;;  %v3142_v5 = vld [vmem:[%s4219_s1 + $0x18] ss:$0 sm:$0xff] }
 0x223   :  { %v139_v10 = vadd.f32 %v137_v7, %v3017_v21  ;;  %v2422_v18 = vmul.f32 -1.442695, %v604_v13 }
 0x225   :  { %2646 = vtanh.f32 %v139_v10  ;;  %v2409_v17 = vmul.f32 -1.442695, %v139_v10 }
 0x226   :  { %2648 = vtanh.f32 %v604_v13 }
 0x227   :  { %2650 = vpow2.f32 %v2409_v17 }
 0x228   :  { %2652 = vpow2.f32 %v2422_v18 }
 0x22f   :  { %v2647_v14 = vpop.eup %2646 }
 0x230   :  { %154 = vrot.lane.b32.xlu1 %v2647_v14, %s2970_s21  ;;  %v2649_v16 = vpop.eup %2648 }
 0x231   :  { %v2651_v19 = vpop.eup %2650 }
 0x232   :  { %v143_v20 = vadd.f32 1.0, %v2651_v19  ;;  %v2653_v22 = vpop.eup %2652 }
 0x233   :  { %v608_v23 = vadd.f32 1.0, %v2653_v22 }
 0x234   :  { %149 = vrot.lane.b32.xlu1 %v148_v15, %s2977_s17  ;;  %2654 = vrcp.f32 %v143_v20 }
 0x235   :  { %2656 = vrcp.f32 %v608_v23 }
 0x238   :  { %613 = vrot.lane.b32.xlu1 %v2649_v16, %s2970_s21 }
 0x23e   :  { %v2655_v24 = vpop.eup %2654 }
 0x23f   :  { %v2657_v28 = vpop.eup %2656 }
 0x2a2   :  { %v155_v25 = vpop.permute.xlu1 %154 }
 0x2a3   :  { %v157_v26 = vmul.f32 %v2655_v24, %v155_v25 }
 0x2a5   :  { %159 = vrot.lane.b32.xlu0 %v157_v26, %s2977_s17 }
 0x2a6   :  { %v150_v27 = vpop.permute.xlu1 %149 }
 0x2a7   :  { %v152_v37 = vmul.f32 %v2655_v24, %v150_v27  ;;  %v3159_v27 = vld [vmem:[%s4219_s1 + $0x1c] ss:$0 sm:$0xff] }
 0x2aa   :  { %v614_v31 = vpop.permute.xlu1 %613 }
 0x2ab   :  { %v616_v32 = vmul.f32 %v2657_v28, %v614_v31 }
 0x2ad   :  { %2658 = vtanh.f32 %v616_v32  ;;  %v695_v53 = vrot.slane %v616_v32, 6 }
 0x2b7   :  { %v2659_v33 = vpop.eup %2658 }
 0x2b8   :  { %619 = vrot.lane.b32.xlu1 %v2659_v33, %s2973_s22 }
 0x317   :  { %v160_v38 = vpop.permute.xlu0 %159 }
 0x318   :  { %v3106_v40 = vadd.f32 %v160_v38, %v152_v37 }
 0x31a   :  { %2660 = vtanh.f32 %v3106_v40 }
 0x324   :  { %v2661_v46 = vpop.eup %2660 }
 0x325   :  { %165 = vrot.lane.b32.xlu0 %v2661_v46, %s2977_s17 }
 0x32a   :  { %v620_v47 = vpop.permute.xlu1 %619 }
 0x32b   :  { %v622_v50 = vmul.f32 %v2657_v28, %v620_v47 }
 0x32d   :  { %635 = vperm.xlu1 %2497, %v622_v50   ;;  %653 = vperm.xlu0 %2499, %v622_v50  }
 0x331   :  { %2498 = vset.pattern.permute.xlu1 %v4231_v30  ;;  %2501 = vset.pattern.permute.xlu0 %v4227_v29 }
 0x332   :  { %644 = vperm.xlu1 %2498, %v622_v50  }
 0x336   :  { %2500 = vset.pattern.permute.xlu1 %v4225_v36 }
 0x337   :  { %662 = vperm.xlu1 %2500, %v622_v50  }
 0x33b   :  { %2502 = vset.pattern.permute.xlu1 %v4231_v30 }
 0x397   :  { %v166_v51 = vpop.permute.xlu0 %165 }
 0x398   :  { %v168_v52 = vmul.f32 %v2655_v24, %v166_v51 }
 0x39a   :  { %176 = vperm.xlu1 %2502, %v168_v52   ;;  %171 = vperm.xlu0 %2501, %v168_v52  }
 0x39e   :  { %2503 = vset.pattern.permute.xlu1 %v4229_v35  ;;  %2504 = vset.pattern.permute.xlu0 %v4225_v36 }
 0x39f   :  { %181 = vperm.xlu1 %2503, %v168_v52   ;;  %186 = vperm.xlu0 %2504, %v168_v52  }
 0x3a3   :  { %2505 = vset.pattern.permute.xlu1 %v4221_v34  ;;  %2506 = vset.pattern.permute.xlu0 %v4221_v34 }
 0x3a4   :  { %191 = vperm.xlu1 %2505, %v168_v52   ;;  %671 = vperm.xlu0 %2506, %v622_v50  }
 0x3a8   :  { %696 = vrot.lane.b32.xlu0 %v695_v53, %s2977_s17  ;;  %2507 = vset.pattern.permute.xlu1 %v4227_v29 }
 0x3a9   :  { %2509 = vset.pattern.permute.xlu0 %v4229_v35 }
 0x3ac   :  { %v3121_v54 = vpop.permute.xlu1 %635  ;;  %v654_v57 = vpop.permute.xlu0 %653 }
 0x3ad   :  { %v660_v11 = vmul.f32 %v3131_v62, %v654_v57  ;;  %v642_v20 = vmul.f32 %v3142_v5, %v3121_v54 }
 0x3b1   :  { %v645_v56 = vpop.permute.xlu1 %644 }
 0x3b2   :  { %v651_v13 = vmul.f32 %v3136_v63, %v645_v56 }
 0x3b4   :  { %v679_v28 = vadd.f32 %v651_v13, %v642_v20 }
 0x3b6   :  { %v663_v58 = vpop.permute.xlu1 %662 }
 0x3b7   :  { %v669_v2 = vmul.f32 %v3126_v59, %v663_v58 }
 0x3b9   :  { %v680_v22 = vadd.f32 %v669_v2, %v660_v11 }
 0x3bb   :  { %v681_v47 = vadd.f32 %v680_v22, %v679_v28  ;;  %v3194_v22 = vld [vmem:[%s4219_s1 + $0xd] ss:$0 sm:$0xff] }
 0x419   :  { %v177_v60 = vpop.permute.xlu1 %176  ;;  %v172_v61 = vpop.permute.xlu0 %171 }
 0x41a   :  { %v179_v7 = vmul.f32 %v3036_v39, %v177_v60  ;;  %v624_v8 = vmul.f32 %v3061_v45, %v177_v60  ;;  %v174_v9 = vmul.f32 %v3041_v41, %v172_v61  ;;  %v623_v10 = vmul.f32 %v3068_v48, %v172_v61 }
 0x41c   :  { %v195_v23 = vadd.f32 %v179_v7, %v174_v9  ;;  %v628_v24 = vadd.f32 %v624_v8, %v623_v10 }
 0x41e   :  { %v182_v14 = vpop.permute.xlu1 %181  ;;  %v187_v15 = vpop.permute.xlu0 %186 }
 0x41f   :  { %v184_v16 = vmul.f32 %v3046_v42, %v182_v14  ;;  %v625_v17 = vmul.f32 %v3073_v49, %v182_v14  ;;  %v189_v18 = vmul.f32 %v3051_v43, %v187_v15  ;;  %v626_v19 = vmul.f32 %v3056_v44, %v187_v15  ;;  %v3171_v14 = vld [vmem:[%s4219_s1 + $0xc] ss:$0 sm:$0xff]  ;;  %v3176_v15 = vld [vmem:[%s4219_s1 + $0xb] ss:$0 sm:$0xff] }
 0x421   :  { %v196_v25 = vadd.f32 %v189_v18, %v184_v16  ;;  %v629_v26 = vadd.f32 %v626_v19, %v625_v17  ;;  %v3181_v16 = vld [vmem:[%s4219_s1 + $0xa] ss:$0 sm:$0xff]  ;;  %v1193_v17 = vmul.f32 %v3171_v14, %v663_v58  ;;  %v3187_v18 = vld [vmem:[%s4219_s1 + $0x9] ss:$0 sm:$0xff]  ;;  %v1188_v19 = vmul.f32 %v3176_v15, %v654_v57 }
 0x422   :  { %4286 = vst [vmem:[#allocation5_spill] sm:$0xff] %v3181_v16  ;;  %v1183_v20 = vmul.f32 %v3181_v16, %v645_v56  ;;  %v3202_v56 = vld [vmem:[%s4219_s1 + $0x29] ss:$0 sm:$0xff] }
 0x423   :  { %v192_v31 = vpop.permute.xlu1 %191  ;;  %v197_v32 = vadd.f32 %v196_v25, %v195_v23  ;;  %v630_v33 = vadd.f32 %v629_v26, %v628_v24  ;;  %v672_v37 = vpop.permute.xlu0 %671  ;;  %v1178_v23 = vmul.f32 %v3187_v18, %v3121_v54  ;;  %v1200_v24 = vadd.f32 %v1193_v17, %v1188_v19 }
 0x424   :  { %v194_v38 = vmul.f32 %v3082_v55, %v192_v31  ;;  %v627_v46 = vmul.f32 %v3090_v6, %v192_v31  ;;  %v678_v50 = vmul.f32 %v3159_v27, %v672_v37  ;;  %v1198_v26 = vmul.f32 %v3194_v22, %v672_v37 }
 0x425   :  { %v1199_v58 = vadd.f32 %v1183_v20, %v1178_v23 }
 0x426   :  { %v198_v51 = vadd.f32 %v197_v32, %v194_v38  ;;  %v631_v52 = vadd.f32 %v630_v33, %v627_v46  ;;  %v682_v53 = vadd.f32 %v681_v47, %v678_v50 }
 0x427   :  { %v1201_v31 = vadd.f32 %v1200_v24, %v1199_v58 }
 0x428   :  { %v200_v60 = vrot.slane %v198_v51, 6  ;;  %v632_v61 = vadd.f32 %v3097_v12, %v631_v52  ;;  %v684_v2 = vrot.slane %v682_v53, 6 }
 0x429   :  { %v1202_v33 = vadd.f32 %v1201_v31, %v1198_v26 }
 0x42a   :  { %v202_v7 = vadd.f32 %v200_v60, %v3017_v21  ;;  %v686_v8 = vadd.f32 %v684_v2, %v632_v61  ;;  %v211_v2 = vrot.slane %v3106_v40, 6 }
 0x42b   :  { %v1207_v38 = vadd.f32 %v3202_v56, %v1202_v33 }
 0x42c   :  { %2662 = vtanh.f32 %v202_v7  ;;  %v2410_v11 = vmul.f32 -1.442695, %v202_v7  ;;  %v2428_v13 = vmul.f32 -1.442695, %v686_v8 }
 0x42d   :  { %2664 = vtanh.f32 %v686_v8  ;;  %v2441_v53 = vmul.f32 -1.442695, %v1207_v38  ;;  %v697_v8 = vpop.permute.xlu0 %696 }
 0x42e   :  { %2666 = vpow2.f32 %v2410_v11 }
 0x42f   :  { %2668 = vpow2.f32 %v2428_v13 }
 0x436   :  { %v2663_v9 = vpop.eup %2662 }
 0x437   :  { %215 = vrot.lane.b32.xlu1 %v2663_v9, %s2970_s21  ;;  %v2665_v10 = vpop.eup %2664 }
 0x438   :  { %v2667_v25 = vpop.eup %2666 }
 0x439   :  { %v206_v28 = vadd.f32 1.0, %v2667_v25  ;;  %v2669_v32 = vpop.eup %2668 }
 0x43a   :  { %v690_v57 = vadd.f32 1.0, %v2669_v32 }
 0x43b   :  { %701 = vrot.lane.b32.xlu1 %v2665_v10, %s2970_s21  ;;  %2670 = vrcp.f32 %v206_v28 }
 0x43c   :  { %2672 = vrcp.f32 %v690_v57 }
 0x43d   :  { %2674 = vtanh.f32 %v1207_v38 }
 0x43e   :  { %2676 = vpow2.f32 %v2441_v53 }
 0x445   :  { %v2671_v54 = vpop.eup %2670 }
 0x446   :  { %v2673_v37 = vpop.eup %2672  ;;  %v213_v7 = vmul.f32 %v2671_v54, %v211_v2 }
 0x447   :  { %v2675_v52 = vpop.eup %2674  ;;  %v699_v11 = vmul.f32 %v2673_v37, %v697_v8 }
 0x448   :  { %v2677_v60 = vpop.eup %2676 }
 0x449   :  { %v1211_v61 = vadd.f32 1.0, %v2677_v60  ;;  %v3251_v60 = vld [vmem:[%s4219_s1 + $0x20] ss:$0 sm:$0xff] }
 0x44a   :  { %4288 = vst [vmem:[#allocation7_spill] sm:$0xff] %v3251_v60 }
 0x44b   :  { %2678 = vrcp.f32 %v1211_v61 }
 0x455   :  { %v2679_v13 = vpop.eup %2678 }
 0x4a9   :  { %v216_v46 = vpop.permute.xlu1 %215 }
 0x4aa   :  { %v218_v47 = vmul.f32 %v2671_v54, %v216_v46 }
 0x4ac   :  { %220 = vrot.lane.b32.xlu1 %v218_v47, %s2977_s17 }
 0x4ad   :  { %v702_v50 = vpop.permute.xlu1 %701 }
 0x4ae   :  { %v704_v51 = vmul.f32 %v2673_v37, %v702_v50 }
 0x4b0   :  { %1216 = vrot.lane.b32.xlu1 %v2675_v52, %s2970_s21  ;;  %706 = vrot.lane.b32.xlu0 %v704_v51, %s2977_s17  ;;  %v3246_v52 = vld [vmem:[%s4219_s1 + $0x1f] ss:$0 sm:$0xff] }
 0x4b1   :  { %4287 = vst [vmem:[#allocation6_spill] sm:$0xff] %v3246_v52 }
 0x51e   :  { %v221_v9 = vpop.permute.xlu1 %220 }
 0x51f   :  { %v3209_v10 = vadd.f32 %v221_v9, %v213_v7 }
 0x521   :  { %2680 = vtanh.f32 %v3209_v10 }
 0x522   :  { %v1217_v17 = vpop.permute.xlu1 %1216  ;;  %v707_v19 = vpop.permute.xlu0 %706 }
 0x523   :  { %v3212_v20 = vmul.f32 %v2679_v13, %v1217_v17  ;;  %v3214_v23 = vadd.f32 %v707_v19, %v699_v11 }
 0x525   :  { %2682 = vtanh.f32 %v3212_v20 }
 0x526   :  { %2684 = vtanh.f32 %v3214_v23 }
 0x52b   :  { %v2681_v40 = vpop.eup %2680 }
 0x52c   :  { %226 = vrot.lane.b32.xlu0 %v2681_v40, %s2977_s17 }
 0x52f   :  { %v2683_v24 = vpop.eup %2682 }
 0x530   :  { %v2685_v25 = vpop.eup %2684  ;;  %1222 = vrot.lane.b32.xlu0 %v2683_v24, %s2973_s22 }
 0x531   :  { %712 = vrot.lane.b32.xlu1 %v2685_v25, %s2977_s17 }
 0x59e   :  { %v227_v58 = vpop.permute.xlu0 %226 }
 0x59f   :  { %v229_v31 = vmul.f32 %v2671_v54, %v227_v58 }
 0x5a2   :  { %v1223_v26 = vpop.permute.xlu0 %1222 }
 0x5a3   :  { %v1225_v28 = vmul.f32 %v2679_v13, %v1223_v26  ;;  %v713_v32 = vpop.permute.xlu1 %712  ;;  %v3262_v13 = vld [vmem:[%s4219_s1 + $0x1e] ss:$0 sm:$0xff] }
 0x5a4   :  { %v715_v33 = vmul.f32 %v2673_v37, %v713_v32  ;;  %4289 = vst [vmem:[#allocation8_spill] sm:$0xff] %v3262_v13  ;;  %v3276_v32 = vld [vmem:[%s4219_s1 + $0x1d] ss:$0 sm:$0xff] }
 0x5a5   :  { %1256 = vperm.xlu0 %2509, %v1225_v28   ;;  %1238 = vperm.xlu1 %2507, %v1225_v28  }
 0x5a9   :  { %2512 = vset.pattern.permute.xlu0 %v4231_v30  ;;  %2508 = vset.pattern.permute.xlu1 %v4231_v30 }
 0x5aa   :  { %237 = vperm.xlu0 %2512, %v229_v31   ;;  %1247 = vperm.xlu1 %2508, %v1225_v28  }
 0x5ae   :  { %2515 = vset.pattern.permute.xlu0 %v4227_v29  ;;  %2510 = vset.pattern.permute.xlu1 %v4225_v36 }
 0x5af   :  { %728 = vperm.xlu0 %2515, %v715_v33   ;;  %1265 = vperm.xlu1 %2510, %v1225_v28  }
 0x5b3   :  { %2518 = vset.pattern.permute.xlu0 %v4225_v36  ;;  %2511 = vset.pattern.permute.xlu1 %v4227_v29 }
 0x5b4   :  { %743 = vperm.xlu0 %2518, %v715_v33   ;;  %232 = vperm.xlu1 %2511, %v229_v31  }
 0x5b8   :  { %2520 = vset.pattern.permute.xlu0 %v4221_v34  ;;  %2513 = vset.pattern.permute.xlu1 %v4229_v35 }
 0x5b9   :  { %748 = vperm.xlu0 %2520, %v715_v33   ;;  %242 = vperm.xlu1 %2513, %v229_v31  }
 0x5bd   :  { %2514 = vset.pattern.permute.xlu1 %v4225_v36  ;;  %2524 = vset.pattern.permute.xlu0 %v2967_v1 }
 0x5be   :  { %247 = vperm.xlu1 %2514, %v229_v31  }
 0x5c2   :  { %2516 = vset.pattern.permute.xlu1 %v4231_v30 }
 0x5c3   :  { %733 = vperm.xlu1 %2516, %v715_v33  }
 0x5c7   :  { %2517 = vset.pattern.permute.xlu1 %v4229_v35 }
 0x5c8   :  { %738 = vperm.xlu1 %2517, %v715_v33  }
 0x5cc   :  { %2519 = vset.pattern.permute.xlu1 %v4221_v34 }
 0x5cd   :  { %252 = vperm.xlu1 %2519, %v229_v31  }
 0x5d1   :  { %1274 = vperm.xlu1 %2519, %v1225_v28  }
 0x5d5   :  { %2521 = vset.pattern.permute.xlu1 %v4227_v29 }
 0x624   :  { %v3235_v57 = vpop.permute.xlu1 %1238  ;;  %v3241_v1 = vpop.permute.xlu0 %1256 }
 0x625   :  { %v1263_v7 = vmul.f32 %v3246_v52, %v3241_v1 }
 0x629   :  { %v3237_v38 = vpop.permute.xlu1 %1247  ;;  %v238_v47 = vpop.permute.xlu0 %237 }
 0x62a   :  { %v240_v8 = vmul.f32 %v3036_v39, %v238_v47  ;;  %v717_v4 = vmul.f32 %v3061_v45, %v238_v47 }
 0x62e   :  { %v3239_v54 = vpop.permute.xlu1 %1265  ;;  %v729_v50 = vpop.permute.xlu0 %728 }
 0x62f   :  { %v731_v9 = vmul.f32 %v3142_v5, %v729_v50  ;;  %v1272_v17 = vmul.f32 %v3251_v60, %v3239_v54 }
 0x633   :  { %v233_v46 = vpop.permute.xlu1 %232  ;;  %v744_v61 = vpop.permute.xlu0 %743 }
 0x634   :  { %v235_v19 = vmul.f32 %v3041_v41, %v233_v46  ;;  %v746_v25 = vmul.f32 %v3126_v59, %v744_v61  ;;  %v716_v58 = vmul.f32 %v3068_v48, %v233_v46  ;;  %v1229_v33 = vmul.f32 %v3171_v14, %v744_v61 }
 0x635   :  { %v1254_v46 = vmul.f32 %v3262_v13, %v3237_v38  ;;  %v1245_v61 = vmul.f32 %v3276_v32, %v3235_v57 }
 0x636   :  { %v256_v29 = vadd.f32 %v240_v8, %v235_v19 }
 0x638   :  { %v243_v37 = vpop.permute.xlu1 %242 }
 0x639   :  { %v245_v40 = vmul.f32 %v3046_v42, %v243_v37  ;;  %v718_v26 = vmul.f32 %v3073_v49, %v243_v37  ;;  %v1226_v37 = vmul.f32 %v3187_v18, %v729_v50 }
 0x63d   :  { %v248_v51 = vpop.permute.xlu1 %247 }
 0x63e   :  { %v250_v2 = vmul.f32 %v3051_v43, %v248_v51  ;;  %v719_v11 = vmul.f32 %v3056_v44, %v248_v51 }
 0x640   :  { %v257_v51 = vadd.f32 %v250_v2, %v245_v40  ;;  %v722_v36 = vadd.f32 %v719_v11, %v718_v26  ;;  %v721_v2 = vadd.f32 %v717_v4, %v716_v58 }
 0x642   :  { %v734_v53 = vpop.permute.xlu1 %733  ;;  %v723_v60 = vadd.f32 %v722_v36, %v721_v2  ;;  %v3334_v2 = vld [vmem:[%s4219_s1 + $0x12] ss:$0 sm:$0xff] }
 0x643   :  { %v736_v24 = vmul.f32 %v3136_v63, %v734_v53  ;;  %v1227_v28 = vmul.f32 %v3181_v16, %v734_v53  ;;  %v749_v53 = vpop.permute.xlu0 %748  ;;  %v1283_v16 = vadd.f32 %v1272_v17, %v1263_v7  ;;  %v258_v63 = vadd.f32 %v257_v51, %v256_v29  ;;  %v3313_v51 = vld [vmem:[%s4219_s1 + $0x10] ss:$0 sm:$0xff] }
 0x644   :  { %v1230_v4 = vmul.f32 %v3194_v22, %v749_v53  ;;  %4290 = vst [vmem:[#allocation9_spill] sm:$0xff] %v3313_v51 }
 0x645   :  { %v752_v35 = vadd.f32 %v736_v24, %v731_v9  ;;  %v1231_v40 = vadd.f32 %v1227_v28, %v1226_v37  ;;  %v1282_v9 = vadd.f32 %v1254_v46, %v1245_v61  ;;  %v3325_v37 = vld [vmem:[%s4219_s1 + $0xe] ss:$0 sm:$0xff] }
 0x647   :  { %v739_v31 = vpop.permute.xlu1 %738  ;;  %v1284_v29 = vadd.f32 %v1283_v16, %v1282_v9 }
 0x648   :  { %v741_v34 = vmul.f32 %v3131_v62, %v739_v31  ;;  %v1228_v0 = vmul.f32 %v3176_v15, %v739_v31  ;;  %v751_v31 = vmul.f32 %v3159_v27, %v749_v53  ;;  %v1791_v53 = vmul.f32 %v3313_v51, %v3241_v1 }
 0x64a   :  { %v753_v30 = vadd.f32 %v746_v25, %v741_v34  ;;  %v1232_v3 = vadd.f32 %v1229_v33, %v1228_v0  ;;  %v3293_v0 = vld [vmem:[%s4219_s1 + $0x21] ss:$0 sm:$0xff]  ;;  %v3308_v33 = vld [vmem:[%s4219_s1 + $0x11] ss:$0 sm:$0xff] }
 0x64b   :  { %v1796_v46 = vmul.f32 %v3308_v33, %v3239_v54  ;;  %v1781_v54 = vmul.f32 %v3325_v37, %v3235_v57 }
 0x64c   :  { %v754_v47 = vadd.f32 %v753_v30, %v752_v35  ;;  %v253_v49 = vpop.permute.xlu1 %252  ;;  %v1233_v48 = vadd.f32 %v1232_v3, %v1231_v40 }
 0x64d   :  { %v255_v50 = vmul.f32 %v3082_v55, %v253_v49  ;;  %v720_v8 = vmul.f32 %v3090_v6, %v253_v49 }
 0x64e   :  { %v755_v34 = vadd.f32 %v754_v47, %v751_v31  ;;  %v1234_v3 = vadd.f32 %v1233_v48, %v1230_v4  ;;  %v1803_v31 = vadd.f32 %v1796_v46, %v1791_v53 }
 0x64f   :  { %v259_v7 = vadd.f32 %v258_v63, %v255_v50  ;;  %v724_v11 = vadd.f32 %v723_v60, %v720_v8 }
 0x650   :  { %v757_v30 = vrot.slane %v755_v34, 6  ;;  %v1275_v35 = vpop.permute.xlu1 %1274  ;;  %v1235_v25 = vadd.f32 %v3202_v56, %v1234_v3 }
 0x651   :  { %v261_v36 = vrot.slane %v259_v7, 6  ;;  %v725_v55 = vadd.f32 %v3097_v12, %v724_v11  ;;  %v1281_v49 = vmul.f32 %v3293_v0, %v1275_v35  ;;  %v1298_v12 = vrot.slane %v3212_v20, 6  ;;  %v3318_v20 = vld [vmem:[%s4219_s1 + $0xf] ss:$0 sm:$0xff] }
 0x652   :  { %v1786_v61 = vmul.f32 %v3318_v20, %v3237_v38  ;;  %v1801_v8 = vmul.f32 %v3334_v2, %v1275_v35  ;;  %v3342_v38 = vld [vmem:[%s4219_s1 + $0x2a] ss:$0 sm:$0xff] }
 0x653   :  { %v263_v17 = vadd.f32 %v261_v36, %v3017_v21  ;;  %v759_v19 = vadd.f32 %v757_v30, %v725_v55  ;;  %v1285_v24 = vadd.f32 %v1284_v29, %v1281_v49 }
 0x654   :  { %v1802_v50 = vadd.f32 %v1786_v61, %v1781_v54 }
 0x655   :  { %2686 = vtanh.f32 %v263_v17  ;;  %v1287_v58 = vrot.slane %v1285_v24, 6  ;;  %v2411_v21 = vmul.f32 -1.442695, %v263_v17  ;;  %v2429_v26 = vmul.f32 -1.442695, %v759_v19 }
 0x656   :  { %2688 = vtanh.f32 %v759_v19  ;;  %v1804_v4 = vadd.f32 %v1803_v31, %v1802_v50 }
 0x657   :  { %v1289_v63 = vadd.f32 %v1287_v58, %v1235_v25 }
 0x658   :  { %v1805_v7 = vadd.f32 %v1804_v4, %v1801_v8  ;;  %v4292_v4 = vmov 11  }
 0x659   :  { %2690 = vtanh.f32 %v1289_v63  ;;  %v2447_v28 = vmul.f32 -1.442695, %v1289_v63 }
 0x65a   :  { %2692 = vpow2.f32 %v2411_v21  ;;  %v1810_v57 = vadd.f32 %v3342_v38, %v1805_v7 }
 0x65b   :  { %2694 = vpow2.f32 %v2429_v26 }
 0x65c   :  { %2696 = vpow2.f32 %v2447_v28  ;;  %v2460_v25 = vmul.f32 -1.442695, %v1810_v57 }
 0x65f   :  { %v2687_v60 = vpop.eup %2686 }
 0x660   :  { %v2689_v16 = vpop.eup %2688  ;;  %276 = vrot.lane.b32.xlu1 %v2687_v60, %s2970_s21  ;;  %v272_v60 = vrot.slane %v3209_v10, 6 }
 0x661   :  { %772 = vrot.lane.b32.xlu0 %v2689_v16, %s2970_s21 }
 0x663   :  { %v2691_v48 = vpop.eup %2690 }
 0x664   :  { %1304 = vrot.lane.b32.xlu1 %v2691_v48, %s2970_s21  ;;  %v2693_v40 = vpop.eup %2692  ;;  %v768_v48 = vrot.slane %v3214_v23, 6 }
 0x665   :  { %1299 = vrot.lane.b32.xlu0 %v1298_v12, %s2977_s17  ;;  %v2695_v47 = vpop.eup %2694  ;;  %v267_v9 = vadd.f32 1.0, %v2693_v40 }
 0x666   :  { %v2697_v34 = vpop.eup %2696  ;;  %v763_v1 = vadd.f32 1.0, %v2695_v47 }
 0x667   :  { %2698 = vrcp.f32 %v267_v9  ;;  %v1293_v11 = vadd.f32 1.0, %v2697_v34  ;;  %v12_v34 = vld [vmem:[%s4218_s0 + $0x8] sm:$0xff] }
 0x668   :  { %2700 = vrcp.f32 %v763_v1  ;;  %v4291_v1 = vmov 3  }
 0x669   :  { %2702 = vrcp.f32 %v1293_v11 }
 0x66a   :  { %2704 = vtanh.f32 %v1810_v57 }
 0x66b   :  { %2706 = vpow2.f32 %v2460_v25  ;;  %v4296_v25 = vmov 1  }
 0x671   :  { %v2699_v30 = vpop.eup %2698 }
 0x672   :  { %v2701_v35 = vpop.eup %2700  ;;  %v274_v12 = vmul.f32 %v2699_v30, %v272_v60 }
 0x673   :  { %v3346_v49 = vpop.eup %2702  ;;  %v770_v21 = vmul.f32 %v2701_v35, %v768_v48 }
 0x674   :  { %v2705_v24 = vpop.eup %2704 }
 0x675   :  { %v2707_v58 = vpop.eup %2706 }
 0x676   :  { %v1814_v63 = vadd.f32 1.0, %v2707_v58  ;;  %v4297_v58 = vmov 2  }
 0x678   :  { %2708 = vrcp.f32 %v1814_v63 }
 0x682   :  { %v2709_v54 = vpop.eup %2708 }
 0x6d2   :  { %v277_v29 = vpop.permute.xlu1 %276 }
 0x6d3   :  { %v773_v3 = vpop.permute.xlu0 %772  ;;  %v279_v36 = vmul.f32 %v2699_v30, %v277_v29 }
 0x6d4   :  { %v775_v55 = vmul.f32 %v2701_v35, %v773_v3 }
 0x6d5   :  { %281 = vrot.lane.b32.xlu1 %v279_v36, %s2977_s17  ;;  %v4293_v36 = vmov 12  }
 0x6d6   :  { %777 = vrot.lane.b32.xlu0 %v775_v55, %s2977_s17  ;;  %v1305_v17 = vpop.permute.xlu1 %1304 }
 0x6d7   :  { %v1307_v19 = vmul.f32 %v3346_v49, %v1305_v17  ;;  %v1300_v16 = vpop.permute.xlu0 %1299  ;;  %v4294_v17 = vmov 10  }
 0x6d8   :  { %v1302_v61 = vmul.f32 %v3346_v49, %v1300_v16 }
 0x6d9   :  { %1309 = vrot.lane.b32.xlu1 %v1307_v19, %s2977_s17  ;;  %v4295_v19 = vmov 13  }
 0x6da   :  { %1819 = vrot.lane.b32.xlu0 %v2705_v24, %s2970_s21 }
 0x747   :  { %v282_v26 = vpop.permute.xlu1 %281 }
 0x748   :  { %v778_v28 = vpop.permute.xlu0 %777  ;;  %v3354_v46 = vadd.f32 %v282_v26, %v274_v12 }
 0x749   :  { %v3356_v53 = vadd.f32 %v778_v28, %v770_v21 }
 0x74a   :  { %2710 = vtanh.f32 %v3354_v46 }
 0x74b   :  { %2712 = vtanh.f32 %v3356_v53  ;;  %v1310_v40 = vpop.permute.xlu1 %1309 }
 0x74c   :  { %v1820_v10 = vpop.permute.xlu0 %1819  ;;  %v3361_v31 = vadd.f32 %v1310_v40, %v1302_v61 }
 0x74d   :  { %v3363_v23 = vmul.f32 %v2709_v54, %v1820_v10 }
 0x74e   :  { %2714 = vtanh.f32 %v3361_v31 }
 0x74f   :  { %2716 = vtanh.f32 %v3363_v23 }
 0x754   :  { %v2711_v47 = vpop.eup %2710 }
 0x755   :  { %v2713_v50 = vpop.eup %2712  ;;  %287 = vrot.lane.b32.xlu1 %v2711_v47, %s2977_s17 }
 0x756   :  { %783 = vrot.lane.b32.xlu0 %v2713_v50, %s2977_s17 }
 0x758   :  { %v2715_v8 = vpop.eup %2714 }
 0x759   :  { %v2717_v9 = vpop.eup %2716  ;;  %1315 = vrot.lane.b32.xlu1 %v2715_v8, %s2977_s17 }
 0x75a   :  { %1825 = vrot.lane.b32.xlu0 %v2717_v9, %s2973_s22 }
 0x75e   :  { %293 = vperm.xlu0 %2524, %v12_v34  }
 0x762   :  { %2527 = vset.pattern.permute.xlu0 %v4291_v1  ;;  %v3408_v1 = vld [vmem:[%s4219_s1 + $0x22] ss:$0 sm:$0xff] }
 0x763   :  { %308 = vperm.xlu0 %2527, %v12_v34   ;;  %4300 = vst [vmem:[#allocation11_spill] sm:$0xff] %v3408_v1 }
 0x767   :  { %2528 = vset.pattern.permute.xlu0 %v4292_v4 }
 0x7c7   :  { %v288_v29 = vpop.permute.xlu1 %287 }
 0x7c8   :  { %v784_v7 = vpop.permute.xlu0 %783  ;;  %v290_v3 = vmul.f32 %v2699_v30, %v288_v29  ;;  %v2895_v29 = vld [vmem:[%s4219_s1 + $0x1] ss:$0 sm:$0xff] }
 0x7c9   :  { %v786_v55 = vmul.f32 %v2701_v35, %v784_v7  ;;  %v4298_v35 = vmov 14   ;;  %v2894_v7 = vld [vmem:[%s4219_s1] ss:$0 sm:$0xff] }
 0x7cb   :  { %v1316_v24 = vpop.permute.xlu1 %1315 }
 0x7cc   :  { %v1826_v11 = vpop.permute.xlu0 %1825  ;;  %v1318_v30 = vmul.f32 %v3346_v49, %v1316_v24 }
 0x7cd   :  { %v1828_v57 = vmul.f32 %v2709_v54, %v1826_v11 }
 0x7cf   :  { %1850 = vperm.xlu0 %2528, %v1828_v57   ;;  %1841 = vperm.xlu1 %2521, %v1828_v57  }
 0x7d3   :  { %2522 = vset.pattern.permute.xlu1 %v4293_v36  ;;  %323 = vperm.xlu0 %2528, %v290_v3  }
 0x7d4   :  { %1859 = vperm.xlu1 %2522, %v1828_v57  }
 0x7d7   :  { %2532 = vset.pattern.permute.xlu0 %v4294_v17 }
 0x7d8   :  { %2523 = vset.pattern.permute.xlu1 %v4295_v19  ;;  %799 = vperm.xlu0 %2532, %v786_v55  }
 0x7d9   :  { %1868 = vperm.xlu1 %2523, %v1828_v57  }
 0x7dc   :  { %2535 = vset.pattern.permute.xlu0 %v4295_v19 }
 0x7dd   :  { %2525 = vset.pattern.permute.xlu1 %v4296_v25  ;;  %814 = vperm.xlu0 %2535, %v786_v55   ;;  %v294_v48 = vpop.permute.xlu0 %293  ;;  %v2896_v25 = vld [vmem:[%s4219_s1 + $0x3] ss:$0 sm:$0xff] }
 0x7de   :  { %298 = vperm.xlu1 %2525, %v12_v34   ;;  %v296_v11 = vmul.f32 %v2894_v7, %v294_v48  ;;  %v2897_v7 = vld [vmem:[%s4219_s1 + $0x2] ss:$0 sm:$0xff] }
 0x7e1   :  { %2538 = vset.pattern.permute.xlu0 %v4293_v36 }
 0x7e2   :  { %2526 = vset.pattern.permute.xlu1 %v4297_v58  ;;  %1341 = vperm.xlu0 %2538, %v1318_v30   ;;  %v309_v21 = vpop.permute.xlu0 %308 }
 0x7e3   :  { %303 = vperm.xlu1 %2526, %v12_v34   ;;  %v3403_v34 = vld [vmem:[%s4219_s1 + $0x23] ss:$0 sm:$0xff] }
 0x7e4   :  { %4299 = vst [vmem:[#allocation10_spill] sm:$0xff] %v3403_v34 }
 0x7e6   :  { %2541 = vset.pattern.permute.xlu0 %v4298_v35 }
 0x7e7   :  { %2529 = vset.pattern.permute.xlu1 %v4294_v17  ;;  %1351 = vperm.xlu0 %2541, %v1318_v30  }
 0x7e8   :  { %318 = vperm.xlu1 %2529, %v290_v3  }
 0x7eb   :  { %2542 = vset.pattern.permute.xlu0 %v4294_v17 }
 0x7ec   :  { %2530 = vset.pattern.permute.xlu1 %v4293_v36 }
 0x7ed   :  { %328 = vperm.xlu1 %2530, %v290_v3  }
 0x7f1   :  { %2531 = vset.pattern.permute.xlu1 %v4295_v19 }
 0x7f2   :  { %333 = vperm.xlu1 %2531, %v290_v3  }
 0x7f6   :  { %2533 = vset.pattern.permute.xlu1 %v4292_v4 }
 0x7f7   :  { %804 = vperm.xlu1 %2533, %v786_v55  }
 0x7fb   :  { %2534 = vset.pattern.permute.xlu1 %v4293_v36 }
 0x7fc   :  { %809 = vperm.xlu1 %2534, %v786_v55  }
 0x800   :  { %2536 = vset.pattern.permute.xlu1 %v4294_v17 }
 0x801   :  { %1331 = vperm.xlu1 %2536, %v1318_v30  }
 0x805   :  { %2537 = vset.pattern.permute.xlu1 %v4292_v4 }
 0x806   :  { %1336 = vperm.xlu1 %2537, %v1318_v30  }
 0x80a   :  { %2539 = vset.pattern.permute.xlu1 %v4295_v19 }
 0x80b   :  { %1346 = vperm.xlu1 %2539, %v1318_v30   ;;  %v311_v30 = vmul.f32 %v2896_v25, %v309_v21 }
 0x80f   :  { %2540 = vset.pattern.permute.xlu1 %v4298_v35 }
 0x810   :  { %338 = vperm.xlu1 %2540, %v290_v3  }
 0x814   :  { %819 = vperm.xlu1 %2540, %v786_v55  }
 0x818   :  { %1877 = vperm.xlu1 %2540, %v1828_v57   ;;  %v3416_v57 = vld [vmem:[%s4219_s1 + $0x25] ss:$0 sm:$0xff] }
 0x819   :  { %4301 = vst [vmem:[#allocation12_spill] sm:$0xff] %v3416_v57 }
 0x81c   :  { %2543 = vset.pattern.permute.xlu1 %v4292_v4 }
 0x84e   :  { %v1842_v49 = vpop.permute.xlu1 %1841  ;;  %v1851_v61 = vpop.permute.xlu0 %1850 }
 0x84f   :  { %v3425_v58 = vmul.f32 %v3403_v34, %v1851_v61  ;;  %v3428_v48 = vmul.f32 %v3408_v1, %v1842_v49 }
 0x852   :  { %v324_v54 = vpop.permute.xlu0 %323 }
 0x853   :  { %v3396_v63 = vpop.permute.xlu1 %1859 }
 0x857   :  { %v800_v47 = vpop.permute.xlu0 %799 }
 0x858   :  { %v1869_v60 = vpop.permute.xlu1 %1868  ;;  %v802_v4 = vmul.f32 %v3142_v5, %v800_v47  ;;  %v1319_v17 = vmul.f32 %v3187_v18, %v800_v47 }
 0x859   :  { %v1875_v21 = vmul.f32 %v3416_v57, %v1869_v60  ;;  %v4306_v57 = vld [vmem:[#allocation5_spill] sm:$0xff] }
 0x85c   :  { %v815_v8 = vpop.permute.xlu0 %814 }
 0x85d   :  { %v299_v16 = vpop.permute.xlu1 %298  ;;  %v817_v61 = vmul.f32 %v3126_v59, %v815_v8  ;;  %v1322_v49 = vmul.f32 %v3171_v14, %v815_v8  ;;  %v4302_v8 = vld [vmem:[#allocation7_spill] sm:$0xff] }
 0x85e   :  { %v301_v3 = vmul.f32 %v2895_v29, %v299_v16  ;;  %v326_v16 = vmul.f32 %v3036_v39, %v324_v54  ;;  %v788_v29 = vmul.f32 %v3061_v45, %v324_v54 }
 0x860   :  { %v312_v1 = vadd.f32 %v301_v3, %v296_v11  ;;  %v4303_v3 = vld [vmem:[#allocation2_spill] sm:$0xff] }
 0x861   :  { %v1342_v55 = vpop.permute.xlu0 %1341 }
 0x862   :  { %v304_v12 = vpop.permute.xlu1 %303  ;;  %v1344_v34 = vmul.f32 %v3246_v52, %v1342_v55 }
 0x863   :  { %v306_v35 = vmul.f32 %v2897_v7, %v304_v12  ;;  %v1831_v12 = vmul.f32 %v3313_v51, %v1342_v55  ;;  %v4305_v7 = vld [vmem:[#allocation4_spill] sm:$0xff] }
 0x865   :  { %v313_v45 = vadd.f32 %v311_v30, %v306_v35  ;;  %v4304_v35 = vld [vmem:[#allocation3_spill] sm:$0xff] }
 0x866   :  { %v1352_v59 = vpop.permute.xlu0 %1351 }
 0x867   :  { %v319_v26 = vpop.permute.xlu1 %318 }
 0x868   :  { %v321_v5 = vmul.f32 %v3041_v41, %v319_v26  ;;  %v787_v55 = vmul.f32 %v4303_v3, %v319_v26  ;;  %v3461_v26 = vld [vmem:[%s4219_s1 + $0x24] ss:$0 sm:$0xff] }
 0x86c   :  { %v329_v28 = vpop.permute.xlu1 %328 }
 0x86d   :  { %v331_v18 = vmul.f32 %v3046_v42, %v329_v28  ;;  %v789_v30 = vmul.f32 %v4304_v35, %v329_v28 }
 0x871   :  { %v334_v40 = vpop.permute.xlu1 %333 }
 0x872   :  { %v336_v25 = vmul.f32 %v3051_v43, %v334_v40  ;;  %v790_v60 = vmul.f32 %v3056_v44, %v334_v40 }
 0x874   :  { %v343_v41 = vadd.f32 %v336_v25, %v331_v18  ;;  %v793_v52 = vadd.f32 %v790_v60, %v789_v30 }
 0x876   :  { %v805_v10 = vpop.permute.xlu1 %804 }
 0x877   :  { %v807_v42 = vmul.f32 %v4305_v7, %v805_v10  ;;  %v1320_v44 = vmul.f32 %v4306_v57, %v805_v10  ;;  %v792_v57 = vadd.f32 %v788_v29, %v787_v55  ;;  %v1833_v7 = vmul.f32 %v3334_v2, %v1352_v59 }
 0x879   :  { %v794_v60 = vadd.f32 %v793_v52, %v792_v57  ;;  %v3486_v52 = vld [vmem:[%s4219_s1 + $0x26] ss:$0 sm:$0xff] }
 0x87b   :  { %v810_v50 = vpop.permute.xlu1 %809 }
 0x87c   :  { %v812_v14 = vmul.f32 %v3131_v62, %v810_v50  ;;  %v1321_v43 = vmul.f32 %v3176_v15, %v810_v50  ;;  %v1354_v15 = vmul.f32 %v3293_v0, %v1352_v59  ;;  %v342_v50 = vadd.f32 %v326_v16, %v321_v5 }
 0x87d   :  { %v1324_v5 = vadd.f32 %v1320_v44, %v1319_v17 }
 0x87e   :  { %v824_v28 = vadd.f32 %v817_v61, %v812_v14  ;;  %v1325_v25 = vadd.f32 %v1322_v49, %v1321_v43 }
 0x880   :  { %v3398_v9 = vpop.permute.xlu1 %1331 }
 0x881   :  { %v1334_v47 = vmul.f32 %v3276_v32, %v3398_v9  ;;  %v1829_v61 = vmul.f32 %v3325_v37, %v3398_v9 }
 0x885   :  { %v1337_v24 = vpop.permute.xlu1 %1336 }
 0x886   :  { %v1339_v39 = vmul.f32 %v3262_v13, %v1337_v24  ;;  %v314_v13 = vadd.f32 %v313_v45, %v312_v1  ;;  %v1830_v18 = vmul.f32 %v3318_v20, %v1337_v24  ;;  %v3467_v1 = vld [vmem:[%s4219_s1 + $0x17] ss:$0 sm:$0xff]  ;;  %v823_v45 = vadd.f32 %v807_v42, %v802_v4  ;;  %v2899_v24 = vld [vmem:[%s4219_s1 + $0x27] ss:$0 sm:$0xff] }
 0x887   :  { %v1326_v4 = vadd.f32 %v1325_v25, %v1324_v5 }
 0x888   :  { %v1355_v40 = vadd.f32 %v1339_v39, %v1334_v47  ;;  %v3478_v29 = vadd.f32 %v2899_v24, %v314_v13  ;;  %v1834_v14 = vadd.f32 %v1830_v18, %v1829_v61 }
 0x88a   :  { %v1347_v54 = vpop.permute.xlu1 %1346 }
 0x88b   :  { %v1349_v11 = vmul.f32 %v4302_v8, %v1347_v54  ;;  %v1832_v62 = vmul.f32 %v3308_v33, %v1347_v54 }
 0x88d   :  { %v1356_v51 = vadd.f32 %v1349_v11, %v1344_v34  ;;  %v344_v34 = vadd.f32 %v343_v41, %v342_v50  ;;  %v1835_v49 = vadd.f32 %v1832_v62, %v1831_v12  ;;  %v1885_v41 = vadd.f32 %v3425_v58, %v3428_v48 }
 0x88f   :  { %v1357_v3 = vadd.f32 %v1356_v51, %v1355_v40  ;;  %v339_v10 = vpop.permute.xlu1 %338  ;;  %v1866_v51 = vmul.f32 %v3461_v26, %v3396_v63  ;;  %v1836_v55 = vadd.f32 %v1835_v49, %v1834_v14 }
 0x890   :  { %v341_v16 = vmul.f32 %v3467_v1, %v339_v10  ;;  %v791_v39 = vmul.f32 %v3090_v6, %v339_v10  ;;  %v825_v6 = vadd.f32 %v824_v28, %v823_v45 }
 0x891   :  { %v1358_v43 = vadd.f32 %v1357_v3, %v1354_v15  ;;  %v1886_v63 = vadd.f32 %v1875_v21, %v1866_v51  ;;  %v1837_v62 = vadd.f32 %v1836_v55, %v1833_v7 }
 0x892   :  { %v345_v54 = vadd.f32 %v344_v34, %v341_v16  ;;  %v795_v11 = vadd.f32 %v794_v60, %v791_v39 }
 0x893   :  { %v820_v17 = vpop.permute.xlu1 %819  ;;  %v1360_v42 = vrot.slane %v1358_v43, 6  ;;  %v1887_v15 = vadd.f32 %v1886_v63, %v1885_v41  ;;  %v1838_v28 = vadd.f32 %v3342_v38, %v1837_v62 }
 0x894   :  { %v347_v47 = vrot.slane %v345_v54, 6  ;;  %v822_v9 = vmul.f32 %v3159_v27, %v820_v17  ;;  %v1323_v12 = vmul.f32 %v3194_v22, %v820_v17  ;;  %v3494_v22 = vld [vmem:[%s4219_s1 + $0x28] ss:$0 sm:$0xff] }
 0x895   :  { %v796_v21 = vadd.f32 %v3494_v22, %v795_v11 }
 0x896   :  { %v349_v35 = vadd.f32 %v347_v47, %v3478_v29  ;;  %v826_v30 = vadd.f32 %v825_v6, %v822_v9  ;;  %v1327_v13 = vadd.f32 %v1326_v4, %v1323_v12 }
 0x897   :  { %v1878_v27 = vpop.permute.xlu1 %1877 }
 0x898   :  { %2718 = vtanh.f32 %v349_v35  ;;  %v828_v44 = vrot.slane %v826_v30, 6  ;;  %v1328_v40 = vadd.f32 %v3202_v56, %v1327_v13  ;;  %v1884_v50 = vmul.f32 %v3486_v52, %v1878_v27 }
 0x899   :  { %v1901_v56 = vrot.slane %v3363_v23, 6  ;;  %v2412_v16 = vmul.f32 -1.442695, %v349_v35  ;;  %v358_v13 = vrot.slane %v3354_v46, 6  ;;  %v839_v27 = vrot.slane %v3356_v53, 6 }
 0x89a   :  { %v830_v58 = vadd.f32 %v828_v44, %v796_v21  ;;  %v1362_v48 = vadd.f32 %v1360_v42, %v1328_v40  ;;  %v1888_v59 = vadd.f32 %v1887_v15, %v1884_v50  ;;  %v1371_v44 = vrot.slane %v3361_v31, 6 }
 0x89c   :  { %2720 = vtanh.f32 %v830_v58  ;;  %v1890_v25 = vrot.slane %v1888_v59, 6  ;;  %v2430_v39 = vmul.f32 -1.442695, %v830_v58  ;;  %v2448_v45 = vmul.f32 -1.442695, %v1362_v48 }
 0x89d   :  { %2722 = vtanh.f32 %v1362_v48 }
 0x89e   :  { %v1892_v18 = vadd.f32 %v1890_v25, %v1838_v28 }
 0x8a0   :  { %2724 = vtanh.f32 %v1892_v18  ;;  %v2466_v5 = vmul.f32 -1.442695, %v1892_v18 }
 0x8a1   :  { %2726 = vpow2.f32 %v2412_v16 }
 0x8a2   :  { %v2719_v3 = vpop.eup %2718  ;;  %2728 = vpow2.f32 %v2430_v39 }
 0x8a3   :  { %362 = vrot.lane.b32.xlu1 %v2719_v3, %s2970_s21  ;;  %2730 = vpow2.f32 %v2448_v45  ;;  %v4308_v45 = vmov 11  }
 0x8a4   :  { %2732 = vpow2.f32 %v2466_v5 }
 0x8a6   :  { %v2721_v10 = vpop.eup %2720 }
 0x8a7   :  { %v2723_v57 = vpop.eup %2722  ;;  %843 = vrot.lane.b32.xlu0 %v2721_v10, %s2970_s21 }
 0x8a8   :  { %1375 = vrot.lane.b32.xlu1 %v2723_v57, %s2970_s21 }
 0x8aa   :  { %v2725_v34 = vpop.eup %2724 }
 0x8ab   :  { %1907 = vrot.lane.b32.xlu0 %v2725_v34, %s2970_s21  ;;  %v2727_v61 = vpop.eup %2726  ;;  %v4307_v34 = vmov 10  }
 0x8ac   :  { %1902 = vrot.lane.b32.xlu1 %v1901_v56, %s2977_s17  ;;  %v353_v49 = vadd.f32 1.0, %v2727_v61  ;;  %v2729_v51 = vpop.eup %2728 }
 0x8ad   :  { %v2731_v24 = vpop.eup %2730  ;;  %v834_v60 = vadd.f32 1.0, %v2729_v51 }
 0x8ae   :  { %2734 = vrcp.f32 %v353_v49  ;;  %v1366_v23 = vadd.f32 1.0, %v2731_v24  ;;  %v2733_v54 = vpop.eup %2732  ;;  %v4309_v49 = vmov 14  }
 0x8af   :  { %2736 = vrcp.f32 %v834_v60  ;;  %v1896_v14 = vadd.f32 1.0, %v2733_v54 }
 0x8b0   :  { %2738 = vrcp.f32 %v1366_v23 }
 0x8b1   :  { %2740 = vrcp.f32 %v1896_v14 }
 0x8b8   :  { %v2735_v43 = vpop.eup %2734 }
 0x8b9   :  { %v2737_v17 = vpop.eup %2736  ;;  %v360_v41 = vmul.f32 %v2735_v43, %v358_v13  ;;  %v3566_v13 = vld [vmem:[%s4219_s1 + $0x16] ss:$0 sm:$0xff] }
 0x8ba   :  { %v2739_v11 = vpop.eup %2738  ;;  %v841_v40 = vmul.f32 %v2737_v17, %v839_v27 }
 0x8bb   :  { %v2741_v55 = vpop.eup %2740  ;;  %v1373_v62 = vmul.f32 %v2739_v11, %v1371_v44  ;;  %v3579_v44 = vld [vmem:[%s4219_s1 + $0x4] ss:$0 sm:$0xff] }
 0x915   :  { %v363_v6 = vpop.permute.xlu1 %362 }
 0x916   :  { %v365_v4 = vmul.f32 %v2735_v43, %v363_v6 }
 0x918   :  { %367 = vrot.lane.b32.xlu0 %v365_v4, %s2977_s17 }
 0x919   :  { %v844_v47 = vpop.permute.xlu0 %843 }
 0x91a   :  { %v846_v9 = vmul.f32 %v2737_v17, %v844_v47  ;;  %v1376_v12 = vpop.permute.xlu1 %1375 }
 0x91b   :  { %v1378_v63 = vmul.f32 %v2739_v11, %v1376_v12 }
 0x91c   :  { %848 = vrot.lane.b32.xlu1 %v846_v9, %s2977_s17 }
 0x91d   :  { %1380 = vrot.lane.b32.xlu0 %v1378_v63, %s2977_s17  ;;  %v1908_v35 = vpop.permute.xlu0 %1907  ;;  %v3554_v63 = vld [vmem:[%s4219_s1 + $0x13] ss:$0 sm:$0xff] }
 0x91e   :  { %v1910_v30 = vmul.f32 %v2741_v55, %v1908_v35  ;;  %v1903_v7 = vpop.permute.xlu1 %1902  ;;  %v3560_v35 = vld [vmem:[%s4219_s1 + $0x14] ss:$0 sm:$0xff] }
 0x91f   :  { %v1905_v46 = vmul.f32 %v2741_v55, %v1903_v7  ;;  %v3572_v7 = vld [vmem:[%s4219_s1 + $0x15] ss:$0 sm:$0xff] }
 0x920   :  { %1912 = vrot.lane.b32.xlu1 %v1910_v30, %s2977_s17 }
 0x98a   :  { %v368_v42 = vpop.permute.xlu0 %367 }
 0x98b   :  { %v3512_v21 = vadd.f32 %v368_v42, %v360_v41 }
 0x98d   :  { %2742 = vtanh.f32 %v3512_v21 }
 0x98e   :  { %v849_v15 = vpop.permute.xlu1 %848 }
 0x98f   :  { %v1381_v50 = vpop.permute.xlu0 %1380  ;;  %v3516_v58 = vadd.f32 %v849_v15, %v841_v40 }
 0x990   :  { %v3518_v48 = vadd.f32 %v1381_v50, %v1373_v62  ;;  %v3585_v62 = vld [vmem:[%s4219_s1 + $0x5] ss:$0 sm:$0xff] }
 0x991   :  { %2744 = vtanh.f32 %v3516_v58 }
 0x992   :  { %2746 = vtanh.f32 %v3518_v48  ;;  %v1913_v53 = vpop.permute.xlu1 %1912 }
 0x993   :  { %v3522_v59 = vadd.f32 %v1913_v53, %v1905_v46  ;;  %v3591_v46 = vld [vmem:[%s4219_s1 + $0x7] ss:$0 sm:$0xff]  ;;  %v3597_v53 = vld [vmem:[%s4219_s1 + $0x6] ss:$0 sm:$0xff] }
 0x995   :  { %2748 = vtanh.f32 %v3522_v59 }
 0x997   :  { %v2743_v31 = vpop.eup %2742 }
 0x998   :  { %373 = vrot.lane.b32.xlu0 %v2743_v31, %s2977_s17 }
 0x99b   :  { %v2745_v28 = vpop.eup %2744 }
 0x99c   :  { %v2747_v25 = vpop.eup %2746  ;;  %854 = vrot.lane.b32.xlu1 %v2745_v28, %s2977_s17 }
 0x99d   :  { %1386 = vrot.lane.b32.xlu0 %v2747_v25, %s2977_s17  ;;  %v4310_v25 = vld [vmem:[#allocation6_spill] sm:$0xff] }
 0x99f   :  { %v2749_v18 = vpop.eup %2748 }
 0x9a0   :  { %1918 = vrot.lane.b32.xlu1 %v2749_v18, %s2977_s17 }
 0xa0a   :  { %v374_v3 = vpop.permute.xlu0 %373 }
 0xa0b   :  { %v376_v10 = vmul.f32 %v2735_v43, %v374_v3  ;;  %v3605_v3 = vld [vmem:[%s4219_s1 + $0x1b] ss:$0 sm:$0xff] }
 0xa0c   :  { %4311 = vst [vmem:[#allocation7_spill] sm:$0xff] %v3605_v3 }
 0xa0d   :  { %379 = vperm.xlu0 %2542, %v376_v10   ;;  %384 = vperm.xlu1 %2543, %v376_v10  }
 0xa0e   :  { %v855_v57 = vpop.permute.xlu1 %854 }
 0xa0f   :  { %v857_v56 = vmul.f32 %v2737_v17, %v855_v57  ;;  %v1387_v16 = vpop.permute.xlu0 %1386  ;;  %v3611_v57 = vld [vmem:[%s4219_s1 + $0xc] ss:$0 sm:$0xff] }
 0xa10   :  { %v1389_v39 = vmul.f32 %v2739_v11, %v1387_v16  ;;  %4312 = vst [vmem:[#allocation2_spill] sm:$0xff] %v3611_v57 }
 0xa11   :  { %2545 = vset.pattern.permute.xlu0 %v4295_v19  ;;  %2544 = vset.pattern.permute.xlu1 %v4293_v36 }
 0xa12   :  { %394 = vperm.xlu0 %2545, %v376_v10   ;;  %389 = vperm.xlu1 %2544, %v376_v10   ;;  %v1919_v5 = vpop.permute.xlu1 %1918 }
 0xa13   :  { %v1921_v61 = vmul.f32 %v2741_v55, %v1919_v5 }
 0xa16   :  { %2548 = vset.pattern.permute.xlu0 %v4293_v36  ;;  %2546 = vset.pattern.permute.xlu1 %v4307_v34 }
 0xa17   :  { %880 = vperm.xlu0 %2548, %v857_v56   ;;  %870 = vperm.xlu1 %2546, %v857_v56  }
 0xa1b   :  { %2551 = vset.pattern.permute.xlu0 %v4308_v45  ;;  %2547 = vset.pattern.permute.xlu1 %v4308_v45 }
 0xa1c   :  { %1407 = vperm.xlu0 %2551, %v1389_v39   ;;  %875 = vperm.xlu1 %2547, %v857_v56  }
 0xa20   :  { %2554 = vset.pattern.permute.xlu0 %v4307_v34  ;;  %2549 = vset.pattern.permute.xlu1 %v4295_v19 }
 0xa21   :  { %885 = vperm.xlu1 %2549, %v857_v56   ;;  %1934 = vperm.xlu0 %2554, %v1921_v61  }
 0xa25   :  { %2550 = vset.pattern.permute.xlu1 %v4307_v34  ;;  %2557 = vset.pattern.permute.xlu0 %v4295_v19 }
 0xa26   :  { %1402 = vperm.xlu1 %2550, %v1389_v39   ;;  %1949 = vperm.xlu0 %2557, %v1921_v61  }
 0xa2a   :  { %2552 = vset.pattern.permute.xlu1 %v4293_v36  ;;  %2559 = vset.pattern.permute.xlu0 %v4309_v49 }
 0xa2b   :  { %1412 = vperm.xlu1 %2552, %v1389_v39   ;;  %1422 = vperm.xlu0 %2559, %v1389_v39  }
 0xa2f   :  { %2553 = vset.pattern.permute.xlu1 %v4295_v19  ;;  %2561 = vset.pattern.permute.xlu0 %v4308_v45 }
 0xa30   :  { %1417 = vperm.xlu1 %2553, %v1389_v39  }
 0xa34   :  { %2555 = vset.pattern.permute.xlu1 %v4308_v45 }
 0xa35   :  { %1939 = vperm.xlu1 %2555, %v1921_v61  }
 0xa39   :  { %2556 = vset.pattern.permute.xlu1 %v4293_v36 }
 0xa3a   :  { %1944 = vperm.xlu1 %2556, %v1921_v61  }
 0xa3e   :  { %2558 = vset.pattern.permute.xlu1 %v4309_v49 }
 0xa3f   :  { %399 = vperm.xlu1 %2558, %v376_v10  }
 0xa43   :  { %890 = vperm.xlu1 %2558, %v857_v56  }
 0xa47   :  { %1954 = vperm.xlu1 %2558, %v1921_v61  }
 0xa4b   :  { %2560 = vset.pattern.permute.xlu1 %v4307_v34 }
 0xa8c   :  { %v385_v51 = vpop.permute.xlu1 %384  ;;  %v380_v23 = vpop.permute.xlu0 %379 }
 0xa8d   :  { %v382_v55 = vmul.f32 %v3554_v63, %v380_v23  ;;  %v387_v30 = vmul.f32 %v3560_v35, %v385_v51  ;;  %v858_v40 = vmul.f32 %v3579_v44, %v380_v23  ;;  %v859_v15 = vmul.f32 %v3585_v62, %v385_v51 }
 0xa8f   :  { %v403_v39 = vadd.f32 %v387_v30, %v382_v55  ;;  %v3630_v55 = vld [vmem:[%s4219_s1 + $0x19] ss:$0 sm:$0xff] }
 0xa90   :  { %4316 = vst [vmem:[#allocation5_spill] sm:$0xff] %v3630_v55 }
 0xa91   :  { %v390_v24 = vpop.permute.xlu1 %389  ;;  %v395_v14 = vpop.permute.xlu0 %394 }
 0xa92   :  { %v397_v41 = vmul.f32 %v3566_v13, %v395_v14  ;;  %v392_v42 = vmul.f32 %v3572_v7, %v390_v24  ;;  %v860_v31 = vmul.f32 %v3597_v53, %v390_v24  ;;  %v3618_v24 = vld [vmem:[%s4219_s1 + $0x1a] ss:$0 sm:$0xff] }
 0xa93   :  { %4314 = vst [vmem:[#allocation3_spill] sm:$0xff] %v3618_v24 }
 0xa94   :  { %v404_v5 = vadd.f32 %v397_v41, %v392_v42  ;;  %v3636_v41 = vld [vmem:[%s4219_s1 + $0xa] ss:$0 sm:$0xff] }
 0xa95   :  { %4317 = vst [vmem:[#allocation6_spill] sm:$0xff] %v3636_v41 }
 0xa96   :  { %v871_v60 = vpop.permute.xlu1 %870  ;;  %v881_v6 = vpop.permute.xlu0 %880 }
 0xa97   :  { %v883_v23 = vmul.f32 %v3618_v24, %v881_v6 }
 0xa9b   :  { %v876_v54 = vpop.permute.xlu1 %875  ;;  %v1408_v47 = vpop.permute.xlu0 %1407 }
 0xa9c   :  { %v878_v30 = vmul.f32 %v3630_v55, %v876_v54  ;;  %v1391_v42 = vmul.f32 %v3636_v41, %v876_v54  ;;  %v3649_v55 = vld [vmem:[%s4219_s1 + $0x9] ss:$0 sm:$0xff] }
 0xaa0   :  { %v886_v43 = vpop.permute.xlu1 %885  ;;  %v3547_v9 = vpop.permute.xlu0 %1934 }
 0xaa1   :  { %v888_v10 = vmul.f32 %v3605_v3, %v886_v43  ;;  %v1393_v56 = vmul.f32 %v3611_v57, %v886_v43  ;;  %v1390_v57 = vmul.f32 %v3649_v55, %v871_v60 }
 0xaa3   :  { %v895_v54 = vadd.f32 %v888_v10, %v883_v23  ;;  %v1395_v3 = vadd.f32 %v1391_v42, %v1390_v57  ;;  %v1923_v10 = vmul.f32 %v3318_v20, %v1408_v47 }
 0xaa5   :  { %v1403_v4 = vpop.permute.xlu1 %1402  ;;  %v1950_v50 = vpop.permute.xlu0 %1949 }
 0xaa6   :  { %v1405_v28 = vmul.f32 %v3276_v32, %v1403_v4  ;;  %v4313_v32 = vld [vmem:[#allocation8_spill] sm:$0xff] }
 0xaa7   :  { %v1410_v61 = vmul.f32 %v4313_v32, %v1408_v47  ;;  %v3676_v47 = vld [vmem:[%s4219_s1 + $0xd] ss:$0 sm:$0xff] }
 0xaaa   :  { %v1413_v17 = vpop.permute.xlu1 %1412 }
 0xaab   :  { %v1415_v18 = vmul.f32 %v4310_v25, %v1413_v17 }
 0xaaf   :  { %v1418_v11 = vpop.permute.xlu1 %1417 }
 0xab0   :  { %v1420_v27 = vmul.f32 %v4302_v8, %v1418_v11  ;;  %v861_v8 = vmul.f32 %v3591_v46, %v395_v14  ;;  %v3624_v14 = vld [vmem:[%s4219_s1 + $0xb] ss:$0 sm:$0xff]  ;;  %v1925_v32 = vmul.f32 %v3308_v33, %v1418_v11  ;;  %v4319_v33 = vld [vmem:[#allocation9_spill] sm:$0xff] }
 0xab1   :  { %4315 = vst [vmem:[#allocation4_spill] sm:$0xff] %v3624_v14  ;;  %v1392_v43 = vmul.f32 %v3624_v14, %v881_v6  ;;  %v3643_v6 = vld [vmem:[%s4219_s1 + $0x18] ss:$0 sm:$0xff]  ;;  %v1924_v11 = vmul.f32 %v4319_v33, %v1413_v17 }
 0xab2   :  { %v1427_v51 = vadd.f32 %v1420_v27, %v1415_v18  ;;  %v863_v27 = vadd.f32 %v859_v15, %v858_v40  ;;  %v864_v25 = vadd.f32 %v861_v8, %v860_v31  ;;  %v1426_v18 = vadd.f32 %v1410_v61, %v1405_v28  ;;  %4318 = vst [vmem:[#allocation8_spill] sm:$0xff] %v3643_v6  ;;  %v1423_v15 = vpop.permute.xlu0 %1422 }
 0xab3   :  { %v873_v14 = vmul.f32 %v3643_v6, %v871_v60  ;;  %v1396_v40 = vadd.f32 %v1393_v56, %v1392_v43  ;;  %v1922_v8 = vmul.f32 %v3325_v37, %v1403_v4  ;;  %v405_v28 = vadd.f32 %v404_v5, %v403_v39  ;;  %v3658_v6 = vld [vmem:[%s4219_s1 + $0x8] ss:$0 sm:$0xff] }
 0xab4   :  { %v3549_v12 = vpop.permute.xlu1 %1939  ;;  %v1428_v31 = vadd.f32 %v1427_v51, %v1426_v18  ;;  %4320 = vst [vmem:[#allocation9_spill] sm:$0xff] %v3658_v6  ;;  %v1425_v37 = vmul.f32 %v3293_v0, %v1423_v15  ;;  %v1928_v4 = vadd.f32 %v1925_v32, %v1924_v11  ;;  %v865_v56 = vadd.f32 %v864_v25, %v863_v27  ;;  %v4321_v51 = vld [vmem:[#allocation12_spill] sm:$0xff]  ;;  %v3670_v0 = vld [vmem:[%s4219_s1 + $0x1c] ss:$0 sm:$0xff] }
 0xab5   :  { %v894_v41 = vadd.f32 %v878_v30, %v873_v14  ;;  %v1397_v57 = vadd.f32 %v1396_v40, %v1395_v3  ;;  %v1952_v23 = vmul.f32 %v4321_v51, %v1950_v50  ;;  %v1927_v14 = vadd.f32 %v1923_v10, %v1922_v8  ;;  %v4322_v30 = vld [vmem:[#allocation10_spill] sm:$0xff]  ;;  %v4323_v3 = vld [vmem:[#allocation11_spill] sm:$0xff] }
 0xab6   :  { %v1429_v43 = vadd.f32 %v1428_v31, %v1425_v37  ;;  %v1942_v42 = vmul.f32 %v4322_v30, %v3549_v12  ;;  %v1937_v12 = vmul.f32 %v4323_v3, %v3547_v9  ;;  %v1926_v32 = vmul.f32 %v3334_v2, %v1423_v15 }
 0xab7   :  { %v896_v5 = vadd.f32 %v895_v54, %v894_v41 }
 0xab8   :  { %v1431_v54 = vrot.slane %v1429_v43, 6  ;;  %v1958_v40 = vadd.f32 %v1942_v42, %v1937_v12 }
 0xab9   :  { %v1945_v16 = vpop.permute.xlu1 %1944 }
 0xaba   :  { %v1947_v17 = vmul.f32 %v3461_v26, %v1945_v16  ;;  %v1929_v16 = vadd.f32 %v1928_v4, %v1927_v14 }
 0xabe   :  { %v400_v61 = vpop.permute.xlu1 %399 }
 0xabf   :  { %v402_v24 = vmul.f32 %v3467_v1, %v400_v61  ;;  %v862_v60 = vmul.f32 %v3658_v6, %v400_v61 }
 0xac1   :  { %v406_v39 = vadd.f32 %v405_v28, %v402_v24  ;;  %v866_v61 = vadd.f32 %v865_v56, %v862_v60  ;;  %v1959_v24 = vadd.f32 %v1952_v23, %v1947_v17  ;;  %v3687_v28 = vld [vmem:[%s4219_s1 + $0x29] ss:$0 sm:$0xff]  ;;  %v1930_v60 = vadd.f32 %v1929_v16, %v1926_v32 }
 0xac2   :  { %v891_v18 = vpop.permute.xlu1 %890 }
 0xac3   :  { %v408_v33 = vrot.slane %v406_v39, 6  ;;  %v893_v20 = vmul.f32 %v3670_v0, %v891_v18  ;;  %v1394_v50 = vmul.f32 %v3676_v47, %v891_v18  ;;  %v867_v11 = vadd.f32 %v3494_v22, %v866_v61 }
 0xac4   :  { %v1960_v10 = vadd.f32 %v1959_v24, %v1958_v40  ;;  %v1931_v17 = vadd.f32 %v3342_v38, %v1930_v60 }
 0xac5   :  { %v410_v41 = vadd.f32 %v408_v33, %v3478_v29  ;;  %v897_v27 = vadd.f32 %v896_v5, %v893_v20  ;;  %v1398_v25 = vadd.f32 %v1397_v57, %v1394_v50 }
 0xac6   :  { %v1955_v8 = vpop.permute.xlu1 %1954 }
 0xac7   :  { %2750 = vtanh.f32 %v410_v41  ;;  %v899_v31 = vrot.slane %v897_v27, 6  ;;  %v1399_v9 = vadd.f32 %v3687_v28, %v1398_v25  ;;  %v1957_v37 = vmul.f32 %v3486_v52, %v1955_v8 }
 0xac8   :  { %v2413_v43 = vmul.f32 -1.442695, %v410_v41 }
 0xac9   :  { %v901_v4 = vadd.f32 %v899_v31, %v867_v11  ;;  %v1433_v2 = vadd.f32 %v1431_v54, %v1399_v9  ;;  %v1961_v15 = vadd.f32 %v1960_v10, %v1957_v37 }
 0xacb   :  { %2752 = vtanh.f32 %v901_v4  ;;  %v1963_v56 = vrot.slane %v1961_v15, 6  ;;  %v2431_v42 = vmul.f32 -1.442695, %v901_v4  ;;  %v2449_v18 = vmul.f32 -1.442695, %v1433_v2 }
 0xacc   :  { %2754 = vtanh.f32 %v1433_v2  ;;  %v419_v4 = vrot.slane %v3512_v21, 6 }
 0xacd   :  { %v1965_v39 = vadd.f32 %v1963_v56, %v1931_v17  ;;  %v910_v17 = vrot.slane %v3516_v58, 6 }
 0xacf   :  { %2756 = vtanh.f32 %v1965_v39  ;;  %v2467_v38 = vmul.f32 -1.442695, %v1965_v39  ;;  %v1442_v39 = vrot.slane %v3518_v48, 6 }
 0xad0   :  { %2758 = vpow2.f32 %v2413_v43 }
 0xad1   :  { %v2751_v5 = vpop.eup %2750  ;;  %2760 = vpow2.f32 %v2431_v42  ;;  %v1974_v42 = vrot.slane %v3522_v59, 6 }
 0xad2   :  { %423 = vrot.lane.b32.xlu1 %v2751_v5, %s2970_s21  ;;  %2762 = vpow2.f32 %v2449_v18 }
 0xad3   :  { %2764 = vpow2.f32 %v2467_v38 }
 0xad5   :  { %v2753_v57 = vpop.eup %2752 }
 0xad6   :  { %v2755_v23 = vpop.eup %2754  ;;  %914 = vrot.lane.b32.xlu0 %v2753_v57, %s2970_s21 }
 0xad7   :  { %1446 = vrot.lane.b32.xlu1 %v2755_v23, %s2970_s21 }
 0xad9   :  { %v2757_v14 = vpop.eup %2756 }
 0xada   :  { %1978 = vrot.lane.b32.xlu0 %v2757_v14, %s2970_s21  ;;  %v2759_v33 = vpop.eup %2758 }
 0xadb   :  { %v414_v61 = vadd.f32 1.0, %v2759_v33  ;;  %v2761_v20 = vpop.eup %2760 }
 0xadc   :  { %v2763_v50 = vpop.eup %2762  ;;  %v905_v12 = vadd.f32 1.0, %v2761_v20 }
 0xadd   :  { %2766 = vrcp.f32 %v414_v61  ;;  %v1437_v16 = vadd.f32 1.0, %v2763_v50  ;;  %v2765_v24 = vpop.eup %2764 }
 0xade   :  { %2768 = vrcp.f32 %v905_v12  ;;  %v1969_v27 = vadd.f32 1.0, %v2765_v24 }
 0xadf   :  { %2770 = vrcp.f32 %v1437_v16 }
 0xae0   :  { %2772 = vrcp.f32 %v1969_v27 }
 0xae7   :  { %v2767_v41 = vpop.eup %2766 }
 0xae8   :  { %v2769_v54 = vpop.eup %2768  ;;  %v421_v2 = vmul.f32 %v2767_v41, %v419_v4 }
 0xae9   :  { %v2771_v8 = vpop.eup %2770  ;;  %v912_v5 = vmul.f32 %v2769_v54, %v910_v17 }
 0xaea   :  { %v2773_v60 = vpop.eup %2772  ;;  %v1444_v23 = vmul.f32 %v2771_v8, %v1442_v39 }
 0xaeb   :  { %v1976_v21 = vmul.f32 %v2773_v60, %v1974_v42 }
 0xb44   :  { %v424_v25 = vpop.permute.xlu1 %423 }
 0xb45   :  { %v426_v32 = vmul.f32 %v2767_v41, %v424_v25 }
 0xb47   :  { %428 = vrot.lane.b32.xlu1 %v426_v32, %s2977_s17 }
 0xb48   :  { %v915_v40 = vpop.permute.xlu0 %914 }
 0xb49   :  { %v917_v11 = vmul.f32 %v2769_v54, %v915_v40  ;;  %v1447_v31 = vpop.permute.xlu1 %1446 }
 0xb4a   :  { %v1449_v9 = vmul.f32 %v2771_v8, %v1447_v31 }
 0xb4b   :  { %919 = vrot.lane.b32.xlu0 %v917_v11, %s2977_s17 }
 0xb4c   :  { %1451 = vrot.lane.b32.xlu1 %v1449_v9, %s2977_s17  ;;  %v1979_v10 = vpop.permute.xlu0 %1978 }
 0xb4d   :  { %v1981_v37 = vmul.f32 %v2773_v60, %v1979_v10 }
 0xb4f   :  { %1983 = vrot.lane.b32.xlu0 %v1981_v37, %s2977_s17 }
 0xbb9   :  { %v429_v15 = vpop.permute.xlu1 %428 }
 0xbba   :  { %v3702_v56 = vadd.f32 %v429_v15, %v421_v2 }
 0xbbc   :  { %2774 = vtanh.f32 %v3702_v56 }
 0xbbd   :  { %v920_v57 = vpop.permute.xlu0 %919 }
 0xbbe   :  { %v3706_v14 = vadd.f32 %v920_v57, %v912_v5  ;;  %v1452_v43 = vpop.permute.xlu1 %1451 }
 0xbbf   :  { %v3709_v18 = vadd.f32 %v1452_v43, %v1444_v23 }
 0xbc0   :  { %2776 = vtanh.f32 %v3706_v14 }
 0xbc1   :  { %2778 = vtanh.f32 %v3709_v18  ;;  %v1984_v58 = vpop.permute.xlu0 %1983 }
 0xbc2   :  { %v3713_v38 = vadd.f32 %v1984_v58, %v1976_v21 }
 0xbc4   :  { %2780 = vtanh.f32 %v3713_v38 }
 0xbc6   :  { %v2775_v48 = vpop.eup %2774 }
 0xbc7   :  { %434 = vrot.lane.b32.xlu1 %v2775_v48, %s2977_s17 }
 0xbca   :  { %v2777_v33 = vpop.eup %2776 }
 0xbcb   :  { %v2779_v61 = vpop.eup %2778  ;;  %925 = vrot.lane.b32.xlu0 %v2777_v33, %s2977_s17 }
 0xbcc   :  { %1457 = vrot.lane.b32.xlu1 %v2779_v61, %s2977_s17 }
 0xbce   :  { %v2781_v59 = vpop.eup %2780 }
 0xbcf   :  { %1989 = vrot.lane.b32.xlu0 %v2781_v59, %s2977_s17 }
 0xc39   :  { %v435_v20 = vpop.permute.xlu1 %434 }
 0xc3a   :  { %v437_v50 = vmul.f32 %v2767_v41, %v435_v20 }
 0xc3c   :  { %445 = vperm.xlu0 %2561, %v437_v50   ;;  %440 = vperm.xlu1 %2560, %v437_v50  }
 0xc3d   :  { %v926_v12 = vpop.permute.xlu0 %925 }
 0xc3e   :  { %v928_v16 = vmul.f32 %v2769_v54, %v926_v12  ;;  %v1458_v24 = vpop.permute.xlu1 %1457 }
 0xc3f   :  { %v1460_v27 = vmul.f32 %v2771_v8, %v1458_v24 }
 0xc40   :  { %2564 = vset.pattern.permute.xlu0 %v4307_v34  ;;  %2562 = vset.pattern.permute.xlu1 %v4293_v36 }
 0xc41   :  { %941 = vperm.xlu0 %2564, %v928_v16   ;;  %450 = vperm.xlu1 %2562, %v437_v50   ;;  %v1990_v41 = vpop.permute.xlu0 %1989 }
 0xc42   :  { %v1992_v25 = vmul.f32 %v2773_v60, %v1990_v41 }
 0xc45   :  { %2567 = vset.pattern.permute.xlu0 %v4295_v19  ;;  %2563 = vset.pattern.permute.xlu1 %v4295_v19 }
 0xc46   :  { %956 = vperm.xlu0 %2567, %v928_v16   ;;  %455 = vperm.xlu1 %2563, %v437_v50  }
 0xc4a   :  { %2570 = vset.pattern.permute.xlu0 %v4293_v36  ;;  %2565 = vset.pattern.permute.xlu1 %v4308_v45 }
 0xc4b   :  { %946 = vperm.xlu1 %2565, %v928_v16   ;;  %1483 = vperm.xlu0 %2570, %v1460_v27  }
 0xc4f   :  { %2566 = vset.pattern.permute.xlu1 %v4293_v36  ;;  %2573 = vset.pattern.permute.xlu0 %v4308_v45 }
 0xc50   :  { %951 = vperm.xlu1 %2566, %v928_v16   ;;  %2010 = vperm.xlu0 %2573, %v1992_v25  }
 0xc54   :  { %2568 = vset.pattern.permute.xlu1 %v4307_v34  ;;  %2576 = vset.pattern.permute.xlu0 %v4309_v49 }
 0xc55   :  { %460 = vperm.xlu0 %2576, %v437_v50   ;;  %1473 = vperm.xlu1 %2568, %v1460_v27  }
 0xc59   :  { %2025 = vperm.xlu0 %2576, %v1992_v25   ;;  %2569 = vset.pattern.permute.xlu1 %v4308_v45 }
 0xc5a   :  { %1478 = vperm.xlu1 %2569, %v1460_v27  }
 0xc5d   :  { %2579 = vset.pattern.permute.xlu0 %v4308_v45 }
 0xc5e   :  { %2571 = vset.pattern.permute.xlu1 %v4295_v19 }
 0xc5f   :  { %1488 = vperm.xlu1 %2571, %v1460_v27  }
 0xc63   :  { %2572 = vset.pattern.permute.xlu1 %v4307_v34 }
 0xc64   :  { %2005 = vperm.xlu1 %2572, %v1992_v25  }
 0xc68   :  { %2574 = vset.pattern.permute.xlu1 %v4293_v36 }
 0xc69   :  { %2015 = vperm.xlu1 %2574, %v1992_v25  }
 0xc6d   :  { %2575 = vset.pattern.permute.xlu1 %v4295_v19 }
 0xc6e   :  { %2020 = vperm.xlu1 %2575, %v1992_v25   ;;  %v4324_v25 = vld [vmem:[#allocation8_spill] sm:$0xff] }
 0xc72   :  { %2577 = vset.pattern.permute.xlu1 %v4309_v49 }
 0xc73   :  { %961 = vperm.xlu1 %2577, %v928_v16  }
 0xc77   :  { %1493 = vperm.xlu1 %2577, %v1460_v27  }
 0xc7b   :  { %2578 = vset.pattern.permute.xlu1 %v4307_v34 }
 0xcbb   :  { %v446_v32 = vpop.permute.xlu0 %445  ;;  %v441_v54 = vpop.permute.xlu1 %440 }
 0xcbc   :  { %v448_v37 = vmul.f32 %v3560_v35, %v446_v32  ;;  %v443_v4 = vmul.f32 %v3554_v63, %v441_v54  ;;  %v930_v50 = vmul.f32 %v3585_v62, %v446_v32  ;;  %v929_v12 = vmul.f32 %v3579_v44, %v441_v54 }
 0xcbe   :  { %v464_v5 = vadd.f32 %v448_v37, %v443_v4  ;;  %v934_v41 = vadd.f32 %v930_v50, %v929_v12  ;;  %v4325_v4 = vld [vmem:[#allocation3_spill] sm:$0xff] }
 0xcc0   :  { %v942_v40 = vpop.permute.xlu0 %941  ;;  %v451_v8 = vpop.permute.xlu1 %450 }
 0xcc1   :  { %v453_v2 = vmul.f32 %v3572_v7, %v451_v8  ;;  %v931_v16 = vmul.f32 %v3597_v53, %v451_v8  ;;  %v1461_v37 = vmul.f32 %v3649_v55, %v942_v40  ;;  %v4328_v8 = vld [vmem:[#allocation5_spill] sm:$0xff] }
 0xcc5   :  { %v957_v11 = vpop.permute.xlu0 %956  ;;  %v456_v31 = vpop.permute.xlu1 %455 }
 0xcc6   :  { %v458_v10 = vmul.f32 %v3566_v13, %v456_v31  ;;  %v932_v20 = vmul.f32 %v3591_v46, %v456_v31 }
 0xcc8   :  { %v465_v39 = vadd.f32 %v458_v10, %v453_v2  ;;  %v935_v24 = vadd.f32 %v932_v20, %v931_v16  ;;  %v944_v10 = vmul.f32 %v4324_v25, %v942_v40  ;;  %v3765_v40 = vld [vmem:[%s4219_s1 + $0x20] ss:$0 sm:$0xff] }
 0xcc9   :  { %4330 = vst [vmem:[#allocation12_spill] sm:$0xff] %v3765_v40 }
 0xcca   :  { %v1484_v9 = vpop.permute.xlu0 %1483  ;;  %v947_v60 = vpop.permute.xlu1 %946  ;;  %v466_v42 = vadd.f32 %v465_v39, %v464_v5  ;;  %v4326_v39 = vld [vmem:[#allocation7_spill] sm:$0xff]  ;;  %v4327_v5 = vld [vmem:[#allocation2_spill] sm:$0xff] }
 0xccb   :  { %v959_v31 = vmul.f32 %v4326_v39, %v957_v11  ;;  %v1464_v32 = vmul.f32 %v4327_v5, %v957_v11 }
 0xccf   :  { %v2011_v15 = vpop.permute.xlu0 %2010  ;;  %v952_v17 = vpop.permute.xlu1 %951 }
 0xcd0   :  { %v954_v2 = vmul.f32 %v4325_v4, %v952_v17 }
 0xcd4   :  { %v461_v57 = vpop.permute.xlu0 %460  ;;  %v1474_v23 = vpop.permute.xlu1 %1473 }
 0xcd5   :  { %v463_v43 = vmul.f32 %v3467_v1, %v461_v57  ;;  %v933_v50 = vmul.f32 %v3658_v6, %v461_v57 }
 0xcd7   :  { %v467_v21 = vadd.f32 %v466_v42, %v463_v43  ;;  %v936_v43 = vadd.f32 %v935_v24, %v934_v41  ;;  %v949_v42 = vmul.f32 %v4328_v8, %v947_v60  ;;  %v4334_v24 = vld [vmem:[#allocation6_spill] sm:$0xff]  ;;  %v966_v41 = vadd.f32 %v959_v31, %v954_v2  ;;  %v3810_v31 = vld [vmem:[%s4219_s1 + $0xe] ss:$0 sm:$0xff] }
 0xcd8   :  { %4338 = vst [vmem:[#allocation5_spill] sm:$0xff] %v3810_v31 }
 0xcd9   :  { %v469_v58 = vrot.slane %v467_v21, 6  ;;  %v1479_v48 = vpop.permute.xlu1 %1478  ;;  %v2013_v21 = vmul.f32 %v4322_v30, %v2011_v15 }
 0xcdb   :  { %v3744_v33 = vadd.f32 %v469_v58, %v3478_v29  ;;  %v4329_v58 = vld [vmem:[#allocation4_spill] sm:$0xff] }
 0xcdc   :  { %v1463_v20 = vmul.f32 %v4329_v58, %v952_v17  ;;  %v3779_v17 = vld [vmem:[%s4219_s1 + $0x1f] ss:$0 sm:$0xff] }
 0xcdd   :  { %2782 = vtanh.f32 %v3744_v33  ;;  %4332 = vst [vmem:[#allocation11_spill] sm:$0xff] %v3779_v17  ;;  %v1486_v57 = vmul.f32 %v3779_v17, %v1484_v9 }
 0xcde   :  { %v1489_v61 = vpop.permute.xlu1 %1488 }
 0xcdf   :  { %v1491_v16 = vmul.f32 %v3765_v40, %v1489_v61 }
 0xce3   :  { %v2006_v59 = vpop.permute.xlu1 %2005 }
 0xce4   :  { %v2008_v54 = vmul.f32 %v4323_v3, %v2006_v59  ;;  %v3771_v3 = vld [vmem:[%s4219_s1 + $0x11] ss:$0 sm:$0xff]  ;;  %v3785_v59 = vld [vmem:[%s4219_s1 + $0x10] ss:$0 sm:$0xff] }
 0xce5   :  { %4331 = vst [vmem:[#allocation10_spill] sm:$0xff] %v3771_v3  ;;  %v1996_v11 = vmul.f32 %v3771_v3, %v1489_v61  ;;  %4333 = vst [vmem:[#allocation8_spill] sm:$0xff] %v3785_v59  ;;  %v1462_v61 = vmul.f32 %v4334_v24, %v947_v60  ;;  %v3804_v60 = vld [vmem:[%s4219_s1 + $0x1d] ss:$0 sm:$0xff]  ;;  %v2026_v24 = vpop.permute.xlu0 %2025 }
 0xce6   :  { %v2029_v17 = vadd.f32 %v2013_v21, %v2008_v54  ;;  %4337 = vst [vmem:[#allocation2_spill] sm:$0xff] %v3804_v60  ;;  %v1476_v2 = vmul.f32 %v3804_v60, %v1474_v23  ;;  %v1498_v54 = vadd.f32 %v1491_v16, %v1486_v57  ;;  %v2028_v60 = vmul.f32 %v3486_v52, %v2026_v24  ;;  %v3826_v52 = vld [vmem:[%s4219_s1 + $0x12] ss:$0 sm:$0xff]  ;;  %v3833_v24 = vld [vmem:[%s4219_s1 + $0x2a] ss:$0 sm:$0xff] }
 0xce7   :  { %v2783_v1 = vpop.eup %2782 }
 0xce8   :  { %484 = vrot.lane.b32.xlu1 %v2783_v1, %s2970_s21  ;;  %v2016_v27 = vpop.permute.xlu1 %2015  ;;  %v1995_v1 = vmul.f32 %v3785_v59, %v1484_v9  ;;  %v965_v9 = vadd.f32 %v949_v42, %v944_v10  ;;  %v1467_v59 = vadd.f32 %v1464_v32, %v1463_v20  ;;  %v1466_v42 = vadd.f32 %v1462_v61, %v1461_v37  ;;  %v3820_v37 = vld [vmem:[%s4219_s1 + $0x21] ss:$0 sm:$0xff] }
 0xce9   :  { %v2018_v30 = vmul.f32 %v3461_v26, %v2016_v27  ;;  %v3792_v26 = vld [vmem:[%s4219_s1 + $0x1e] ss:$0 sm:$0xff]  ;;  %v3798_v27 = vld [vmem:[%s4219_s1 + $0xf] ss:$0 sm:$0xff] }
 0xcea   :  { %4335 = vst [vmem:[#allocation3_spill] sm:$0xff] %v3792_v26  ;;  %4336 = vst [vmem:[#allocation7_spill] sm:$0xff] %v3798_v27  ;;  %v1999_v21 = vadd.f32 %v1996_v11, %v1995_v1  ;;  %v967_v20 = vadd.f32 %v966_v41, %v965_v9  ;;  %v1468_v6 = vadd.f32 %v1467_v59, %v1466_v42  ;;  %v2414_v9 = vmul.f32 -1.442695, %v3744_v33 }
 0xced   :  { %v2021_v12 = vpop.permute.xlu1 %2020 }
 0xcee   :  { %v2023_v15 = vmul.f32 %v4321_v51, %v2021_v12  ;;  %v1481_v51 = vmul.f32 %v3792_v26, %v1479_v48  ;;  %v1994_v12 = vmul.f32 %v3798_v27, %v1479_v48  ;;  %v1993_v26 = vmul.f32 %v3810_v31, %v1474_v23 }
 0xcef   :  { %v937_v48 = vadd.f32 %v936_v43, %v933_v50 }
 0xcf0   :  { %v2030_v3 = vadd.f32 %v2023_v15, %v2018_v30  ;;  %v1497_v27 = vadd.f32 %v1481_v51, %v1476_v2  ;;  %v1998_v40 = vadd.f32 %v1994_v12, %v1993_v26 }
 0xcf1   :  { %v938_v23 = vadd.f32 %v3494_v22, %v937_v48 }
 0xcf2   :  { %v2031_v10 = vadd.f32 %v2030_v3, %v2029_v17  ;;  %v962_v32 = vpop.permute.xlu1 %961  ;;  %v1499_v43 = vadd.f32 %v1498_v54, %v1497_v27  ;;  %v2000_v50 = vadd.f32 %v1999_v21, %v1998_v40 }
 0xcf3   :  { %v964_v30 = vmul.f32 %v3670_v0, %v962_v32  ;;  %v1465_v15 = vmul.f32 %v3676_v47, %v962_v32 }
 0xcf4   :  { %v2032_v31 = vadd.f32 %v2031_v10, %v2028_v60 }
 0xcf5   :  { %v968_v58 = vadd.f32 %v967_v20, %v964_v30  ;;  %v1469_v11 = vadd.f32 %v1468_v6, %v1465_v15 }
 0xcf6   :  { %v1494_v16 = vpop.permute.xlu1 %1493  ;;  %v2034_v1 = vrot.slane %v2032_v31, 6 }
 0xcf7   :  { %v970_v3 = vrot.slane %v968_v58, 6  ;;  %v1496_v17 = vmul.f32 %v3820_v37, %v1494_v16  ;;  %v1997_v22 = vmul.f32 %v3826_v52, %v1494_v16  ;;  %v1470_v6 = vadd.f32 %v3687_v28, %v1469_v11 }
 0xcf9   :  { %v972_v57 = vadd.f32 %v970_v3, %v938_v23  ;;  %v1500_v59 = vadd.f32 %v1499_v43, %v1496_v17  ;;  %v2001_v40 = vadd.f32 %v2000_v50, %v1997_v22 }
 0xcfb   :  { %2784 = vtanh.f32 %v972_v57  ;;  %v1502_v58 = vrot.slane %v1500_v59, 6  ;;  %v2002_v61 = vadd.f32 %v3833_v24, %v2001_v40  ;;  %v2432_v31 = vmul.f32 -1.442695, %v972_v57 }
 0xcfc   :  { %v480_v40 = vrot.slane %v3702_v56, 6 }
 0xcfd   :  { %v1504_v41 = vadd.f32 %v1502_v58, %v1470_v6  ;;  %v2036_v26 = vadd.f32 %v2034_v1, %v2002_v61 }
 0xcff   :  { %2786 = vtanh.f32 %v1504_v41  ;;  %v2450_v10 = vmul.f32 -1.442695, %v1504_v41  ;;  %v2468_v32 = vmul.f32 -1.442695, %v2036_v26  ;;  %v981_v41 = vrot.slane %v3706_v14, 6 }
 0xd00   :  { %2788 = vtanh.f32 %v2036_v26 }
 0xd01   :  { %2790 = vpow2.f32 %v2414_v9  ;;  %v2045_v9 = vrot.slane %v3713_v38, 6 }
 0xd05   :  { %v2785_v51 = vpop.eup %2784 }
 0xd06   :  { %985 = vrot.lane.b32.xlu0 %v2785_v51, %s2970_s21 }
 0xd09   :  { %v2787_v27 = vpop.eup %2786 }
 0xd0a   :  { %v2789_v12 = vpop.eup %2788  ;;  %1517 = vrot.lane.b32.xlu1 %v2787_v27, %s2970_s21  ;;  %v1513_v27 = vrot.slane %v3709_v18, 6 }
 0xd0b   :  { %2049 = vrot.lane.b32.xlu0 %v2789_v12, %s2970_s21  ;;  %v2791_v60 = vpop.eup %2790 }
 0xd0c   :  { %v475_v2 = vadd.f32 1.0, %v2791_v60 }
 0xd0e   :  { %2792 = vrcp.f32 %v475_v2 }
 0xd0f   :  { %2794 = vpow2.f32 %v2432_v31 }
 0xd10   :  { %2796 = vpow2.f32 %v2450_v10 }
 0xd11   :  { %2798 = vpow2.f32 %v2468_v32 }
 0xd18   :  { %v2793_v48 = vpop.eup %2792 }
 0xd19   :  { %v2795_v42 = vpop.eup %2794  ;;  %v482_v1 = vmul.f32 %v2793_v48, %v480_v40 }
 0xd1a   :  { %v976_v20 = vadd.f32 1.0, %v2795_v42  ;;  %v2797_v30 = vpop.eup %2796 }
 0xd1b   :  { %v2799_v15 = vpop.eup %2798  ;;  %v1508_v33 = vadd.f32 1.0, %v2797_v30 }
 0xd1c   :  { %2800 = vrcp.f32 %v976_v20  ;;  %v2040_v23 = vadd.f32 1.0, %v2799_v15 }
 0xd1d   :  { %2802 = vrcp.f32 %v1508_v33 }
 0xd1e   :  { %2804 = vrcp.f32 %v2040_v23 }
 0xd26   :  { %v2801_v43 = vpop.eup %2800 }
 0xd27   :  { %v2803_v3 = vpop.eup %2802  ;;  %v983_v26 = vmul.f32 %v2801_v43, %v981_v41 }
 0xd28   :  { %v2805_v17 = vpop.eup %2804  ;;  %v1515_v56 = vmul.f32 %v2803_v3, %v1513_v27 }
 0xd29   :  { %v2047_v60 = vmul.f32 %v2805_v17, %v2045_v9 }
 0xd5a   :  { %v485_v54 = vpop.permute.xlu1 %484 }
 0xd5b   :  { %v487_v21 = vmul.f32 %v2793_v48, %v485_v54 }
 0xd5d   :  { %489 = vrot.lane.b32.xlu1 %v487_v21, %s2977_s17 }
 0xd78   :  { %v986_v50 = vpop.permute.xlu0 %985 }
 0xd79   :  { %v988_v16 = vmul.f32 %v2801_v43, %v986_v50 }
 0xd7b   :  { %990 = vrot.lane.b32.xlu0 %v988_v16, %s2977_s17 }
 0xd7c   :  { %v1518_v11 = vpop.permute.xlu1 %1517 }
 0xd7d   :  { %v2050_v22 = vpop.permute.xlu0 %2049  ;;  %v1520_v57 = vmul.f32 %v2803_v3, %v1518_v11 }
 0xd7e   :  { %v2052_v59 = vmul.f32 %v2805_v17, %v2050_v22 }
 0xd7f   :  { %1522 = vrot.lane.b32.xlu1 %v1520_v57, %s2977_s17 }
 0xd80   :  { %2054 = vrot.lane.b32.xlu0 %v2052_v59, %s2977_s17 }
 0xdcf   :  { %v490_v6 = vpop.permute.xlu1 %489 }
 0xdd0   :  { %v3845_v58 = vadd.f32 %v490_v6, %v482_v1 }
 0xdd2   :  { %2806 = vtanh.f32 %v3845_v58 }
 0xddc   :  { %v2807_v61 = vpop.eup %2806 }
 0xddd   :  { %495 = vrot.lane.b32.xlu1 %v2807_v61, %s2977_s17 }
 0xded   :  { %v991_v51 = vpop.permute.xlu0 %990 }
 0xdee   :  { %v3851_v12 = vadd.f32 %v991_v51, %v983_v26 }
 0xdf0   :  { %2808 = vtanh.f32 %v3851_v12 }
 0xdf1   :  { %v1523_v2 = vpop.permute.xlu1 %1522 }
 0xdf2   :  { %v2055_v31 = vpop.permute.xlu0 %2054  ;;  %v3855_v54 = vadd.f32 %v1523_v2, %v1515_v56 }
 0xdf3   :  { %v3857_v21 = vadd.f32 %v2055_v31, %v2047_v60  ;;  %v2932_v60 = vld [vmem:[%s4219_s1 + $0x17] ss:$0 sm:$0xff] }
 0xdf4   :  { %2810 = vtanh.f32 %v3855_v54 }
 0xdf5   :  { %2812 = vtanh.f32 %v3857_v21 }
 0xdfa   :  { %v2809_v14 = vpop.eup %2808 }
 0xdfb   :  { %996 = vrot.lane.b32.xlu0 %v2809_v14, %s2977_s17 }
 0xdfe   :  { %v2811_v18 = vpop.eup %2810 }
 0xdff   :  { %v2813_v10 = vpop.eup %2812  ;;  %1528 = vrot.lane.b32.xlu1 %v2811_v18, %s2977_s17 }
 0xe00   :  { %2060 = vrot.lane.b32.xlu0 %v2813_v10, %s2977_s17 }
 0xe4f   :  { %v496_v38 = vpop.permute.xlu1 %495 }
 0xe50   :  { %v498_v32 = vmul.f32 %v2793_v48, %v496_v38 }
 0xe52   :  { %506 = vperm.xlu0 %2579, %v498_v32   ;;  %501 = vperm.xlu1 %2578, %v498_v32  }
 0xe56   :  { %2580 = vset.pattern.permute.xlu1 %v4293_v36  ;;  %2582 = vset.pattern.permute.xlu0 %v4307_v34 }
 0xe57   :  { %511 = vperm.xlu1 %2580, %v498_v32  }
 0xe5b   :  { %2581 = vset.pattern.permute.xlu1 %v4295_v19 }
 0xe5c   :  { %516 = vperm.xlu1 %2581, %v498_v32  }
 0xe60   :  { %2583 = vset.pattern.permute.xlu1 %v4308_v45 }
 0xe6d   :  { %v997_v42 = vpop.permute.xlu0 %996 }
 0xe6e   :  { %v999_v20 = vmul.f32 %v2801_v43, %v997_v42 }
 0xe70   :  { %1012 = vperm.xlu0 %2582, %v999_v20   ;;  %1017 = vperm.xlu1 %2583, %v999_v20  }
 0xe71   :  { %v1529_v48 = vpop.permute.xlu1 %1528 }
 0xe72   :  { %v1531_v30 = vmul.f32 %v2803_v3, %v1529_v48  ;;  %v2061_v15 = vpop.permute.xlu0 %2060 }
 0xe73   :  { %v2063_v33 = vmul.f32 %v2805_v17, %v2061_v15 }
 0xe74   :  { %2585 = vset.pattern.permute.xlu0 %v4295_v19  ;;  %2584 = vset.pattern.permute.xlu1 %v4293_v36 }
 0xe75   :  { %1027 = vperm.xlu0 %2585, %v999_v20   ;;  %1022 = vperm.xlu1 %2584, %v999_v20  }
 0xe79   :  { %2588 = vset.pattern.permute.xlu0 %v4293_v36  ;;  %2586 = vset.pattern.permute.xlu1 %v4307_v34 }
 0xe7a   :  { %1554 = vperm.xlu0 %2588, %v1531_v30   ;;  %1544 = vperm.xlu1 %2586, %v1531_v30  }
 0xe7e   :  { %2591 = vset.pattern.permute.xlu0 %v4308_v45  ;;  %2587 = vset.pattern.permute.xlu1 %v4308_v45 }
 0xe7f   :  { %2081 = vperm.xlu0 %2591, %v2063_v33   ;;  %1549 = vperm.xlu1 %2587, %v1531_v30  }
 0xe83   :  { %2594 = vset.pattern.permute.xlu0 %v4309_v49  ;;  %2589 = vset.pattern.permute.xlu1 %v4295_v19 }
 0xe84   :  { %521 = vperm.xlu0 %2594, %v498_v32   ;;  %1559 = vperm.xlu1 %2589, %v1531_v30  }
 0xe88   :  { %2096 = vperm.xlu0 %2594, %v2063_v33   ;;  %2590 = vset.pattern.permute.xlu1 %v4307_v34 }
 0xe89   :  { %2076 = vperm.xlu1 %2590, %v2063_v33  }
 0xe8c   :  { %2597 = vset.pattern.permute.xlu0 %v4308_v45 }
 0xe8d   :  { %2592 = vset.pattern.permute.xlu1 %v4293_v36 }
 0xe8e   :  { %2086 = vperm.xlu1 %2592, %v2063_v33  }
 0xe92   :  { %2593 = vset.pattern.permute.xlu1 %v4295_v19 }
 0xe93   :  { %2091 = vperm.xlu1 %2593, %v2063_v33  }
 0xe97   :  { %2595 = vset.pattern.permute.xlu1 %v4309_v49 }
 0xe98   :  { %1032 = vperm.xlu1 %2595, %v999_v20  }
 0xe9c   :  { %1564 = vperm.xlu1 %2595, %v1531_v30  }
 0xea0   :  { %2596 = vset.pattern.permute.xlu1 %v4307_v34 }
 0xed1   :  { %v502_v23 = vpop.permute.xlu1 %501  ;;  %v507_v50 = vpop.permute.xlu0 %506 }
 0xed2   :  { %v509_v1 = vmul.f32 %v3560_v35, %v507_v50  ;;  %v504_v6 = vmul.f32 %v3554_v63, %v502_v23  ;;  %v1001_v63 = vmul.f32 %v3585_v62, %v507_v50  ;;  %v4341_v50 = vld [vmem:[#allocation12_spill] sm:$0xff] }
 0xed4   :  { %v525_v27 = vadd.f32 %v509_v1, %v504_v6  ;;  %v4343_v6 = vld [vmem:[#allocation6_spill] sm:$0xff] }
 0xed6   :  { %v512_v43 = vpop.permute.xlu1 %511 }
 0xed7   :  { %v514_v61 = vmul.f32 %v3572_v7, %v512_v43  ;;  %v1000_v7 = vmul.f32 %v3579_v44, %v502_v23  ;;  %v1002_v10 = vmul.f32 %v3597_v53, %v512_v43  ;;  %v4339_v23 = vld [vmem:[#allocation4_spill] sm:$0xff] }
 0xed9   :  { %v1005_v20 = vadd.f32 %v1001_v63, %v1000_v7 }
 0xedb   :  { %v517_v16 = vpop.permute.xlu1 %516 }
 0xedc   :  { %v519_v40 = vmul.f32 %v3566_v13, %v517_v16  ;;  %v1003_v13 = vmul.f32 %v3591_v46, %v517_v16 }
 0xede   :  { %v526_v51 = vadd.f32 %v519_v40, %v514_v61  ;;  %v1006_v32 = vadd.f32 %v1003_v13, %v1002_v10  ;;  %v4348_v10 = vld [vmem:[#allocation2_spill] sm:$0xff] }
 0xee0   :  { %v527_v31 = vadd.f32 %v526_v51, %v525_v27  ;;  %v1007_v30 = vadd.f32 %v1006_v32, %v1005_v20  ;;  %v4344_v51 = vld [vmem:[#allocation11_spill] sm:$0xff] }
 0xeef   :  { %v1013_v3 = vpop.permute.xlu0 %1012  ;;  %v1018_v11 = vpop.permute.xlu1 %1017 }
 0xef0   :  { %v1015_v15 = vmul.f32 %v4324_v25, %v1013_v3  ;;  %v1532_v62 = vmul.f32 %v3649_v55, %v1013_v3  ;;  %v1020_v44 = vmul.f32 %v4328_v8, %v1018_v11  ;;  %v4340_v25 = vld [vmem:[#allocation9_spill] sm:$0xff]  ;;  %v4342_v3 = vld [vmem:[#allocation10_spill] sm:$0xff]  ;;  %v1533_v61 = vmul.f32 %v4343_v6, %v1018_v11 }
 0xef2   :  { %v1036_v63 = vadd.f32 %v1020_v44, %v1015_v15 }
 0xef4   :  { %v1028_v17 = vpop.permute.xlu0 %1027  ;;  %v1023_v22 = vpop.permute.xlu1 %1022 }
 0xef5   :  { %v1030_v48 = vmul.f32 %v4326_v39, %v1028_v17  ;;  %v1025_v46 = vmul.f32 %v4325_v4, %v1023_v22  ;;  %v1535_v33 = vmul.f32 %v4327_v5, %v1028_v17  ;;  %v1534_v39 = vmul.f32 %v4339_v23, %v1023_v22  ;;  %v3913_v4 = vld [vmem:[%s4219_s1 + $0x23] ss:$0 sm:$0xff]  ;;  %v3922_v5 = vld [vmem:[%s4219_s1 + $0x24] ss:$0 sm:$0xff]  ;;  %v3928_v22 = vld [vmem:[%s4219_s1 + $0x25] ss:$0 sm:$0xff] }
 0xef7   :  { %v1538_v7 = vadd.f32 %v1535_v33, %v1534_v39 }
 0xef9   :  { %v1555_v57 = vpop.permute.xlu0 %1554  ;;  %v1545_v59 = vpop.permute.xlu1 %1544 }
 0xefa   :  { %v1557_v27 = vmul.f32 %v4344_v51, %v1555_v57  ;;  %v1547_v32 = vmul.f32 %v4348_v10, %v1545_v59 }
 0xefe   :  { %v2082_v41 = vpop.permute.xlu0 %2081  ;;  %v1550_v26 = vpop.permute.xlu1 %1549 }
 0xeff   :  { %v2084_v55 = vmul.f32 %v3913_v4, %v2082_v41  ;;  %v1037_v41 = vadd.f32 %v1030_v48, %v1025_v46 }
 0xf01   :  { %v1038_v6 = vadd.f32 %v1037_v41, %v1036_v63 }
 0xf03   :  { %v522_v9 = vpop.permute.xlu0 %521  ;;  %v1560_v56 = vpop.permute.xlu1 %1559 }
 0xf04   :  { %v524_v2 = vmul.f32 %v2932_v60, %v522_v9  ;;  %v1004_v8 = vmul.f32 %v4340_v25, %v522_v9  ;;  %v1562_v16 = vmul.f32 %v4341_v50, %v1560_v56  ;;  %v2067_v40 = vmul.f32 %v4342_v3, %v1560_v56  ;;  %v4345_v9 = vld [vmem:[#allocation8_spill] sm:$0xff]  ;;  %v4346_v60 = vld [vmem:[#allocation3_spill] sm:$0xff] }
 0xf05   :  { %v2066_v56 = vmul.f32 %v4345_v9, %v1555_v57 }
 0xf06   :  { %v528_v14 = vadd.f32 %v527_v31, %v524_v2  ;;  %v1552_v2 = vmul.f32 %v4346_v60, %v1550_v26  ;;  %v4347_v31 = vld [vmem:[#allocation7_spill] sm:$0xff]  ;;  %v1008_v11 = vadd.f32 %v1007_v30, %v1004_v8  ;;  %v1569_v48 = vadd.f32 %v1562_v16, %v1557_v27 }
 0xf07   :  { %v2097_v23 = vpop.permute.xlu0 %2096  ;;  %v2070_v46 = vadd.f32 %v2067_v40, %v2066_v56 }
 0xf08   :  { %v530_v35 = vrot.slane %v528_v14, 6  ;;  %v2077_v18 = vpop.permute.xlu1 %2076  ;;  %v2065_v14 = vmul.f32 %v4347_v31, %v1550_v26  ;;  %v1568_v15 = vadd.f32 %v1552_v2, %v1547_v32 }
 0xf0a   :  { %v3894_v38 = vadd.f32 %v530_v35, %v3478_v29  ;;  %v3905_v29 = vld [vmem:[%s4219_s1 + $0x22] ss:$0 sm:$0xff] }
 0xf0b   :  { %v2079_v53 = vmul.f32 %v3905_v29, %v2077_v18 }
 0xf0c   :  { %2814 = vtanh.f32 %v3894_v38 }
 0xf0d   :  { %v2087_v42 = vpop.permute.xlu1 %2086  ;;  %v2100_v13 = vadd.f32 %v2084_v55, %v2079_v53 }
 0xf0e   :  { %v2089_v17 = vmul.f32 %v3922_v5, %v2087_v42  ;;  %v4349_v42 = vld [vmem:[#allocation5_spill] sm:$0xff] }
 0xf0f   :  { %v2064_v20 = vmul.f32 %v4349_v42, %v1545_v59  ;;  %v3944_v59 = vld [vmem:[%s4219_s1 + $0x26] ss:$0 sm:$0xff] }
 0xf10   :  { %v2099_v30 = vmul.f32 %v3944_v59, %v2097_v23  ;;  %v2415_v23 = vmul.f32 -1.442695, %v3894_v38 }
 0xf11   :  { %v2069_v44 = vadd.f32 %v2065_v14, %v2064_v20 }
 0xf12   :  { %v2092_v43 = vpop.permute.xlu1 %2091 }
 0xf13   :  { %v2094_v1 = vmul.f32 %v3928_v22, %v2092_v43  ;;  %v1537_v43 = vadd.f32 %v1533_v61, %v1532_v62  ;;  %v3950_v62 = vld [vmem:[%s4219_s1 + $0x28] ss:$0 sm:$0xff]  ;;  %v2071_v8 = vadd.f32 %v2070_v46, %v2069_v44 }
 0xf15   :  { %v2101_v35 = vadd.f32 %v2094_v1, %v2089_v17  ;;  %v1539_v33 = vadd.f32 %v1538_v7, %v1537_v43 }
 0xf16   :  { %v2815_v18 = vpop.eup %2814 }
 0xf17   :  { %v2102_v25 = vadd.f32 %v2101_v35, %v2100_v13  ;;  %545 = vrot.lane.b32.xlu1 %v2815_v18, %s2970_s21  ;;  %v1033_v57 = vpop.permute.xlu1 %1032 }
 0xf18   :  { %v1035_v26 = vmul.f32 %v3670_v0, %v1033_v57  ;;  %v1536_v53 = vmul.f32 %v3676_v47, %v1033_v57  ;;  %v1009_v0 = vadd.f32 %v3950_v62, %v1008_v11  ;;  %v1570_v47 = vadd.f32 %v1569_v48, %v1568_v15 }
 0xf19   :  { %v2103_v55 = vadd.f32 %v2102_v25, %v2099_v30 }
 0xf1a   :  { %v1039_v39 = vadd.f32 %v1038_v6, %v1035_v26  ;;  %v1540_v17 = vadd.f32 %v1539_v33, %v1536_v53 }
 0xf1b   :  { %v1565_v16 = vpop.permute.xlu1 %1564  ;;  %v2105_v2 = vrot.slane %v2103_v55, 6 }
 0xf1c   :  { %v1041_v40 = vrot.slane %v1039_v39, 6  ;;  %v1567_v1 = vmul.f32 %v3820_v37, %v1565_v16  ;;  %v2068_v61 = vmul.f32 %v3826_v52, %v1565_v16  ;;  %v1541_v14 = vadd.f32 %v3687_v28, %v1540_v17 }
 0xf1e   :  { %v1043_v41 = vadd.f32 %v1041_v40, %v1009_v0  ;;  %v1571_v27 = vadd.f32 %v1570_v47, %v1567_v1  ;;  %v2072_v56 = vadd.f32 %v2071_v8, %v2068_v61  ;;  %v541_v1 = vrot.slane %v3845_v58, 6 }
 0xf20   :  { %2816 = vtanh.f32 %v1043_v41  ;;  %v1573_v13 = vrot.slane %v1571_v27, 6  ;;  %v2073_v35 = vadd.f32 %v3833_v24, %v2072_v56  ;;  %v2433_v48 = vmul.f32 -1.442695, %v1043_v41 }
 0xf22   :  { %v1575_v18 = vadd.f32 %v1573_v13, %v1541_v14  ;;  %v2107_v63 = vadd.f32 %v2105_v2, %v2073_v35  ;;  %v1052_v2 = vrot.slane %v3851_v12, 6  ;;  %v1584_v35 = vrot.slane %v3855_v54, 6 }
 0xf24   :  { %2818 = vtanh.f32 %v1575_v18  ;;  %v2451_v46 = vmul.f32 -1.442695, %v1575_v18  ;;  %v2469_v25 = vmul.f32 -1.442695, %v2107_v63 }
 0xf25   :  { %2820 = vtanh.f32 %v2107_v63  ;;  %v2116_v63 = vrot.slane %v3857_v21, 6 }
 0xf26   :  { %2822 = vpow2.f32 %v2415_v23 }
 0xf2a   :  { %v2817_v7 = vpop.eup %2816 }
 0xf2b   :  { %1056 = vrot.lane.b32.xlu0 %v2817_v7, %s2970_s21 }
 0xf2e   :  { %v2819_v32 = vpop.eup %2818 }
 0xf2f   :  { %v2821_v20 = vpop.eup %2820  ;;  %1588 = vrot.lane.b32.xlu1 %v2819_v32, %s2970_s21 }
 0xf30   :  { %2120 = vrot.lane.b32.xlu0 %v2821_v20, %s2970_s21  ;;  %v2823_v28 = vpop.eup %2822 }
 0xf31   :  { %v536_v11 = vadd.f32 1.0, %v2823_v28 }
 0xf33   :  { %2824 = vrcp.f32 %v536_v11 }
 0xf34   :  { %2826 = vpow2.f32 %v2433_v48 }
 0xf35   :  { %2828 = vpow2.f32 %v2451_v46 }
 0xf36   :  { %2830 = vpow2.f32 %v2469_v25 }
 0xf3d   :  { %v2825_v57 = vpop.eup %2824 }
 0xf3e   :  { %v2827_v26 = vpop.eup %2826  ;;  %v543_v61 = vmul.f32 %v2825_v57, %v541_v1 }
 0xf3f   :  { %v1047_v53 = vadd.f32 1.0, %v2827_v26  ;;  %v2829_v15 = vpop.eup %2828 }
 0xf40   :  { %v2831_v44 = vpop.eup %2830  ;;  %v1579_v38 = vadd.f32 1.0, %v2829_v15 }
 0xf41   :  { %2832 = vrcp.f32 %v1047_v53  ;;  %v2111_v30 = vadd.f32 1.0, %v2831_v44 }
 0xf42   :  { %2834 = vrcp.f32 %v1579_v38 }
 0xf43   :  { %2836 = vrcp.f32 %v2111_v30 }
 0xf4b   :  { %v2833_v33 = vpop.eup %2832 }
 0xf4c   :  { %v2835_v55 = vpop.eup %2834  ;;  %v1054_v14 = vmul.f32 %v2833_v33, %v1052_v2 }
 0xf4d   :  { %v2837_v8 = vpop.eup %2836  ;;  %v1586_v58 = vmul.f32 %v2835_v55, %v1584_v35 }
 0xf4e   :  { %v2118_v7 = vmul.f32 %v2837_v8, %v2116_v63 }
 0xf89   :  { %v546_v43 = vpop.permute.xlu1 %545 }
 0xf8a   :  { %v548_v6 = vmul.f32 %v2825_v57, %v546_v43 }
 0xf8c   :  { %550 = vrot.lane.b32.xlu1 %v548_v6, %s2977_s17 }
 0xf9d   :  { %v1057_v39 = vpop.permute.xlu0 %1056 }
 0xf9e   :  { %v1059_v0 = vmul.f32 %v2833_v33, %v1057_v39 }
 0xfa0   :  { %1061 = vrot.lane.b32.xlu0 %v1059_v0, %s2977_s17 }
 0xfa1   :  { %v1589_v47 = vpop.permute.xlu1 %1588 }
 0xfa2   :  { %v2121_v16 = vpop.permute.xlu0 %2120  ;;  %v1591_v40 = vmul.f32 %v2835_v55, %v1589_v47 }
 0xfa3   :  { %v2123_v17 = vmul.f32 %v2837_v8, %v2121_v16 }
 0xfa4   :  { %1593 = vrot.lane.b32.xlu1 %v1591_v40, %s2977_s17  ;;  %v2939_v40 = vld [vmem:[%s4219_s1 + $0x7] ss:$0 sm:$0xff] }
 0xfa5   :  { %2125 = vrot.lane.b32.xlu0 %v2123_v17, %s2977_s17 }
 0xffe   :  { %v551_v41 = vpop.permute.xlu1 %550 }
 0xfff   :  { %v553_v27 = vadd.f32 %v551_v41, %v543_v61  ;;  %v2940_v41 = vld [vmem:[%s4219_s1 + $0x5] ss:$0 sm:$0xff] }
0x1001   :  { %2838 = vtanh.f32 %v553_v27 }
0x100b   :  { %v2839_v56 = vpop.eup %2838 }
0x100c   :  { %556 = vrot.lane.b32.xlu1 %v2839_v56, %s2977_s17  ;;  %v2941_v56 = vld [vmem:[%s4219_s1 + $0x4] ss:$0 sm:$0xff] }
0x1012   :  { %v1062_v13 = vpop.permute.xlu0 %1061 }
0x1013   :  { %v3969_v18 = vadd.f32 %v1062_v13, %v1054_v14  ;;  %v2942_v14 = vld [vmem:[%s4219_s1 + $0x6] ss:$0 sm:$0xff] }
0x1015   :  { %2840 = vtanh.f32 %v3969_v18 }
0x1016   :  { %v1594_v32 = vpop.permute.xlu1 %1593 }
0x1017   :  { %v2126_v20 = vpop.permute.xlu0 %2125  ;;  %v3973_v23 = vadd.f32 %v1594_v32, %v1586_v58  ;;  %v2943_v32 = vld [vmem:[%s4219_s1 + $0x1b] ss:$0 sm:$0xff] }
0x1018   :  { %v3975_v28 = vadd.f32 %v2126_v20, %v2118_v7 }
0x1019   :  { %2842 = vtanh.f32 %v3973_v23 }
0x101a   :  { %2844 = vtanh.f32 %v3975_v28 }
0x101f   :  { %v2841_v12 = vpop.eup %2840 }
0x1020   :  { %1067 = vrot.lane.b32.xlu0 %v2841_v12, %s2977_s17  ;;  %v2944_v12 = vld [vmem:[%s4219_s1 + $0x1a] ss:$0 sm:$0xff] }
0x1023   :  { %v2843_v54 = vpop.eup %2842 }
0x1024   :  { %v2845_v11 = vpop.eup %2844  ;;  %1599 = vrot.lane.b32.xlu1 %v2843_v54, %s2977_s17 }
0x1025   :  { %2131 = vrot.lane.b32.xlu0 %v2845_v11, %s2977_s17 }
0x107e   :  { %v557_v21 = vpop.permute.xlu1 %556 }
0x107f   :  { %v559_v48 = vmul.f32 %v2825_v57, %v557_v21  ;;  %v2945_v21 = vld [vmem:[%s4219_s1 + $0x18] ss:$0 sm:$0xff] }
0x1081   :  { %1078 = vperm.xlu0 %2597, %v559_v48   ;;  %1073 = vperm.xlu1 %2596, %v559_v48  }
0x1085   :  { %2598 = vset.pattern.permute.xlu1 %v4293_v36  ;;  %2600 = vset.pattern.permute.xlu0 %v4307_v34 }
0x1086   :  { %1083 = vperm.xlu1 %2598, %v559_v48  }
0x108a   :  { %2599 = vset.pattern.permute.xlu1 %v4295_v19 }
0x108b   :  { %1088 = vperm.xlu1 %2599, %v559_v48  }
0x108f   :  { %2601 = vset.pattern.permute.xlu1 %v4308_v45 }
0x1092   :  { %v1068_v46 = vpop.permute.xlu0 %1067 }
0x1093   :  { %v1070_v25 = vmul.f32 %v2833_v33, %v1068_v46  ;;  %v4024_v46 = vld [vmem:[%s4219_s1 + $0x9] ss:$0 sm:$0xff] }
0x1095   :  { %1104 = vperm.xlu0 %2600, %v1070_v25   ;;  %1109 = vperm.xlu1 %2601, %v1070_v25  }
0x1096   :  { %v1600_v57 = vpop.permute.xlu1 %1599 }
0x1097   :  { %v1602_v43 = vmul.f32 %v2835_v55, %v1600_v57  ;;  %v2132_v6 = vpop.permute.xlu0 %2131  ;;  %v2947_v57 = vld [vmem:[%s4219_s1 + $0x19] ss:$0 sm:$0xff] }
0x1098   :  { %v2134_v26 = vmul.f32 %v2837_v8, %v2132_v6 }
0x1099   :  { %2603 = vset.pattern.permute.xlu0 %v4295_v19  ;;  %2602 = vset.pattern.permute.xlu1 %v4293_v36 }
0x109a   :  { %1119 = vperm.xlu0 %2603, %v1070_v25   ;;  %1114 = vperm.xlu1 %2602, %v1070_v25  }
0x109e   :  { %2606 = vset.pattern.permute.xlu0 %v4293_v36  ;;  %2604 = vset.pattern.permute.xlu1 %v4307_v34 }
0x109f   :  { %1625 = vperm.xlu0 %2606, %v1602_v43   ;;  %1615 = vperm.xlu1 %2604, %v1602_v43  }
0x10a3   :  { %2609 = vset.pattern.permute.xlu0 %v4308_v45  ;;  %2605 = vset.pattern.permute.xlu1 %v4308_v45 }
0x10a4   :  { %2152 = vperm.xlu0 %2609, %v2134_v26   ;;  %1620 = vperm.xlu1 %2605, %v1602_v43  }
0x10a8   :  { %2612 = vset.pattern.permute.xlu0 %v4309_v49  ;;  %2607 = vset.pattern.permute.xlu1 %v4295_v19 }
0x10a9   :  { %1093 = vperm.xlu0 %2612, %v559_v48   ;;  %1630 = vperm.xlu1 %2607, %v1602_v43  }
0x10ad   :  { %2167 = vperm.xlu0 %2612, %v2134_v26   ;;  %2608 = vset.pattern.permute.xlu1 %v4307_v34 }
0x10ae   :  { %2147 = vperm.xlu1 %2608, %v2134_v26  }
0x10b1   :  { %2614 = vset.pattern.permute.xlu0 %v4307_v34 }
0x10b2   :  { %2610 = vset.pattern.permute.xlu1 %v4293_v36 }
0x10b3   :  { %2157 = vperm.xlu1 %2610, %v2134_v26  }
0x10b7   :  { %2611 = vset.pattern.permute.xlu1 %v4295_v19 }
0x10b8   :  { %2162 = vperm.xlu1 %2611, %v2134_v26   ;;  %v4034_v26 = vld [vmem:[%s4219_s1 + $0xc] ss:$0 sm:$0xff] }
0x10bc   :  { %2613 = vset.pattern.permute.xlu1 %v4309_v49 }
0x10bd   :  { %1124 = vperm.xlu1 %2613, %v1070_v25  }
0x10c1   :  { %1635 = vperm.xlu1 %2613, %v1602_v43  }
0x10c5   :  { %2615 = vset.pattern.permute.xlu1 %v4308_v45 }
0x1100   :  { %v1074_v53 = vpop.permute.xlu1 %1073  ;;  %v1079_v30 = vpop.permute.xlu0 %1078 }
0x1101   :  { %v1081_v27 = vmul.f32 %v2940_v41, %v1079_v30  ;;  %v1076_v2 = vmul.f32 %v2941_v56, %v1074_v53 }
0x1103   :  { %v1097_v58 = vadd.f32 %v1081_v27, %v1076_v2 }
0x1105   :  { %v1084_v15 = vpop.permute.xlu1 %1083 }
0x1106   :  { %v1086_v13 = vmul.f32 %v2942_v14, %v1084_v15  ;;  %v4040_v15 = vld [vmem:[%s4219_s1 + $0xb] ss:$0 sm:$0xff] }
0x110a   :  { %v1089_v44 = vpop.permute.xlu1 %1088 }
0x110b   :  { %v1091_v17 = vmul.f32 %v2939_v40, %v1089_v44 }
0x110d   :  { %v1098_v35 = vadd.f32 %v1091_v17, %v1086_v13 }
0x110f   :  { %v1099_v11 = vadd.f32 %v1098_v35, %v1097_v58 }
0x1114   :  { %v1110_v38 = vpop.permute.xlu1 %1109  ;;  %v1105_v39 = vpop.permute.xlu0 %1104 }
0x1115   :  { %v1107_v48 = vmul.f32 %v2945_v21, %v1105_v39  ;;  %v1603_v25 = vmul.f32 %v4024_v46, %v1105_v39  ;;  %v1112_v43 = vmul.f32 %v2947_v57, %v1110_v38  ;;  %v2950_v39 = vld [vmem:[%s4219_s1 + $0x8] ss:$0 sm:$0xff] }
0x1117   :  { %v1128_v35 = vadd.f32 %v1112_v43, %v1107_v48 }
0x1119   :  { %v1115_v33 = vpop.permute.xlu1 %1114  ;;  %v1120_v55 = vpop.permute.xlu0 %1119 }
0x111a   :  { %v1122_v20 = vmul.f32 %v2943_v32, %v1120_v55  ;;  %v1117_v54 = vmul.f32 %v2944_v12, %v1115_v33  ;;  %v1606_v53 = vmul.f32 %v4034_v26, %v1120_v55  ;;  %v1605_v44 = vmul.f32 %v4040_v15, %v1115_v33  ;;  %v4054_v33 = vld [vmem:[%s4219_s1 + $0xa] ss:$0 sm:$0xff] }
0x111c   :  { %v1129_v56 = vadd.f32 %v1122_v20, %v1117_v54 }
0x111e   :  { %v1616_v0 = vpop.permute.xlu1 %1615  ;;  %v1626_v8 = vpop.permute.xlu0 %1625 }
0x111f   :  { %v1628_v2 = vmul.f32 %v4344_v51, %v1626_v8  ;;  %v2137_v14 = vmul.f32 %v4345_v9, %v1626_v8  ;;  %v1618_v58 = vmul.f32 %v4348_v10, %v1616_v0  ;;  %v1130_v9 = vadd.f32 %v1129_v56, %v1128_v35 }
0x1123   :  { %v1621_v47 = vpop.permute.xlu1 %1620  ;;  %v2153_v61 = vpop.permute.xlu0 %2152 }
0x1124   :  { %v2155_v30 = vmul.f32 %v3913_v4, %v2153_v61  ;;  %v1604_v61 = vmul.f32 %v4054_v33, %v1110_v38 }
0x1126   :  { %v1608_v21 = vadd.f32 %v1604_v61, %v1603_v25 }
0x1128   :  { %v1631_v16 = vpop.permute.xlu1 %1630  ;;  %v1094_v7 = vpop.permute.xlu0 %1093 }
0x1129   :  { %v1096_v40 = vmul.f32 %v2950_v39, %v1094_v7  ;;  %v2138_v41 = vmul.f32 %v4342_v3, %v1631_v16  ;;  %v2136_v3 = vmul.f32 %v4347_v31, %v1621_v47  ;;  %v2135_v7 = vmul.f32 %v4349_v42, %v1616_v0 }
0x112b   :  { %v1100_v12 = vadd.f32 %v1099_v11, %v1096_v40  ;;  %v2141_v20 = vadd.f32 %v2138_v41, %v2137_v14  ;;  %v2140_v0 = vadd.f32 %v2136_v3, %v2135_v7 }
0x112c   :  { %v2168_v32 = vpop.permute.xlu0 %2167 }
0x112d   :  { %v2148_v1 = vpop.permute.xlu1 %2147  ;;  %v2170_v8 = vmul.f32 %v3944_v59, %v2168_v32  ;;  %v1101_v25 = vadd.f32 %v3950_v62, %v1100_v12 }
0x112e   :  { %v2150_v6 = vmul.f32 %v3905_v29, %v2148_v1  ;;  %v1633_v1 = vmul.f32 %v4341_v50, %v1631_v16  ;;  %v1623_v50 = vmul.f32 %v4346_v60, %v1621_v47  ;;  %v2952_v60 = vld [vmem:[%s4219_s1 + $0x1c] ss:$0 sm:$0xff]  ;;  %v4069_v47 = vld [vmem:[%s4219_s1 + $0xd] ss:$0 sm:$0xff] }
0x1130   :  { %v2171_v16 = vadd.f32 %v2155_v30, %v2150_v6  ;;  %v1640_v38 = vadd.f32 %v1633_v1, %v1628_v2  ;;  %v1639_v42 = vadd.f32 %v1623_v50, %v1618_v58  ;;  %v2142_v6 = vadd.f32 %v2141_v20, %v2140_v0 }
0x1132   :  { %v2158_v63 = vpop.permute.xlu1 %2157  ;;  %v1641_v43 = vadd.f32 %v1640_v38, %v1639_v42 }
0x1133   :  { %v2160_v55 = vmul.f32 %v3922_v5, %v2158_v63  ;;  %v1609_v63 = vadd.f32 %v1606_v53, %v1605_v44 }
0x1135   :  { %v1610_v11 = vadd.f32 %v1609_v63, %v1608_v21 }
0x1137   :  { %v2163_v17 = vpop.permute.xlu1 %2162 }
0x1138   :  { %v2165_v27 = vmul.f32 %v3928_v22, %v2163_v17 }
0x113a   :  { %v2172_v13 = vadd.f32 %v2165_v27, %v2160_v55  ;;  %v4079_v27 = vld [vmem:[%s4219_s1 + $0x29] ss:$0 sm:$0xff] }
0x113c   :  { %v2173_v54 = vadd.f32 %v2172_v13, %v2171_v16  ;;  %v1125_v51 = vpop.permute.xlu1 %1124 }
0x113d   :  { %v1127_v31 = vmul.f32 %v2952_v60, %v1125_v51  ;;  %v1607_v10 = vmul.f32 %v4069_v47, %v1125_v51 }
0x113e   :  { %v2174_v57 = vadd.f32 %v2173_v54, %v2170_v8  ;;  %v1655_v8 = vrot.slane %v3973_v23, 6 }
0x113f   :  { %v1131_v48 = vadd.f32 %v1130_v9, %v1127_v31  ;;  %v1611_v30 = vadd.f32 %v1610_v11, %v1607_v10  ;;  %v1144_v10 = vrot.slane %v3969_v18, 6 }
0x1140   :  { %v1636_v53 = vpop.permute.xlu1 %1635  ;;  %v2176_v55 = vrot.slane %v2174_v57, 6 }
0x1141   :  { %v1133_v44 = vrot.slane %v1131_v48, 6  ;;  %v1638_v39 = vmul.f32 %v3820_v37, %v1636_v53  ;;  %v2139_v40 = vmul.f32 %v3826_v52, %v1636_v53  ;;  %v1612_v62 = vadd.f32 %v4079_v27, %v1611_v30 }
0x1142   :  { %v2187_v48 = vrot.slane %v3975_v28, 6 }
0x1143   :  { %v1135_v17 = vadd.f32 %v1133_v44, %v1101_v25  ;;  %v1642_v1 = vadd.f32 %v1641_v43, %v1638_v39  ;;  %v2143_v41 = vadd.f32 %v2142_v6, %v2139_v40 }
0x1145   :  { %2846 = vtanh.f32 %v1135_v17  ;;  %v1644_v61 = vrot.slane %v1642_v1, 6  ;;  %v2144_v56 = vadd.f32 %v3833_v24, %v2143_v41  ;;  %v2434_v3 = vmul.f32 -1.442695, %v1135_v17 }
0x1147   :  { %v1646_v2 = vadd.f32 %v1644_v61, %v1612_v62  ;;  %v2178_v14 = vadd.f32 %v2176_v55, %v2144_v56 }
0x1149   :  { %2848 = vtanh.f32 %v1646_v2  ;;  %v2452_v16 = vmul.f32 -1.442695, %v1646_v2  ;;  %v2470_v13 = vmul.f32 -1.442695, %v2178_v14 }
0x114a   :  { %2850 = vtanh.f32 %v2178_v14 }
0x114b   :  { %2852 = vpow2.f32 %v2434_v3 }
0x114c   :  { %2854 = vpow2.f32 %v2452_v16 }
0x114d   :  { %2856 = vpow2.f32 %v2470_v13 }
0x114f   :  { %v2847_v37 = vpop.eup %2846 }
0x1150   :  { %1148 = vrot.lane.b32.xlu1 %v2847_v37, %s2970_s21 }
0x1153   :  { %v2849_v52 = vpop.eup %2848 }
0x1154   :  { %v2851_v50 = vpop.eup %2850  ;;  %1659 = vrot.lane.b32.xlu0 %v2849_v52, %s2970_s21 }
0x1155   :  { %2191 = vrot.lane.b32.xlu1 %v2851_v50, %s2970_s21  ;;  %v2853_v24 = vpop.eup %2852 }
0x1156   :  { %v1139_v35 = vadd.f32 1.0, %v2853_v24  ;;  %v2855_v63 = vpop.eup %2854 }
0x1157   :  { %v2857_v58 = vpop.eup %2856  ;;  %v1650_v7 = vadd.f32 1.0, %v2855_v63 }
0x1158   :  { %2858 = vrcp.f32 %v1139_v35  ;;  %v2182_v32 = vadd.f32 1.0, %v2857_v58 }
0x1159   :  { %2860 = vrcp.f32 %v1650_v7  ;;  %v2955_v7 = vld [vmem:[%s4219_s1 + $0x20] ss:$0 sm:$0xff] }
0x115a   :  { %2862 = vrcp.f32 %v2182_v32 }
0x1162   :  { %v2859_v12 = vpop.eup %2858 }
0x1163   :  { %v2861_v54 = vpop.eup %2860  ;;  %v1146_v42 = vmul.f32 %v2859_v12, %v1144_v10 }
0x1164   :  { %v2863_v21 = vpop.eup %2862  ;;  %v1657_v25 = vmul.f32 %v2861_v54, %v1655_v8 }
0x1165   :  { %v2189_v57 = vmul.f32 %v2863_v21, %v2187_v48  ;;  %v4154_v48 = vld [vmem:[%s4219_s1 + $0xe] ss:$0 sm:$0xff] }
0x11c2   :  { %v1149_v38 = vpop.permute.xlu1 %1148 }
0x11c3   :  { %v1151_v20 = vmul.f32 %v2859_v12, %v1149_v38  ;;  %v2956_v38 = vld [vmem:[%s4219_s1 + $0x1f] ss:$0 sm:$0xff] }
0x11c5   :  { %1153 = vrot.lane.b32.xlu0 %v1151_v20, %s2977_s17 }
0x11c6   :  { %v1660_v51 = vpop.permute.xlu0 %1659 }
0x11c7   :  { %v1662_v9 = vmul.f32 %v2861_v54, %v1660_v51  ;;  %v2192_v60 = vpop.permute.xlu1 %2191 }
0x11c8   :  { %v2194_v31 = vmul.f32 %v2863_v21, %v2192_v60 }
0x11c9   :  { %1664 = vrot.lane.b32.xlu1 %v1662_v9, %s2977_s17 }
0x11ca   :  { %2196 = vrot.lane.b32.xlu0 %v2194_v31, %s2977_s17  ;;  %v4144_v31 = vld [vmem:[%s4219_s1 + $0x10] ss:$0 sm:$0xff] }
0x1237   :  { %v1154_v0 = vpop.permute.xlu0 %1153 }
0x1238   :  { %v1156_v11 = vadd.f32 %v1154_v0, %v1146_v42  ;;  %v2961_v42 = vld [vmem:[%s4219_s1 + $0x1d] ss:$0 sm:$0xff] }
0x123a   :  { %2864 = vtanh.f32 %v1156_v11 }
0x123b   :  { %v1665_v43 = vpop.permute.xlu1 %1664 }
0x123c   :  { %v2197_v6 = vpop.permute.xlu0 %2196  ;;  %v4092_v53 = vadd.f32 %v1665_v43, %v1657_v25 }
0x123d   :  { %v4094_v44 = vadd.f32 %v2197_v6, %v2189_v57 }
0x123e   :  { %2866 = vtanh.f32 %v4092_v53 }
0x123f   :  { %2868 = vtanh.f32 %v4094_v44 }
0x1244   :  { %v2865_v18 = vpop.eup %2864 }
0x1245   :  { %1159 = vrot.lane.b32.xlu1 %v2865_v18, %s2977_s17 }
0x1248   :  { %v2867_v23 = vpop.eup %2866 }
0x1249   :  { %v2869_v30 = vpop.eup %2868  ;;  %1670 = vrot.lane.b32.xlu0 %v2867_v23, %s2977_s17 }
0x124a   :  { %2202 = vrot.lane.b32.xlu1 %v2869_v30, %s2977_s17 }
0x12b7   :  { %v1160_v28 = vpop.permute.xlu1 %1159 }
0x12b8   :  { %v1162_v39 = vmul.f32 %v2859_v12, %v1160_v28 }
0x12ba   :  { %1681 = vperm.xlu1 %2615, %v1162_v39   ;;  %1676 = vperm.xlu0 %2614, %v1162_v39  }
0x12bb   :  { %v1671_v40 = vpop.permute.xlu0 %1670 }
0x12bc   :  { %v1673_v17 = vmul.f32 %v2861_v54, %v1671_v40  ;;  %v2203_v1 = vpop.permute.xlu1 %2202 }
0x12bd   :  { %v2205_v41 = vmul.f32 %v2863_v21, %v2203_v1  ;;  %v4137_v21 = vld [vmem:[%s4219_s1 + $0xf] ss:$0 sm:$0xff]  ;;  %v2963_v1 = vld [vmem:[%s4219_s1 + $0x21] ss:$0 sm:$0xff] }
0x12be   :  { %2616 = vset.pattern.permute.xlu1 %v4293_v36  ;;  %2617 = vset.pattern.permute.xlu0 %v4295_v19 }
0x12bf   :  { %1686 = vperm.xlu1 %2616, %v1162_v39   ;;  %1691 = vperm.xlu0 %2617, %v1162_v39  }
0x12c3   :  { %2618 = vset.pattern.permute.xlu1 %v4307_v34  ;;  %2620 = vset.pattern.permute.xlu0 %v4293_v36 }
0x12c4   :  { %1707 = vperm.xlu1 %2618, %v1673_v17   ;;  %1717 = vperm.xlu0 %2620, %v1673_v17  }
0x12c8   :  { %2619 = vset.pattern.permute.xlu1 %v4308_v45  ;;  %2623 = vset.pattern.permute.xlu0 %v4308_v45 }
0x12c9   :  { %1712 = vperm.xlu1 %2619, %v1673_v17   ;;  %2223 = vperm.xlu0 %2623, %v2205_v41  }
0x12cd   :  { %2621 = vset.pattern.permute.xlu1 %v4295_v19  ;;  %2626 = vset.pattern.permute.xlu0 %v4309_v49 }
0x12ce   :  { %1722 = vperm.xlu1 %2621, %v1673_v17   ;;  %1696 = vperm.xlu0 %2626, %v1162_v39  }
0x12d2   :  { %2622 = vset.pattern.permute.xlu1 %v4307_v34  ;;  %2628 = vset.pattern.permute.xlu0 %v4307_v34 }
0x12d3   :  { %2218 = vperm.xlu1 %2622, %v2205_v41  }
0x12d7   :  { %2624 = vset.pattern.permute.xlu1 %v4293_v36 }
0x12d8   :  { %2228 = vperm.xlu1 %2624, %v2205_v41  }
0x12dc   :  { %2625 = vset.pattern.permute.xlu1 %v4295_v19 }
0x12dd   :  { %2233 = vperm.xlu1 %2625, %v2205_v41  }
0x12e1   :  { %2627 = vset.pattern.permute.xlu1 %v4309_v49 }
0x12e2   :  { %1727 = vperm.xlu1 %2627, %v1673_v17  }
0x12e6   :  { %2238 = vperm.xlu1 %2627, %v2205_v41  }
0x12ea   :  { %2629 = vset.pattern.permute.xlu1 %v4308_v45 }
0x1339   :  { %v1682_v55 = vpop.permute.xlu1 %1681  ;;  %v1677_v61 = vpop.permute.xlu0 %1676 }
0x133a   :  { %v1679_v35 = vmul.f32 %v4024_v46, %v1677_v61  ;;  %v1684_v63 = vmul.f32 %v4054_v33, %v1682_v55  ;;  %v4131_v46 = vld [vmem:[%s4219_s1 + $0x11] ss:$0 sm:$0xff]  ;;  %v4166_v55 = vld [vmem:[%s4219_s1 + $0x12] ss:$0 sm:$0xff] }
0x133c   :  { %v1700_v51 = vadd.f32 %v1684_v63, %v1679_v35  ;;  %v4174_v35 = vld [vmem:[%s4219_s1 + $0x2a] ss:$0 sm:$0xff] }
0x133e   :  { %v1687_v62 = vpop.permute.xlu1 %1686  ;;  %v1692_v2 = vpop.permute.xlu0 %1691 }
0x133f   :  { %v1694_v16 = vmul.f32 %v4034_v26, %v1692_v2  ;;  %v1689_v13 = vmul.f32 %v4040_v15, %v1687_v62  ;;  %v2957_v26 = vld [vmem:[%s4219_s1 + $0x1e] ss:$0 sm:$0xff] }
0x1341   :  { %v1701_v12 = vadd.f32 %v1694_v16, %v1689_v13 }
0x1343   :  { %v1708_v56 = vpop.permute.xlu1 %1707  ;;  %v1718_v52 = vpop.permute.xlu0 %1717  ;;  %v1702_v25 = vadd.f32 %v1701_v12, %v1700_v51 }
0x1344   :  { %v1720_v20 = vmul.f32 %v2956_v38, %v1718_v52  ;;  %v2208_v10 = vmul.f32 %v4144_v31, %v1718_v52  ;;  %v1710_v0 = vmul.f32 %v2961_v42, %v1708_v56 }
0x1348   :  { %v1713_v14 = vpop.permute.xlu1 %1712  ;;  %v2224_v3 = vpop.permute.xlu0 %2223 }
0x1349   :  { %v1715_v15 = vmul.f32 %v2957_v26, %v1713_v14  ;;  %v2207_v9 = vmul.f32 %v4137_v21, %v1713_v14  ;;  %v2226_v23 = vmul.f32 %v3913_v4, %v2224_v3 }
0x134b   :  { %v1731_v57 = vadd.f32 %v1715_v15, %v1710_v0  ;;  %v1747_v0 = vrot.slane %v4092_v53, 6 }
0x134d   :  { %v1723_v37 = vpop.permute.xlu1 %1722  ;;  %v1697_v58 = vpop.permute.xlu0 %1696 }
0x134e   :  { %v1725_v32 = vmul.f32 %v2955_v7, %v1723_v37  ;;  %v2209_v33 = vmul.f32 %v4131_v46, %v1723_v37  ;;  %v1699_v60 = vmul.f32 %v4069_v47, %v1697_v58  ;;  %v2206_v47 = vmul.f32 %v4154_v48, %v1708_v56 }
0x1350   :  { %v1732_v8 = vadd.f32 %v1725_v32, %v1720_v20  ;;  %v2212_v43 = vadd.f32 %v2209_v33, %v2208_v10  ;;  %v2211_v30 = vadd.f32 %v2207_v9, %v2206_v47  ;;  %v1703_v28 = vadd.f32 %v1702_v25, %v1699_v60 }
0x1351   :  { %v2258_v47 = vrot.slane %v4094_v44, 6 }
0x1352   :  { %v2219_v50 = vpop.permute.xlu1 %2218  ;;  %v1733_v17 = vadd.f32 %v1732_v8, %v1731_v57  ;;  %v2213_v56 = vadd.f32 %v2212_v43, %v2211_v30  ;;  %v1704_v14 = vadd.f32 %v4079_v27, %v1703_v28 }
0x1353   :  { %v2221_v6 = vmul.f32 %v3905_v29, %v2219_v50 }
0x1355   :  { %v2242_v61 = vadd.f32 %v2226_v23, %v2221_v6 }
0x1357   :  { %v2229_v24 = vpop.permute.xlu1 %2228 }
0x1358   :  { %v2231_v18 = vmul.f32 %v3922_v5, %v2229_v24 }
0x135c   :  { %v2234_v54 = vpop.permute.xlu1 %2233 }
0x135d   :  { %v2236_v11 = vmul.f32 %v3928_v22, %v2234_v54 }
0x135f   :  { %v2243_v40 = vadd.f32 %v2236_v11, %v2231_v18 }
0x1361   :  { %v1728_v39 = vpop.permute.xlu1 %1727  ;;  %v2244_v3 = vadd.f32 %v2243_v40, %v2242_v61 }
0x1362   :  { %v1730_v41 = vmul.f32 %v2963_v1, %v1728_v39  ;;  %v2210_v62 = vmul.f32 %v4166_v55, %v1728_v39 }
0x1364   :  { %v1734_v2 = vadd.f32 %v1733_v17, %v1730_v41  ;;  %v2214_v50 = vadd.f32 %v2213_v56, %v2210_v62 }
0x1365   :  { %v2239_v37 = vpop.permute.xlu1 %2238 }
0x1366   :  { %v1736_v52 = vrot.slane %v1734_v2, 6  ;;  %v2241_v16 = vmul.f32 %v3944_v59, %v2239_v37  ;;  %v2215_v63 = vadd.f32 %v4174_v35, %v2214_v50 }
0x1368   :  { %v1738_v13 = vadd.f32 %v1736_v52, %v1704_v14  ;;  %v2245_v24 = vadd.f32 %v2244_v3, %v2241_v16 }
0x136a   :  { %2870 = vtanh.f32 %v1738_v13  ;;  %v2247_v58 = vrot.slane %v2245_v24, 6  ;;  %v2453_v12 = vmul.f32 -1.442695, %v1738_v13 }
0x136c   :  { %v2249_v7 = vadd.f32 %v2247_v58, %v2215_v63 }
0x136e   :  { %2872 = vtanh.f32 %v2249_v7  ;;  %v2471_v38 = vmul.f32 -1.442695, %v2249_v7 }
0x136f   :  { %2874 = vpow2.f32 %v2453_v12 }
0x1370   :  { %2876 = vpow2.f32 %v2471_v38 }
0x1374   :  { %v2871_v27 = vpop.eup %2870 }
0x1375   :  { %1751 = vrot.lane.b32.xlu0 %v2871_v27, %s2970_s21 }
0x1378   :  { %v2873_v32 = vpop.eup %2872 }
0x1379   :  { %2262 = vrot.lane.b32.xlu1 %v2873_v32, %s2970_s21  ;;  %v2875_v20 = vpop.eup %2874 }
0x137a   :  { %v1742_v26 = vadd.f32 1.0, %v2875_v20  ;;  %v2877_v15 = vpop.eup %2876 }
0x137b   :  { %v2253_v33 = vadd.f32 1.0, %v2877_v15 }
0x137c   :  { %2878 = vrcp.f32 %v1742_v26 }
0x137d   :  { %2880 = vrcp.f32 %v2253_v33 }
0x1386   :  { %v2879_v54 = vpop.eup %2878 }
0x1387   :  { %v2881_v60 = vpop.eup %2880  ;;  %v1749_v8 = vmul.f32 %v2879_v54, %v1747_v0 }
0x1388   :  { %v2260_v57 = vmul.f32 %v2881_v60, %v2258_v47 }
0x13e7   :  { %v1752_v51 = vpop.permute.xlu0 %1751 }
0x13e8   :  { %v1754_v9 = vmul.f32 %v2879_v54, %v1752_v51 }
0x13ea   :  { %1756 = vrot.lane.b32.xlu0 %v1754_v9, %s2977_s17 }
0x13eb   :  { %v2263_v10 = vpop.permute.xlu1 %2262 }
0x13ec   :  { %v2265_v42 = vmul.f32 %v2881_v60, %v2263_v10 }
0x13ee   :  { %2267 = vrot.lane.b32.xlu1 %v2265_v42, %s2977_s17 }
0x145c   :  { %v1757_v11 = vpop.permute.xlu0 %1756 }
0x145d   :  { %v1759_v25 = vadd.f32 %v1757_v11, %v1749_v8 }
0x145f   :  { %2882 = vtanh.f32 %v1759_v25 }
0x1460   :  { %v2268_v43 = vpop.permute.xlu1 %2267 }
0x1461   :  { %v4183_v6 = vadd.f32 %v2268_v43, %v2260_v57 }
0x1463   :  { %2884 = vtanh.f32 %v4183_v6 }
0x1469   :  { %v2883_v18 = vpop.eup %2882 }
0x146a   :  { %1762 = vrot.lane.b32.xlu0 %v2883_v18, %s2977_s17 }
0x146d   :  { %v2885_v23 = vpop.eup %2884 }
0x146e   :  { %2273 = vrot.lane.b32.xlu1 %v2885_v23, %s2977_s17 }
0x14dc   :  { %v1763_v30 = vpop.permute.xlu0 %1762 }
0x14dd   :  { %v1765_v53 = vmul.f32 %v2879_v54, %v1763_v30 }
0x14df   :  { %2279 = vperm.xlu0 %2628, %v1765_v53   ;;  %2284 = vperm.xlu1 %2629, %v1765_v53  }
0x14e0   :  { %v2274_v44 = vpop.permute.xlu1 %2273 }
0x14e1   :  { %v2276_v28 = vmul.f32 %v2881_v60, %v2274_v44 }
0x14e3   :  { %2631 = vset.pattern.permute.xlu0 %v4295_v19  ;;  %2630 = vset.pattern.permute.xlu1 %v4293_v36 }
0x14e4   :  { %2294 = vperm.xlu0 %2631, %v1765_v53   ;;  %2289 = vperm.xlu1 %2630, %v1765_v53  }
0x14e8   :  { %2634 = vset.pattern.permute.xlu0 %v4293_v36  ;;  %2632 = vset.pattern.permute.xlu1 %v4307_v34 }
0x14e9   :  { %2320 = vperm.xlu0 %2634, %v2276_v28   ;;  %2310 = vperm.xlu1 %2632, %v2276_v28  }
0x14ed   :  { %2637 = vset.pattern.permute.xlu0 %v4309_v49  ;;  %2633 = vset.pattern.permute.xlu1 %v4308_v45 }
0x14ee   :  { %2330 = vperm.xlu0 %2637, %v2276_v28   ;;  %2315 = vperm.xlu1 %2633, %v2276_v28  }
0x14f2   :  { %2635 = vset.pattern.permute.xlu1 %v4295_v19 }
0x14f3   :  { %2325 = vperm.xlu1 %2635, %v2276_v28  }
0x14f7   :  { %2636 = vset.pattern.permute.xlu1 %v4309_v49 }
0x14f8   :  { %2299 = vperm.xlu1 %2636, %v1765_v53  }
0x155e   :  { %v2285_v39 = vpop.permute.xlu1 %2284  ;;  %v2280_v40 = vpop.permute.xlu0 %2279 }
0x155f   :  { %v2282_v56 = vmul.f32 %v4154_v48, %v2280_v40  ;;  %v2287_v19 = vmul.f32 %v4137_v21, %v2285_v39 }
0x1563   :  { %v2290_v17 = vpop.permute.xlu1 %2289  ;;  %v2295_v36 = vpop.permute.xlu0 %2294 }
0x1564   :  { %v2297_v62 = vmul.f32 %v4131_v46, %v2295_v36  ;;  %v2292_v61 = vmul.f32 %v4144_v31, %v2290_v17  ;;  %v2303_v46 = vadd.f32 %v2287_v19, %v2282_v56 }
0x1566   :  { %v2304_v52 = vadd.f32 %v2297_v62, %v2292_v61 }
0x1568   :  { %v2311_v1 = vpop.permute.xlu1 %2310  ;;  %v2321_v41 = vpop.permute.xlu0 %2320  ;;  %v2305_v24 = vadd.f32 %v2304_v52, %v2303_v46 }
0x1569   :  { %v2323_v49 = vmul.f32 %v3922_v5, %v2321_v41  ;;  %v2313_v14 = vmul.f32 %v3905_v29, %v2311_v1 }
0x156d   :  { %v2316_v34 = vpop.permute.xlu1 %2315  ;;  %v2331_v50 = vpop.permute.xlu0 %2330 }
0x156e   :  { %v2318_v45 = vmul.f32 %v3913_v4, %v2316_v34  ;;  %v2333_v31 = vmul.f32 %v3944_v59, %v2331_v50 }
0x1570   :  { %v2334_v3 = vadd.f32 %v2318_v45, %v2313_v14 }
0x1572   :  { %v2326_v2 = vpop.permute.xlu1 %2325 }
0x1573   :  { %v2328_v37 = vmul.f32 %v3928_v22, %v2326_v2 }
0x1575   :  { %v2335_v16 = vadd.f32 %v2328_v37, %v2323_v49 }
0x1577   :  { %v2336_v13 = vadd.f32 %v2335_v16, %v2334_v3  ;;  %v2300_v4 = vpop.permute.xlu1 %2299 }
0x1578   :  { %v2302_v48 = vmul.f32 %v4166_v55, %v2300_v4  ;;  %v2473_v55 = vld [vmem:[%s4219_s1 + $0x2b] ss:$0 sm:$0xff]  ;;  %s2979_s1 = smov 123  }
0x1579   :  { %v2337_v21 = vadd.f32 %v2336_v13, %v2333_v31 }
0x157a   :  { %v2306_v63 = vadd.f32 %v2305_v24, %v2302_v48 }
0x157b   :  { %v2339_v58 = vrot.slane %v2337_v21, 6 }
0x157c   :  { %v2307_v5 = vadd.f32 %v4174_v35, %v2306_v63  ;;  %v2350_v35 = vrot.slane %v4183_v6, 6 }
0x157e   :  { %v2341_v29 = vadd.f32 %v2339_v58, %v2307_v5 }
0x1580   :  { %2886 = vtanh.f32 %v2341_v29  ;;  %v2472_v7 = vmul.f32 -1.442695, %v2341_v29 }
0x1582   :  { %2888 = vpow2.f32 %v2472_v7 }
0x158a   :  { %v2887_v22 = vpop.eup %2886 }
0x158b   :  { %2354 = vrot.lane.b32.xlu1 %v2887_v22, %s2970_s21  ;;  %s2978_s21 = smov 118  }
0x158c   :  { %v2889_v27 = vpop.eup %2888 }
0x158d   :  { %v2345_v32 = vadd.f32 1.0, %v2889_v27 }
0x158f   :  { %2890 = vrcp.f32 %v2345_v32 }
0x1599   :  { %v2891_v59 = vpop.eup %2890 }
0x159a   :  { %v2352_v20 = vmul.f32 %v2891_v59, %v2350_v35 }
0x15fd   :  { %v2355_v12 = vpop.permute.xlu1 %2354 }
0x15fe   :  { %v2357_v38 = vmul.f32 %v2891_v59, %v2355_v12 }
0x1600   :  { %2359 = vrot.lane.b32.xlu1 %v2357_v38, %s2977_s17 }
0x1604   :  { %2375 = vrot.lane.b32.xlu1 %v2473_v55, %s2973_s22 }
0x1672   :  { %v2360_v26 = vpop.permute.xlu1 %2359 }
0x1673   :  { %v2362_v15 = vadd.f32 %v2360_v26, %v2352_v20 }
0x1675   :  { %2892 = vtanh.f32 %v2362_v15 }
0x1676   :  { %v2376_v51 = vpop.permute.xlu1 %2375 }
0x167f   :  { %v2893_v33 = vpop.eup %2892 }
0x1680   :  { %2365 = vrot.lane.b32.xlu0 %v2893_v33, %s2977_s17 }
0x16f2   :  { %v2366_v54 = vpop.permute.xlu0 %2365 }
0x16f3   :  { %v2368_v9 = vmul.f32 %v2891_v59, %v2366_v54 }
0x16f5   :  { %v2378_v60 = vmul.f32 %v2376_v51, %v2368_v9 }
0x16f7   :  { %2380 = vrot.lane.b32.xlu0 %v2378_v60, %s2978_s21 }
0x1769   :  { %v2381_v10 = vpop.permute.xlu0 %2380 }
0x176a   :  { %v2384_v42 = vsel %vm2383_vm0, %v2381_v10, 0.0 }
0x176b   :  { %2385 = vadd.xlane.f32.xlu1 %v2384_v42 }
0x17f8   :  { %v2386_v0 = vpop.xlane.xlu1 %2385 }
0x17f9   :  { %v2387_v8 = vadd.f32 %v2473_v55, %v2386_v0 }
0x17fb   :  { %2389 = vrot.lane.b32.xlu0 %v2387_v8, %s2979_s1 }
0x186d   :  { %v2390_v11 = vpop.permute.xlu0 %2389 }
0x186e   :  { %2393 = vst.msk [vmem:[%s4220_s2 - $0x6] sm:$0xc0] %vm2392_vm1, %v2390_v11 }

</bundles_post_ra>
